<compile_context>
chip_gen: v6e
topology: v6e:2x2x1
jax: 0.10.0
libtpu: 0.0.40
codegen_flags: <defaults>
</compile_context>

<pallas_src>
import numpy as np

import jax
import jax.numpy as jnp
from jax.experimental import pallas as pl
from jax.experimental.pallas import tpu as pltpu


TB = 8   # images per grid step: conv1 gets 8*32 = 256 rows (full MXU on v6e/v7x)


# ----------------------------------------------------------------------------
# Fused forward kernel: TB images per grid step, weights resident in VMEM
# ----------------------------------------------------------------------------
def _fused_forward_kernel(x_ref,
                          m1_ref, bc1_ref, wsel1_ref, hsel1_ref,
                          m2_ref, bc2_ref, wsel2_ref, hsel2_ref,
                          wf1_ref, bf1_ref, wf2_ref, bf2_ref,
                          o_ref):
    f32 = jnp.float32
    bf16 = jnp.bfloat16
    tb = x_ref.shape[0]

    def dot(a, b):
        # bf16 operands on the MXU, f32 accumulation.
        return jnp.dot(a.astype(bf16), b.astype(bf16), preferred_element_type=f32)

    def conv3x3_relu(a, m_ref, b_ref, h):
        # a: (tb*h, W*Cin) row slab, image-major rows (row = img*h + y).
        # m_ref: (3, W*Cin, W*Cout) band matrices (W zero-padding folded in).
        # H zero-padding: sublane roll (+/-1) on the XLU + boundary row mask.
        rows = a.shape[0]
        y = jax.lax.broadcasted_iota(jnp.int32, (rows, 1), 0) % h
        up = jnp.where(y == 0, 0.0, pltpu.roll(a, 1, axis=0))           # a[row-1]
        dn = jnp.where(y == h - 1, 0.0, pltpu.roll(a, rows - 1, axis=0))  # a[row+1]
        acc = dot(a, m_ref[1]) + dot(up, m_ref[0]) + dot(dn, m_ref[2])
        return jnp.maximum(acc + b_ref[...], 0.0)

    def maxpool2x2(hact, wsel_ref, hsel_ref):
        # W direction: exact 0/1 selection matmuls + max (2 pushes).
        pw = jnp.maximum(dot(hact, wsel_ref[0]), dot(hact, wsel_ref[1]))
        # H direction: roll(-1)+max puts the pair-max on even rows (XLU/VPU),
        # then a single even-row compaction matmul (1 push).
        pm = jnp.maximum(pw, pltpu.roll(pw, pw.shape[0] - 1, axis=0))
        return dot(hsel_ref[...], pm)

    # (tb, 32, 32) -> (tb*32, 32): merge leading dims, lane dim untouched.
    x = x_ref[...].reshape(tb * 32, 32)

    h1 = conv3x3_relu(x, m1_ref, bc1_ref, 32)        # (tb*32, 192) lane = x*6 + c
    p1 = maxpool2x2(h1, wsel1_ref, hsel1_ref)        # (tb*16, 96)  image-major rows
    h2 = conv3x3_relu(p1, m2_ref, bc2_ref, 16)       # (tb*16, 256) lane = x*16 + c
    p2 = maxpool2x2(h2, wsel2_ref, hsel2_ref)        # (tb*8, 128)  rows = y*tb + img

    # fc1 as ONE matmul: gather the 8 contiguous per-y row blocks (each (tb,128))
    # into a lane-dense (tb, 1024) operand and contract against the pre-permuted
    # (1024, 64) weight.
    xflat = jnp.concatenate([p2[y * tb:(y + 1) * tb, :] for y in range(8)], axis=1)
    h3 = jnp.maximum(dot(xflat, wf1_ref[...]) + bf1_ref[...], 0.0)      # (tb, 64)

    # fc2 (output padded to 128 lanes -> one dense store) + overflow-safe sigmoid.
    z = dot(h3, wf2_ref[...]) + bf2_ref[...]                            # (tb, 128)
    ez = jnp.exp(-jnp.abs(z))
    o_ref[...] = jnp.where(z >= 0, 1.0, ez) / (1.0 + ez)


# ----------------------------------------------------------------------------
# Host-side (one-time) parameter preparation
# ----------------------------------------------------------------------------
def prepare_params(params, tb=TB):
    """Transform PyTorch-convention parameters into the kernel's matrices."""
    w1, b1, w2, b2, wf1, bf1, wf2, bf2 = [np.asarray(p, np.float32) for p in params]

    def conv_band_mats(w, width):
        # M[ky, xin*Cin + c, x*Cout + o] = w[o, c, ky, xin - x + 1]
        cout, cin, _, _ = w.shape
        m = np.zeros((3, width * cin, width * cout), np.float32)
        for ky in range(3):
            for x in range(width):
                for kx in range(3):
                    xin = x + kx - 1
                    if 0 <= xin < width:
                        m[ky, xin * cin:(xin + 1) * cin,
                             x * cout:(x + 1) * cout] = w[:, :, ky, kx].T
        return m

    def wpool_sel(width, c):
        e = np.zeros((2, width * c, (width // 2) * c), np.float32)
        for xo in range(width // 2):
            for ch in range(c):
                e[0, (2 * xo) * c + ch, xo * c + ch] = 1.0
                e[1, (2 * xo + 1) * c + ch, xo * c + ch] = 1.0
        return e

    def hpool_even_sel(h, n_img, y_major):
        # After roll(-1)+max, row img*h + 2*y2 holds the H-pair max.
        e = np.zeros((n_img * (h // 2), n_img * h), np.float32)
        for img in range(n_img):
            for y2 in range(h // 2):
                r_out = (y2 * n_img + img) if y_major else (img * (h // 2) + y2)
                e[r_out, img * h + 2 * y2] = 1.0
        return e

    # conv1: 1 -> 6 on 32x32 ; conv2: 6 -> 16 on 16x16
    m1 = conv_band_mats(w1, 32)                        # (3, 32, 192)
    bc1 = np.tile(b1, 32).reshape(1, 32 * 6)
    wsel1 = wpool_sel(32, 6)                           # (2, 192, 96)
    hsel1 = hpool_even_sel(32, tb, y_major=False)      # (tb*16, tb*32)

    m2 = conv_band_mats(w2, 16)                        # (3, 96, 256)
    bc2 = np.tile(b2, 16).reshape(1, 16 * 16)
    wsel2 = wpool_sel(16, 16)                          # (2, 256, 128)
    hsel2 = hpool_even_sel(16, tb, y_major=True)       # (tb*8, tb*16), y-major rows

    # fc1: single (1024, 64) weight matching the kernel's concat order
    # xflat[img, y*128 + x*16 + c]  <->  torch flatten index  c*64 + y*8 + x.
    wf1p = np.zeros((1024, 64), np.float32)
    for y in range(8):
        for x in range(8):
            for c in range(16):
                wf1p[y * 128 + x * 16 + c, :] = wf1[:, c * 64 + y * 8 + x]
    bf1r = bf1.reshape(1, 64)

    # fc2: pad the single output unit to 128 lanes for a dense final store.
    wf2p = np.zeros((64, 128), np.float32)
    wf2p[:, 0] = wf2[0, :]
    bf2p = np.zeros((1, 128), np.float32)
    bf2p[0, 0] = bf2[0]

    bf16, f32 = jnp.bfloat16, jnp.float32
    return (jnp.asarray(m1, bf16), jnp.asarray(bc1, f32),
            jnp.asarray(wsel1, bf16), jnp.asarray(hsel1, bf16),
            jnp.asarray(m2, bf16), jnp.asarray(bc2, f32),
            jnp.asarray(wsel2, bf16), jnp.asarray(hsel2, bf16),
            jnp.asarray(wf1p, bf16), jnp.asarray(bf1r, f32),
            jnp.asarray(wf2p, bf16), jnp.asarray(bf2p, f32))


# ----------------------------------------------------------------------------
# Forward pass (single fused pallas_call, TB images per grid step)
# ----------------------------------------------------------------------------
def forward(x, prepped):
    B, C, H, W = x.shape
    assert C == 1 and H == 32 and W == 32
    b_pad = ((B + TB - 1) // TB) * TB
    x2d = x.reshape(B, H, W)
    if b_pad != B:
        x2d = jnp.pad(x2d, ((0, b_pad - B), (0, 0), (0, 0)))

    def const_spec(arr):
        nd = arr.ndim
        return pl.BlockSpec(arr.shape, lambda g, _n=nd: (0,) * _n)

    weight_bytes = sum(int(a.size) * a.dtype.itemsize for a in prepped)
    cost = pl.CostEstimate(flops=9_200_000 * b_pad,
                           transcendentals=128 * b_pad,
                           bytes_accessed=weight_bytes + b_pad * (H * W * 4 + 512))

    out = pl.pallas_call(
        _fused_forward_kernel,
        out_shape=jax.ShapeDtypeStruct((b_pad, 128), jnp.float32),
        grid=(b_pad // TB,),
        in_specs=[pl.BlockSpec((TB, H, W), lambda g: (g, 0, 0))]
                 + [const_spec(a) for a in prepped],
        out_specs=pl.BlockSpec((TB, 128), lambda g: (g, 0)),
        compiler_params=pltpu.CompilerParams(
            dimension_semantics=("parallel",),
            vmem_limit_bytes=32 * 1024 * 1024),
        cost_estimate=cost,
    )(x2d, *prepped)
    return out[:B, :1]                                 # (B, 1)


# ----------------------------------------------------------------------------
# Pure-JAX reference (mirrors the PyTorch module) for a correctness check
# ----------------------------------------------------------------------------
def reference_forward(x, params):
    w1, b1, w2, b2, wf1, bf1, wf2, bf2 = params
    dn = ("NCHW", "OIHW", "NCHW")
    hp = jax.lax.Precision.HIGHEST

    h = jax.lax.conv_general_dilated(x, w1, (1, 1), ((1, 1), (1, 1)),
                                     dimension_numbers=dn, precision=hp)
    h = jnp.maximum(h + b1.reshape(1, -1, 1, 1), 0.0)
    b, c, hh, ww = h.shape
    h = h.reshape(b, c, hh // 2, 2, ww // 2, 2).max(axis=(3, 5))

    h = jax.lax.conv_general_dilated(h, w2, (1, 1), ((1, 1), (1, 1)),
                                     dimension_numbers=dn, precision=hp)
    h = jnp.maximum(h + b2.reshape(1, -1, 1, 1), 0.0)
    b, c, hh, ww = h.shape
    h = h.reshape(b, c, hh // 2, 2, ww // 2, 2).max(axis=(3, 5))

    flat = h.reshape(b, -1)
    h3 = jnp.maximum(jnp.dot(flat, wf1.T, precision=hp) + bf1, 0.0)
    z = jnp.dot(h3, wf2.T, precision=hp) + bf2
    return jax.nn.sigmoid(z)


# ----------------------------------------------------------------------------
# Deterministic synthetic parameters (PyTorch-convention shapes)
# ----------------------------------------------------------------------------
def init_params(key):
    ks = jax.random.split(key, 8)

    def nrm(k, shape, scale):
        return (scale * jax.random.normal(k, shape)).astype(jnp.float32)

    w1 = nrm(ks[0], (6, 1, 3, 3), 0.3)      # conv1.weight
    b1 = nrm(ks[1], (6,), 0.1)              # conv1.bias
    w2 = nrm(ks[2], (16, 6, 3, 3), 0.15)    # conv2.weight
    b2 = nrm(ks[3], (16,), 0.1)             # conv2.bias
    wf1 = nrm(ks[4], (64, 1024), 0.03)      # fc1.weight (out, in)
    bf1 = nrm(ks[5], (64,), 0.1)            # fc1.bias
    wf2 = nrm(ks[6], (1, 64), 0.1)          # fc2.weight (out, in)
    bf2 = nrm(ks[7], (1,), 0.1)             # fc2.bias
    return (w1, b1, w2, b2, wf1, bf1, wf2, bf2)


if __name__ == "__main__":
    key = jax.random.PRNGKey(0)
    kx, kp = jax.random.split(key)
    # Input must be 32x32 so that after two 2x2 pools we get 16*8*8 = fc1 in-features.
    # Batch 10 -> padded to 16 -> grid of 2 "parallel" steps (exercises megacore path).
    x = jax.random.normal(kx, (10, 1, 32, 32), dtype=jnp.float32)   # NCHW
    params = init_params(kp)
    prepped = prepare_params(params)       # one-time host-side weight transform

    out = jax.jit(forward)(x, prepped)
    jax.block_until_ready(out)
    assert out.shape == (10, 1)

    ref = reference_forward(x, params)
    max_err = float(jnp.max(jnp.abs(out - ref)))
    assert max_err < 2e-2, f"kernel/reference mismatch: {max_err}"
    assert bool(jnp.all((out >= 0.0) & (out <= 1.0)))
    print("KERNEL_OK")
</pallas_src>

<mosaic_0001>
module attributes {stable_mosaic.version = 11 : i64} {
  func.func @_fused_forward_kernel(%arg0: i32, %arg1: memref<8x32x32xf32, #tpu.memory_space<vmem>>, %arg2: memref<3x32x192xbf16, #tpu.memory_space<vmem>>, %arg3: memref<1x192xf32, #tpu.memory_space<vmem>>, %arg4: memref<2x192x96xbf16, #tpu.memory_space<vmem>>, %arg5: memref<128x256xbf16, #tpu.memory_space<vmem>>, %arg6: memref<3x96x256xbf16, #tpu.memory_space<vmem>>, %arg7: memref<1x256xf32, #tpu.memory_space<vmem>>, %arg8: memref<2x256x128xbf16, #tpu.memory_space<vmem>>, %arg9: memref<64x128xbf16, #tpu.memory_space<vmem>>, %arg10: memref<1024x64xbf16, #tpu.memory_space<vmem>>, %arg11: memref<1x64xf32, #tpu.memory_space<vmem>>, %arg12: memref<64x128xbf16, #tpu.memory_space<vmem>>, %arg13: memref<1x128xf32, #tpu.memory_space<vmem>>, %arg14: memref<8x128xf32, #tpu.memory_space<vmem>>) attributes {dimension_semantics = [#tpu.dimension_semantics<parallel>], iteration_bounds = array<i64: 2>, scalar_prefetch = 0 : i64, scratch_operands = 0 : i64, tpu.core_type = #tpu.core_type<tc>, window_params = [{transform_indices = @transform_0, window_bounds = array<i64: 8, 32, 32>}, {pipeline_mode = #tpu.pipeline_mode<synchronous>, transform_indices = @transform_1, window_bounds = array<i64: 3, 32, 192>}, {pipeline_mode = #tpu.pipeline_mode<synchronous>, transform_indices = @transform_2, window_bounds = array<i64: 1, 192>}, {pipeline_mode = #tpu.pipeline_mode<synchronous>, transform_indices = @transform_3, window_bounds = array<i64: 2, 192, 96>}, {pipeline_mode = #tpu.pipeline_mode<synchronous>, transform_indices = @transform_4, window_bounds = array<i64: 128, 256>}, {pipeline_mode = #tpu.pipeline_mode<synchronous>, transform_indices = @transform_5, window_bounds = array<i64: 3, 96, 256>}, {pipeline_mode = #tpu.pipeline_mode<synchronous>, transform_indices = @transform_6, window_bounds = array<i64: 1, 256>}, {pipeline_mode = #tpu.pipeline_mode<synchronous>, transform_indices = @transform_7, window_bounds = array<i64: 2, 256, 128>}, {pipeline_mode = #tpu.pipeline_mode<synchronous>, transform_indices = @transform_8, window_bounds = array<i64: 64, 128>}, {pipeline_mode = #tpu.pipeline_mode<synchronous>, transform_indices = @transform_9, window_bounds = array<i64: 1024, 64>}, {pipeline_mode = #tpu.pipeline_mode<synchronous>, transform_indices = @transform_10, window_bounds = array<i64: 1, 64>}, {pipeline_mode = #tpu.pipeline_mode<synchronous>, transform_indices = @transform_11, window_bounds = array<i64: 64, 128>}, {pipeline_mode = #tpu.pipeline_mode<synchronous>, transform_indices = @transform_12, window_bounds = array<i64: 1, 128>}, {transform_indices = @transform_13, window_bounds = array<i64: 8, 128>}]} {
    %c0 = arith.constant 0 : index
    %c0_0 = arith.constant 0 : index
    %c0_1 = arith.constant 0 : index
    %0 = vector.load %arg1[%c0, %c0_0, %c0_1] : memref<8x32x32xf32, #tpu.memory_space<vmem>>, vector<8x32x32xf32>
    %1 = vector.shape_cast %0 : vector<8x32x32xf32> to vector<256x32xf32>
    %2 = tpu.iota {dimensions = array<i32: 0>} : vector<256x1xi32>
    %c32_i32 = arith.constant 32 : i32
    %c0_i32 = arith.constant 0 : i32
    %3 = arith.cmpi eq, %c32_i32, %c0_i32 : i32
    %c1_i32 = arith.constant 1 : i32
    %4 = arith.select %3, %c1_i32, %c32_i32 : i32
    %5 = vector.broadcast %4 : i32 to vector<256x1xi32>
    %6 = arith.remsi %2, %5 : vector<256x1xi32>
    %c0_i32_2 = arith.constant 0 : i32
    %7 = vector.broadcast %c0_i32_2 : i32 to vector<256x1xi32>
    %8 = arith.cmpi ne, %6, %7 : vector<256x1xi32>
    %c0_i32_3 = arith.constant 0 : i32
    %9 = vector.broadcast %c0_i32_3 : i32 to vector<256x1xi32>
    %10 = arith.cmpi slt, %6, %9 : vector<256x1xi32>
    %c0_i32_4 = arith.constant 0 : i32
    %11 = arith.cmpi slt, %4, %c0_i32_4 : i32
    %12 = vector.broadcast %11 : i1 to vector<256x1xi1>
    %13 = vector.broadcast %12 : vector<256x1xi1> to vector<256x1xi1>
    %14 = arith.xori %10, %13 : vector<256x1xi1>
    %15 = arith.andi %14, %8 : vector<256x1xi1>
    %16 = vector.broadcast %4 : i32 to vector<256x1xi32>
    %17 = arith.addi %6, %16 : vector<256x1xi32>
    %18 = arith.select %15, %17, %6 : vector<256x1xi1>, vector<256x1xi32>
    %c0_i32_5 = arith.constant 0 : i32
    %19 = vector.broadcast %c0_i32_5 : i32 to vector<256x1xi32>
    %20 = arith.cmpi eq, %18, %19 : vector<256x1xi32>
    %c1_i32_6 = arith.constant 1 : i32
    %21 = tpu.dynamic_rotate %1 by %c1_i32_6 dim 0 : vector<256x32xf32>, i32 -> vector<256x32xf32>
    %cst = arith.constant 0.000000e+00 : f32
    %22 = vector.shape_cast %20 : vector<256x1xi1> to vector<256x1xi1>
    %23 = vector.broadcast %22 : vector<256x1xi1> to vector<256x32xi1>
    %24 = vector.broadcast %cst : f32 to vector<256x32xf32>
    %25 = arith.select %23, %24, %21 : vector<256x32xi1>, vector<256x32xf32>
    %c31_i32 = arith.constant 31 : i32
    %26 = vector.broadcast %c31_i32 : i32 to vector<256x1xi32>
    %27 = arith.cmpi eq, %18, %26 : vector<256x1xi32>
    %c255_i32 = arith.constant 255 : i32
    %28 = tpu.dynamic_rotate %1 by %c255_i32 dim 0 : vector<256x32xf32>, i32 -> vector<256x32xf32>
    %cst_7 = arith.constant 0.000000e+00 : f32
    %29 = vector.shape_cast %27 : vector<256x1xi1> to vector<256x1xi1>
    %30 = vector.broadcast %29 : vector<256x1xi1> to vector<256x32xi1>
    %31 = vector.broadcast %cst_7 : f32 to vector<256x32xf32>
    %32 = arith.select %30, %31, %28 : vector<256x32xi1>, vector<256x32xf32>
    %c1 = arith.constant 1 : index
    %c0_8 = arith.constant 0 : index
    %c0_9 = arith.constant 0 : index
    %33 = vector.load %arg2[%c1, %c0_8, %c0_9] : memref<3x32x192xbf16, #tpu.memory_space<vmem>>, vector<1x32x192xbf16>
    %34 = vector.shape_cast %33 : vector<1x32x192xbf16> to vector<32x192xbf16>
    %35 = arith.truncf %1 : vector<256x32xf32> to vector<256x32xbf16>
    %cst_10 = arith.constant dense<0.000000e+00> : vector<256x192xf32>
    %36 = tpu.matmul %35, %34, %cst_10 {dimension_numbers = #tpu.dot_dimension_numbers<[1], [0], [0], [1], [0, 0, 1, 1], [], []>} : vector<256x32xbf16>, vector<32x192xbf16>, vector<256x192xf32> -> vector<256x192xf32>
    %c0_11 = arith.constant 0 : index
    %c0_12 = arith.constant 0 : index
    %c0_13 = arith.constant 0 : index
    %37 = vector.load %arg2[%c0_11, %c0_12, %c0_13] : memref<3x32x192xbf16, #tpu.memory_space<vmem>>, vector<1x32x192xbf16>
    %38 = vector.shape_cast %37 : vector<1x32x192xbf16> to vector<32x192xbf16>
    %39 = arith.truncf %25 : vector<256x32xf32> to vector<256x32xbf16>
    %cst_14 = arith.constant dense<0.000000e+00> : vector<256x192xf32>
    %40 = tpu.matmul %39, %38, %cst_14 {dimension_numbers = #tpu.dot_dimension_numbers<[1], [0], [0], [1], [0, 0, 1, 1], [], []>} : vector<256x32xbf16>, vector<32x192xbf16>, vector<256x192xf32> -> vector<256x192xf32>
    %41 = arith.addf %36, %40 : vector<256x192xf32>
    %c2 = arith.constant 2 : index
    %c0_15 = arith.constant 0 : index
    %c0_16 = arith.constant 0 : index
    %42 = vector.load %arg2[%c2, %c0_15, %c0_16] : memref<3x32x192xbf16, #tpu.memory_space<vmem>>, vector<1x32x192xbf16>
    %43 = vector.shape_cast %42 : vector<1x32x192xbf16> to vector<32x192xbf16>
    %44 = arith.truncf %32 : vector<256x32xf32> to vector<256x32xbf16>
    %cst_17 = arith.constant dense<0.000000e+00> : vector<256x192xf32>
    %45 = tpu.matmul %44, %43, %cst_17 {dimension_numbers = #tpu.dot_dimension_numbers<[1], [0], [0], [1], [0, 0, 1, 1], [], []>} : vector<256x32xbf16>, vector<32x192xbf16>, vector<256x192xf32> -> vector<256x192xf32>
    %46 = arith.addf %41, %45 : vector<256x192xf32>
    %c0_18 = arith.constant 0 : index
    %c0_19 = arith.constant 0 : index
    %47 = vector.load %arg3[%c0_18, %c0_19] : memref<1x192xf32, #tpu.memory_space<vmem>>, vector<1x192xf32>
    %48 = vector.broadcast %47 : vector<1x192xf32> to vector<256x192xf32>
    %49 = arith.addf %46, %48 : vector<256x192xf32>
    %cst_20 = arith.constant 0.000000e+00 : f32
    %50 = vector.broadcast %cst_20 : f32 to vector<256x192xf32>
    %51 = arith.maximumf %49, %50 : vector<256x192xf32>
    %c0_21 = arith.constant 0 : index
    %c0_22 = arith.constant 0 : index
    %c0_23 = arith.constant 0 : index
    %52 = vector.load %arg4[%c0_21, %c0_22, %c0_23] : memref<2x192x96xbf16, #tpu.memory_space<vmem>>, vector<1x192x96xbf16>
    %53 = vector.shape_cast %52 : vector<1x192x96xbf16> to vector<192x96xbf16>
    %54 = arith.truncf %51 : vector<256x192xf32> to vector<256x192xbf16>
    %cst_24 = arith.constant dense<0.000000e+00> : vector<256x96xf32>
    %55 = tpu.matmul %54, %53, %cst_24 {dimension_numbers = #tpu.dot_dimension_numbers<[1], [0], [0], [1], [0, 0, 1, 1], [], []>} : vector<256x192xbf16>, vector<192x96xbf16>, vector<256x96xf32> -> vector<256x96xf32>
    %c1_25 = arith.constant 1 : index
    %c0_26 = arith.constant 0 : index
    %c0_27 = arith.constant 0 : index
    %56 = vector.load %arg4[%c1_25, %c0_26, %c0_27] : memref<2x192x96xbf16, #tpu.memory_space<vmem>>, vector<1x192x96xbf16>
    %57 = vector.shape_cast %56 : vector<1x192x96xbf16> to vector<192x96xbf16>
    %58 = arith.truncf %51 : vector<256x192xf32> to vector<256x192xbf16>
    %cst_28 = arith.constant dense<0.000000e+00> : vector<256x96xf32>
    %59 = tpu.matmul %58, %57, %cst_28 {dimension_numbers = #tpu.dot_dimension_numbers<[1], [0], [0], [1], [0, 0, 1, 1], [], []>} : vector<256x192xbf16>, vector<192x96xbf16>, vector<256x96xf32> -> vector<256x96xf32>
    %60 = arith.maximumf %55, %59 : vector<256x96xf32>
    %c255_i32_29 = arith.constant 255 : i32
    %61 = tpu.dynamic_rotate %60 by %c255_i32_29 dim 0 : vector<256x96xf32>, i32 -> vector<256x96xf32>
    %62 = arith.maximumf %60, %61 : vector<256x96xf32>
    %c0_30 = arith.constant 0 : index
    %c0_31 = arith.constant 0 : index
    %63 = vector.load %arg5[%c0_30, %c0_31] : memref<128x256xbf16, #tpu.memory_space<vmem>>, vector<128x256xbf16>
    %64 = arith.truncf %62 : vector<256x96xf32> to vector<256x96xbf16>
    %cst_32 = arith.constant dense<0.000000e+00> : vector<128x96xf32>
    %65 = tpu.matmul %63, %64, %cst_32 {dimension_numbers = #tpu.dot_dimension_numbers<[1], [0], [0], [1], [0, 0, 1, 1], [], []>} : vector<128x256xbf16>, vector<256x96xbf16>, vector<128x96xf32> -> vector<128x96xf32>
    %66 = tpu.iota {dimensions = array<i32: 0>} : vector<128x1xi32>
    %c16_i32 = arith.constant 16 : i32
    %c0_i32_33 = arith.constant 0 : i32
    %67 = arith.cmpi eq, %c16_i32, %c0_i32_33 : i32
    %c1_i32_34 = arith.constant 1 : i32
    %68 = arith.select %67, %c1_i32_34, %c16_i32 : i32
    %69 = vector.broadcast %68 : i32 to vector<128x1xi32>
    %70 = arith.remsi %66, %69 : vector<128x1xi32>
    %c0_i32_35 = arith.constant 0 : i32
    %71 = vector.broadcast %c0_i32_35 : i32 to vector<128x1xi32>
    %72 = arith.cmpi ne, %70, %71 : vector<128x1xi32>
    %c0_i32_36 = arith.constant 0 : i32
    %73 = vector.broadcast %c0_i32_36 : i32 to vector<128x1xi32>
    %74 = arith.cmpi slt, %70, %73 : vector<128x1xi32>
    %c0_i32_37 = arith.constant 0 : i32
    %75 = arith.cmpi slt, %68, %c0_i32_37 : i32
    %76 = vector.broadcast %75 : i1 to vector<128x1xi1>
    %77 = vector.broadcast %76 : vector<128x1xi1> to vector<128x1xi1>
    %78 = arith.xori %74, %77 : vector<128x1xi1>
    %79 = arith.andi %78, %72 : vector<128x1xi1>
    %80 = vector.broadcast %68 : i32 to vector<128x1xi32>
    %81 = arith.addi %70, %80 : vector<128x1xi32>
    %82 = arith.select %79, %81, %70 : vector<128x1xi1>, vector<128x1xi32>
    %c0_i32_38 = arith.constant 0 : i32
    %83 = vector.broadcast %c0_i32_38 : i32 to vector<128x1xi32>
    %84 = arith.cmpi eq, %82, %83 : vector<128x1xi32>
    %c1_i32_39 = arith.constant 1 : i32
    %85 = tpu.dynamic_rotate %65 by %c1_i32_39 dim 0 : vector<128x96xf32>, i32 -> vector<128x96xf32>
    %cst_40 = arith.constant 0.000000e+00 : f32
    %86 = vector.shape_cast %84 : vector<128x1xi1> to vector<128x1xi1>
    %87 = vector.broadcast %86 : vector<128x1xi1> to vector<128x96xi1>
    %88 = vector.broadcast %cst_40 : f32 to vector<128x96xf32>
    %89 = arith.select %87, %88, %85 : vector<128x96xi1>, vector<128x96xf32>
    %c15_i32 = arith.constant 15 : i32
    %90 = vector.broadcast %c15_i32 : i32 to vector<128x1xi32>
    %91 = arith.cmpi eq, %82, %90 : vector<128x1xi32>
    %c127_i32 = arith.constant 127 : i32
    %92 = tpu.dynamic_rotate %65 by %c127_i32 dim 0 : vector<128x96xf32>, i32 -> vector<128x96xf32>
    %cst_41 = arith.constant 0.000000e+00 : f32
    %93 = vector.shape_cast %91 : vector<128x1xi1> to vector<128x1xi1>
    %94 = vector.broadcast %93 : vector<128x1xi1> to vector<128x96xi1>
    %95 = vector.broadcast %cst_41 : f32 to vector<128x96xf32>
    %96 = arith.select %94, %95, %92 : vector<128x96xi1>, vector<128x96xf32>
    %c1_42 = arith.constant 1 : index
    %c0_43 = arith.constant 0 : index
    %c0_44 = arith.constant 0 : index
    %97 = vector.load %arg6[%c1_42, %c0_43, %c0_44] : memref<3x96x256xbf16, #tpu.memory_space<vmem>>, vector<1x96x256xbf16>
    %98 = vector.shape_cast %97 : vector<1x96x256xbf16> to vector<96x256xbf16>
    %99 = arith.truncf %65 : vector<128x96xf32> to vector<128x96xbf16>
    %cst_45 = arith.constant dense<0.000000e+00> : vector<128x256xf32>
    %100 = tpu.matmul %99, %98, %cst_45 {dimension_numbers = #tpu.dot_dimension_numbers<[1], [0], [0], [1], [0, 0, 1, 1], [], []>} : vector<128x96xbf16>, vector<96x256xbf16>, vector<128x256xf32> -> vector<128x256xf32>
    %c0_46 = arith.constant 0 : index
    %c0_47 = arith.constant 0 : index
    %c0_48 = arith.constant 0 : index
    %101 = vector.load %arg6[%c0_46, %c0_47, %c0_48] : memref<3x96x256xbf16, #tpu.memory_space<vmem>>, vector<1x96x256xbf16>
    %102 = vector.shape_cast %101 : vector<1x96x256xbf16> to vector<96x256xbf16>
    %103 = arith.truncf %89 : vector<128x96xf32> to vector<128x96xbf16>
    %cst_49 = arith.constant dense<0.000000e+00> : vector<128x256xf32>
    %104 = tpu.matmul %103, %102, %cst_49 {dimension_numbers = #tpu.dot_dimension_numbers<[1], [0], [0], [1], [0, 0, 1, 1], [], []>} : vector<128x96xbf16>, vector<96x256xbf16>, vector<128x256xf32> -> vector<128x256xf32>
    %105 = arith.addf %100, %104 : vector<128x256xf32>
    %c2_50 = arith.constant 2 : index
    %c0_51 = arith.constant 0 : index
    %c0_52 = arith.constant 0 : index
    %106 = vector.load %arg6[%c2_50, %c0_51, %c0_52] : memref<3x96x256xbf16, #tpu.memory_space<vmem>>, vector<1x96x256xbf16>
    %107 = vector.shape_cast %106 : vector<1x96x256xbf16> to vector<96x256xbf16>
    %108 = arith.truncf %96 : vector<128x96xf32> to vector<128x96xbf16>
    %cst_53 = arith.constant dense<0.000000e+00> : vector<128x256xf32>
    %109 = tpu.matmul %108, %107, %cst_53 {dimension_numbers = #tpu.dot_dimension_numbers<[1], [0], [0], [1], [0, 0, 1, 1], [], []>} : vector<128x96xbf16>, vector<96x256xbf16>, vector<128x256xf32> -> vector<128x256xf32>
    %110 = arith.addf %105, %109 : vector<128x256xf32>
    %c0_54 = arith.constant 0 : index
    %c0_55 = arith.constant 0 : index
    %111 = vector.load %arg7[%c0_54, %c0_55] : memref<1x256xf32, #tpu.memory_space<vmem>>, vector<1x256xf32>
    %112 = vector.broadcast %111 : vector<1x256xf32> to vector<128x256xf32>
    %113 = arith.addf %110, %112 : vector<128x256xf32>
    %cst_56 = arith.constant 0.000000e+00 : f32
    %114 = vector.broadcast %cst_56 : f32 to vector<128x256xf32>
    %115 = arith.maximumf %113, %114 : vector<128x256xf32>
    %c0_57 = arith.constant 0 : index
    %c0_58 = arith.constant 0 : index
    %c0_59 = arith.constant 0 : index
    %116 = vector.load %arg8[%c0_57, %c0_58, %c0_59] : memref<2x256x128xbf16, #tpu.memory_space<vmem>>, vector<1x256x128xbf16>
    %117 = vector.shape_cast %116 : vector<1x256x128xbf16> to vector<256x128xbf16>
    %118 = arith.truncf %115 : vector<128x256xf32> to vector<128x256xbf16>
    %cst_60 = arith.constant dense<0.000000e+00> : vector<128x128xf32>
    %119 = tpu.matmul %118, %117, %cst_60 {dimension_numbers = #tpu.dot_dimension_numbers<[1], [0], [0], [1], [0, 0, 1, 1], [], []>} : vector<128x256xbf16>, vector<256x128xbf16>, vector<128x128xf32> -> vector<128x128xf32>
    %c1_61 = arith.constant 1 : index
    %c0_62 = arith.constant 0 : index
    %c0_63 = arith.constant 0 : index
    %120 = vector.load %arg8[%c1_61, %c0_62, %c0_63] : memref<2x256x128xbf16, #tpu.memory_space<vmem>>, vector<1x256x128xbf16>
    %121 = vector.shape_cast %120 : vector<1x256x128xbf16> to vector<256x128xbf16>
    %122 = arith.truncf %115 : vector<128x256xf32> to vector<128x256xbf16>
    %cst_64 = arith.constant dense<0.000000e+00> : vector<128x128xf32>
    %123 = tpu.matmul %122, %121, %cst_64 {dimension_numbers = #tpu.dot_dimension_numbers<[1], [0], [0], [1], [0, 0, 1, 1], [], []>} : vector<128x256xbf16>, vector<256x128xbf16>, vector<128x128xf32> -> vector<128x128xf32>
    %124 = arith.maximumf %119, %123 : vector<128x128xf32>
    %c127_i32_65 = arith.constant 127 : i32
    %125 = tpu.dynamic_rotate %124 by %c127_i32_65 dim 0 : vector<128x128xf32>, i32 -> vector<128x128xf32>
    %126 = arith.maximumf %124, %125 : vector<128x128xf32>
    %c0_66 = arith.constant 0 : index
    %c0_67 = arith.constant 0 : index
    %127 = vector.load %arg9[%c0_66, %c0_67] : memref<64x128xbf16, #tpu.memory_space<vmem>>, vector<64x128xbf16>
    %128 = arith.truncf %126 : vector<128x128xf32> to vector<128x128xbf16>
    %cst_68 = arith.constant dense<0.000000e+00> : vector<64x128xf32>
    %129 = tpu.matmul %127, %128, %cst_68 {dimension_numbers = #tpu.dot_dimension_numbers<[1], [0], [0], [1], [0, 0, 1, 1], [], []>} : vector<64x128xbf16>, vector<128x128xbf16>, vector<64x128xf32> -> vector<64x128xf32>
    %130 = vector.extract_strided_slice %129 {offsets = [0, 0], sizes = [8, 128], strides = [1, 1]} : vector<64x128xf32> to vector<8x128xf32>
    %131 = vector.extract_strided_slice %129 {offsets = [8, 0], sizes = [8, 128], strides = [1, 1]} : vector<64x128xf32> to vector<8x128xf32>
    %132 = vector.extract_strided_slice %129 {offsets = [16, 0], sizes = [8, 128], strides = [1, 1]} : vector<64x128xf32> to vector<8x128xf32>
    %133 = vector.extract_strided_slice %129 {offsets = [24, 0], sizes = [8, 128], strides = [1, 1]} : vector<64x128xf32> to vector<8x128xf32>
    %134 = vector.extract_strided_slice %129 {offsets = [32, 0], sizes = [8, 128], strides = [1, 1]} : vector<64x128xf32> to vector<8x128xf32>
    %135 = vector.extract_strided_slice %129 {offsets = [40, 0], sizes = [8, 128], strides = [1, 1]} : vector<64x128xf32> to vector<8x128xf32>
    %136 = vector.extract_strided_slice %129 {offsets = [48, 0], sizes = [8, 128], strides = [1, 1]} : vector<64x128xf32> to vector<8x128xf32>
    %137 = vector.extract_strided_slice %129 {offsets = [56, 0], sizes = [8, 128], strides = [1, 1]} : vector<64x128xf32> to vector<8x128xf32>
    %138 = tpu.concatenate %130, %131, %132, %133, %134, %135, %136, %137 in 1 : vector<8x128xf32>, vector<8x128xf32>, vector<8x128xf32>, vector<8x128xf32>, vector<8x128xf32>, vector<8x128xf32>, vector<8x128xf32>, vector<8x128xf32> -> vector<8x1024xf32>
    %c0_69 = arith.constant 0 : index
    %c0_70 = arith.constant 0 : index
    %139 = vector.load %arg10[%c0_69, %c0_70] : memref<1024x64xbf16, #tpu.memory_space<vmem>>, vector<1024x64xbf16>
    %140 = arith.truncf %138 : vector<8x1024xf32> to vector<8x1024xbf16>
    %cst_71 = arith.constant dense<0.000000e+00> : vector<8x64xf32>
    %141 = tpu.matmul %140, %139, %cst_71 {dimension_numbers = #tpu.dot_dimension_numbers<[1], [0], [0], [1], [0, 0, 1, 1], [], []>} : vector<8x1024xbf16>, vector<1024x64xbf16>, vector<8x64xf32> -> vector<8x64xf32>
    %c0_72 = arith.constant 0 : index
    %c0_73 = arith.constant 0 : index
    %142 = vector.load %arg11[%c0_72, %c0_73] : memref<1x64xf32, #tpu.memory_space<vmem>>, vector<1x64xf32>
    %143 = vector.broadcast %142 : vector<1x64xf32> to vector<8x64xf32>
    %144 = arith.addf %141, %143 : vector<8x64xf32>
    %cst_74 = arith.constant 0.000000e+00 : f32
    %145 = vector.broadcast %cst_74 : f32 to vector<8x64xf32>
    %146 = arith.maximumf %144, %145 : vector<8x64xf32>
    %c0_75 = arith.constant 0 : index
    %c0_76 = arith.constant 0 : index
    %147 = vector.load %arg12[%c0_75, %c0_76] : memref<64x128xbf16, #tpu.memory_space<vmem>>, vector<64x128xbf16>
    %148 = arith.truncf %146 : vector<8x64xf32> to vector<8x64xbf16>
    %cst_77 = arith.constant dense<0.000000e+00> : vector<8x128xf32>
    %149 = tpu.matmul %148, %147, %cst_77 {dimension_numbers = #tpu.dot_dimension_numbers<[1], [0], [0], [1], [0, 0, 1, 1], [], []>} : vector<8x64xbf16>, vector<64x128xbf16>, vector<8x128xf32> -> vector<8x128xf32>
    %c0_78 = arith.constant 0 : index
    %c0_79 = arith.constant 0 : index
    %150 = vector.load %arg13[%c0_78, %c0_79] : memref<1x128xf32, #tpu.memory_space<vmem>>, vector<1x128xf32>
    %151 = vector.broadcast %150 : vector<1x128xf32> to vector<8x128xf32>
    %152 = arith.addf %149, %151 : vector<8x128xf32>
    %153 = math.absf %152 : vector<8x128xf32>
    %cst_80 = arith.constant 0.000000e+00 : f32
    %154 = vector.broadcast %cst_80 : f32 to vector<8x128xf32>
    %155 = arith.subf %154, %153 : vector<8x128xf32>
    %156 = math.exp %155 : vector<8x128xf32>
    %cst_81 = arith.constant 0.000000e+00 : f32
    %157 = vector.broadcast %cst_81 : f32 to vector<8x128xf32>
    %158 = arith.cmpf oge, %152, %157 : vector<8x128xf32>
    %cst_82 = arith.constant 1.000000e+00 : f32
    %159 = vector.broadcast %cst_82 : f32 to vector<8x128xf32>
    %160 = arith.select %158, %159, %156 : vector<8x128xi1>, vector<8x128xf32>
    %cst_83 = arith.constant 1.000000e+00 : f32
    %161 = vector.broadcast %cst_83 : f32 to vector<8x128xf32>
    %162 = arith.addf %161, %156 : vector<8x128xf32>
    %163 = arith.divf %160, %162 : vector<8x128xf32>
    %c0_84 = arith.constant 0 : index
    %c0_85 = arith.constant 0 : index
    %164 = vector.load %arg14[%c0_84, %c0_85] : memref<8x128xf32, #tpu.memory_space<vmem>>, vector<8x128xf32>
    tpu.vector_store %arg14[%c0_84, %c0_85], %163 {strides = array<i32>} : memref<8x128xf32, #tpu.memory_space<vmem>>, vector<8x128xf32>,
    return
  }
  func.func @transform_0(%arg0: i32) -> (i32, i32, i32) {
    %c0_i32 = arith.constant 0 : i32
    %c0_i32_0 = arith.constant 0 : i32
    %c0_i32_1 = arith.constant 0 : i32
    return %arg0, %c0_i32, %c0_i32_0 : i32, i32, i32
  }
  func.func @transform_1(%arg0: i32) -> (i32, i32, i32) {
    %c0_i32 = arith.constant 0 : i32
    %c0_i32_0 = arith.constant 0 : i32
    %c0_i32_1 = arith.constant 0 : i32
    %c0_i32_2 = arith.constant 0 : i32
    return %c0_i32, %c0_i32_0, %c0_i32_1 : i32, i32, i32
  }
  func.func @transform_2(%arg0: i32) -> (i32, i32) {
    %c0_i32 = arith.constant 0 : i32
    %c0_i32_0 = arith.constant 0 : i32
    %c0_i32_1 = arith.constant 0 : i32
    return %c0_i32, %c0_i32_0 : i32, i32
  }
  func.func @transform_3(%arg0: i32) -> (i32, i32, i32) {
    %c0_i32 = arith.constant 0 : i32
    %c0_i32_0 = arith.constant 0 : i32
    %c0_i32_1 = arith.constant 0 : i32
    %c0_i32_2 = arith.constant 0 : i32
    return %c0_i32, %c0_i32_0, %c0_i32_1 : i32, i32, i32
  }
  func.func @transform_4(%arg0: i32) -> (i32, i32) {
    %c0_i32 = arith.constant 0 : i32
    %c0_i32_0 = arith.constant 0 : i32
    %c0_i32_1 = arith.constant 0 : i32
    return %c0_i32, %c0_i32_0 : i32, i32
  }
  func.func @transform_5(%arg0: i32) -> (i32, i32, i32) {
    %c0_i32 = arith.constant 0 : i32
    %c0_i32_0 = arith.constant 0 : i32
    %c0_i32_1 = arith.constant 0 : i32
    %c0_i32_2 = arith.constant 0 : i32
    return %c0_i32, %c0_i32_0, %c0_i32_1 : i32, i32, i32
  }
  func.func @transform_6(%arg0: i32) -> (i32, i32) {
    %c0_i32 = arith.constant 0 : i32
    %c0_i32_0 = arith.constant 0 : i32
    %c0_i32_1 = arith.constant 0 : i32
    return %c0_i32, %c0_i32_0 : i32, i32
  }
  func.func @transform_7(%arg0: i32) -> (i32, i32, i32) {
    %c0_i32 = arith.constant 0 : i32
    %c0_i32_0 = arith.constant 0 : i32
    %c0_i32_1 = arith.constant 0 : i32
    %c0_i32_2 = arith.constant 0 : i32
    return %c0_i32, %c0_i32_0, %c0_i32_1 : i32, i32, i32
  }
  func.func @transform_8(%arg0: i32) -> (i32, i32) {
    %c0_i32 = arith.constant 0 : i32
    %c0_i32_0 = arith.constant 0 : i32
    %c0_i32_1 = arith.constant 0 : i32
    return %c0_i32, %c0_i32_0 : i32, i32
  }
  func.func @transform_9(%arg0: i32) -> (i32, i32) {
    %c0_i32 = arith.constant 0 : i32
    %c0_i32_0 = arith.constant 0 : i32
    %c0_i32_1 = arith.constant 0 : i32
    return %c0_i32, %c0_i32_0 : i32, i32
  }
  func.func @transform_10(%arg0: i32) -> (i32, i32) {
    %c0_i32 = arith.constant 0 : i32
    %c0_i32_0 = arith.constant 0 : i32
    %c0_i32_1 = arith.constant 0 : i32
    return %c0_i32, %c0_i32_0 : i32, i32
  }
  func.func @transform_11(%arg0: i32) -> (i32, i32) {
    %c0_i32 = arith.constant 0 : i32
    %c0_i32_0 = arith.constant 0 : i32
    %c0_i32_1 = arith.constant 0 : i32
    return %c0_i32, %c0_i32_0 : i32, i32
  }
  func.func @transform_12(%arg0: i32) -> (i32, i32) {
    %c0_i32 = arith.constant 0 : i32
    %c0_i32_0 = arith.constant 0 : i32
    %c0_i32_1 = arith.constant 0 : i32
    return %c0_i32, %c0_i32_0 : i32, i32
  }
  func.func @transform_13(%arg0: i32) -> (i32, i32) {
    %c0_i32 = arith.constant 0 : i32
    %c0_i32_0 = arith.constant 0 : i32
    return %arg0, %c0_i32 : i32, i32
  }
}

</mosaic_0001>

<bundles_post_ra>
// kernel: forward.1
= control target key start
LH: loop header
LB: loop body
LE: loop exit
PB: predicated region body
PF: predicated region fallthrough
CT: control target
= control target key end

     0   :  { %s6940_s25 = smov 0   ;;  %s9271_s0 = inlined_call_operand.vmem [shape: f32[16,32,32], index: 0, kind: input, shape index: {}]   ;;  %s9272_s1 = inlined_call_operand.vmem [shape: bf16[3,32,192], index: 1, kind: input, shape index: {}]   ;;  %s9273_s2 = inlined_call_operand.vmem [shape: f32[1,192], index: 2, kind: input, shape index: {}]   ;;  %s9274_s3 = inlined_call_operand.vmem [shape: bf16[2,192,96], index: 3, kind: input, shape index: {}]   ;;  %s9275_s4 = inlined_call_operand.vmem [shape: bf16[128,256], index: 4, kind: input, shape index: {}]   ;;  %s9276_s5 = inlined_call_operand.vmem [shape: bf16[3,96,256], index: 5, kind: input, shape index: {}]   ;;  %s9277_s6 = inlined_call_operand.vmem [shape: f32[1,256], index: 6, kind: input, shape index: {}]   ;;  %s9278_s7 = inlined_call_operand.vmem [shape: bf16[2,256,128], index: 7, kind: input, shape index: {}]   ;;  %s9279_s8 = inlined_call_operand.vmem [shape: bf16[64,128], index: 8, kind: input, shape index: {}]   ;;  %s9280_s9 = inlined_call_operand.vmem [shape: bf16[1024,64], index: 9, kind: input, shape index: {}]   ;;  %s9281_s10 = inlined_call_operand.vmem [shape: f32[1,64], index: 10, kind: input, shape index: {}]   ;;  %s9282_s11 = inlined_call_operand.vmem [shape: bf16[64,128], index: 11, kind: input, shape index: {}]   ;;  %s9283_s12 = inlined_call_operand.vmem [shape: f32[1,128], index: 12, kind: input, shape index: {}]   ;;  %s9284_s13 = inlined_call_operand.vmem [shape: f32[16,128], index: 13, kind: output, shape index: {}]  }
   0x1 LB: > { %s6946_s26 = sadd.s32 4294967295, %s6865_s25   ;;  %p5883_p0 = scmp.ge.s32.totalorder %s6865_s25, 1  ;;  %s6865_s25 = sphi %s6940_s25, %s23_s25  }
   0x2   : > { %p389_p1 = scmp.lt.s32.totalorder %s6865_s25, 3 }
   0x4   : > { %p390_p2 = pnand %p5883_p0, %p389_p1 }
   0x6   : > { %393 = sbr.rel (%p390_p2) target bundleno = 2217 (0x8a9), region = 72 }
   0xb   : > { %v6626_v0 = vld [vmem:[%s9272_s1 + $0x14] ss:$8 sps:$4 sm:$0xff]   ;;  %s5884_s29 = sshll.u32 %s6946_s26, 3  ;;  %v477_v1 = vlaneseq  ;;  %v6628_v2 = vld [vmem:[%s9272_s1 + $0x10] ss:$8 sps:$4 sm:$0xff]   ;;  %v9285_v3 = vmov 0  }
   0xc   : > { %1572 = vmatprep.mubr.bf16.mxu1 %v9285_v3  ;;  %1422 = vmatprep.mubr.bf16.mxu0 %v9285_v3  ;;  %p434_p3 = scmp.lt.s32.totalorder %s5884_s29, 15  ;;  %v6629_v4 = vld [vmem:[%s9272_s1 + $0x4] ss:$8 sps:$4 sm:$0xff]   ;;  %v6631_v6 = vld [vmem:[%s9272_s1] ss:$8 sps:$4 sm:$0xff]   ;;  %vm1341_vm2 = vcmask 261120  }
   0xd   : > { %6611 = vmatprep.subr.bf16.mxu1 %v6626_v0  ;;  %1402 = vmatprep.subr.bf16.mxu0 %v6626_v0  ;;  %v6962_v5 = vshrl.u32 %v477_v1, 7  ;;  %v6634_v7 = vld [vmem:[%s9272_s1 + $0x34] ss:$8 sps:$4 sm:$0xff]   ;;  %v6632_v24 = vld [vmem:[%s9272_s1 + $0x30] ss:$8 sps:$4 sm:$0xff]   ;;  %p440_p4 = scmp.lt.s32.totalorder %s6946_s26, 1 }
   0xe   : > { %6613 = vmatpush1.bf16.msra.mxu1 %v6628_v2  ;;  %1403 = vmatpush1.bf16.msra.mxu0 %v6628_v2  ;;  %s9434_s29 = smov (!%p434_p3, %s5884_s29), 15  ;;  %v6637_v28 = vld [vmem:[%s9272_s1 + $0x24] ss:$8 sps:$4 sm:$0xff]   ;;  %v6635_v34 = vld [vmem:[%s9272_s1 + $0x20] ss:$8 sps:$4 sm:$0xff]  }
   0xf   : > { %9300 = vst [vmem:[#allocation2_spill] sm:$0xff] %v6962_v5  ;;  %6612 = vmatprep.subr.bf16.mxu1 %v6629_v4  ;;  %1404 = vmatprep.subr.bf16.mxu0 %v6629_v4  ;;  %s6277_s21 = sshll.u32 %s9434_s29, 5  ;;  %v514_v8 = vand.u32 31, %v6962_v5  ;;  %vm958_vm0 = vcmp.lt.s32.totalorder %v6962_v5, 1  ;;  %v7022_v32 = vadd.s32 32, %v6962_v5  ;;  %v7067_v50 = vadd.s32 64, %v6962_v5 }
  0x10   : > { %s6974_s24 = scalar_lea.vmem %s9271_s0, %s6277_s21  ;;  %v6638_v42 = vld [vmem:[%s9272_s1 + $0x50] ss:$8 sps:$4 sm:$0xff]   ;;  %v6640_v43 = vld [vmem:[%s9272_s1 + $0x54] ss:$8 sps:$4 sm:$0xff]   ;;  %v6641_v45 = vld [vmem:[%s9272_s1 + $0x40] ss:$8 sps:$4 sm:$0xff]  }
  0x11   : > { %v6977_v9 = vld [vmem:[%s6974_s24 + $0xe8] sm:$0xff]  ;;  %v475_v10 = vld [vmem:[%s6974_s24 + $0xf0] sm:$0xff]  ;;  %v476_v11 = vld [vmem:[%s6974_s24 + $0xf8] sm:$0xff]  ;;  %vm6989_vm1 = vcmp.eq.s32.totalorder %v514_v8, 0  ;;  %9303 = vst [vmem:[#allocation3_spill] sm:$0xff] %v7022_v32  ;;  %v542_v38 = vand.u32 31, %v7022_v32 }
  0x12   : > { %6614 = vmatpush1.bf16.msra.mxu1 %v6631_v6  ;;  %1405 = vmatpush1.bf16.msra.mxu0 %v6631_v6  ;;  %v955_v12 = vrot.slane %v6977_v9, 7  ;;  %v956_v13 = vrot.slane %v475_v10, 7  ;;  %v957_v14 = vrot.slane %v476_v11, 7  ;;  %v6984_v15 = vld [vmem:[%s6974_s24] sm:$0xff]  ;;  %v6987_v16 = vld [vmem:[%s6974_s24 + $0x8] sm:$0xff]  ;;  %v6996_v20 = vld [vmem:[%s6974_s24 + $0x10] sm:$0xff] }
  0x13   : > { %1663 = vmatprep.subr.bf16.mxu1 %v6634_v7  ;;  %v926_v18 = vrot.slane %v6984_v15, 7  ;;  %v927_v19 = vrot.slane %v6987_v16, 7  ;;  %v6999_v21 = vld [vmem:[%s6974_s24 + $0x18] sm:$0xff]  ;;  %v928_v30 = vrot.slane %v6996_v20, 7  ;;  %v7030_v35 = vld [vmem:[%s6974_s24 + $0x20] sm:$0xff]  ;;  %v1285_v39 = vpack.c.bf16 %v6987_v16, %v6984_v15  ;;  %v7042_v40 = vld [vmem:[%s6974_s24 + $0x28] sm:$0xff]  ;;  %1945 = vmatprep.subr.bf16.mxu0 %v6640_v43 }
  0x14   : > { %v959_v22 = vsel %vm958_vm0, %v956_v13, %v957_v14  ;;  %v960_v23 = vsel %vm958_vm0, %v955_v12, %v956_v13  ;;  %v929_v31 = vrot.slane %v6999_v21, 7  ;;  %v930_v41 = vrot.slane %v7030_v35, 7  ;;  %v6643_v47 = vld [vmem:[%s9272_s1 + $0x44] ss:$8 sps:$4 sm:$0xff]   ;;  %9306 = vst [vmem:[#allocation4_spill] sm:$0xff] %v7067_v50  ;;  %v7075_v52 = vld [vmem:[%s6974_s24 + $0x30] sm:$0xff] }
  0x15   : > { %v1320_v25 = vpack.c.bf16 %v959_v22, %v960_v23  ;;  %v989_v26 = vsel %vm958_vm0, %v926_v18, %v927_v19  ;;  %v990_v27 = vsel %vm958_vm0, %v957_v14, %v926_v18  ;;  %v988_v37 = vsel %vm958_vm0, %v927_v19, %v928_v30  ;;  %v7078_v53 = vld [vmem:[%s6974_s24 + $0x40] sm:$0xff]  ;;  %v7089_v57 = vld [vmem:[%s6974_s24 + $0x38] sm:$0xff]  ;;  %v7096_v60 = vld [vmem:[%s6974_s24 + $0x48] sm:$0xff]  ;;  %s9436_s26 = smov (!%p440_p4, %s6946_s26), 1 }
  0x16   : > { %v1055_v29 = vsel %vm6989_vm1, 0.0, %v990_v27  ;;  %v987_v36 = vsel %vm958_vm0, %v928_v30, %v929_v31  ;;  %v931_v46 = vrot.slane %v7042_v40, 7  ;;  %vm7060_vm3 = vcmp.eq.s32.totalorder %v542_v38, 0  ;;  %v7104_v4 = vld [vmem:[%s6974_s24 + $0x50] sm:$0xff]  ;;  %v7109_v7 = vld [vmem:[%s6974_s24 + $0x58] sm:$0xff]  ;;  %v7130_v19 = vld [vmem:[%s6974_s24 + $0xe0] sm:$0xff] }
  0x17   : > { %5911 = vmatmul.mubr.msk.bf16.vlgmr.msra.gmra.mxu1 %vm1341_vm2, %v1320_v25  ;;  %v1305_v33 = vpack.c.bf16 %v989_v26, %v1055_v29  ;;  %v1306_v44 = vpack.c.bf16 %v987_v36, %v988_v37  ;;  %v986_v49 = vsel %vm958_vm0, %v929_v31, %v930_v41  ;;  %v7071_v51 = vadd.s32 96, %v6962_v5  ;;  %v7121_v13 = vld [vmem:[%s6974_s24 + $0xd8] sm:$0xff]  ;;  %v7218_v8 = vld [vmem:[%s6974_s24 + $0x68] sm:$0xff]  ;;  %s5887_s20 = sshll.u32 %s9436_s26, 3 }
  0x18   : > { %1664 = vmatpush1.bf16.msra.mxu1 %v6632_v24  ;;  %1683 = vmatprep.mubr.bf16.mxu1 %v9285_v3  ;;  %v7081_v54 = vadd.s32 128, %v6962_v5  ;;  %v985_v55 = vsel %vm958_vm0, %v930_v41, %v931_v46  ;;  %v1059_v56 = vsel %vm7060_vm3, 0.0, %v986_v49  ;;  %v1286_v58 = vpack.c.bf16 %v6999_v21, %v6996_v20  ;;  %v7199_v49 = vld [vmem:[%s6974_s24 + $0x60] sm:$0xff]  ;;  %s443_s23 = scalar_lea.vmem %s9284_s13, %s5887_s20 }
  0x19   : > { %5896 = vmatmul.mubr.msk.bf16.vlgmr.msra.gmra.mxu0 %vm1341_vm2, %v1305_v33  ;;  %1665 = vmatprep.subr.bf16.mxu1 %v6637_v28  ;;  %9307 = vst [vmem:[#allocation5_spill] sm:$0xff] %v7071_v51  ;;  %v570_v59 = vand.u32 31, %v7067_v50  ;;  %v934_v61 = vrot.slane %v7078_v53, 7  ;;  %v1119_v62 = vrot.slane %v6984_v15, 1  ;;  %v1307_v63 = vpack.c.bf16 %v985_v55, %v1059_v56 }
  0x1a   : > { %1432 = vmatprep.mubr.bf16.mxu0 %v9285_v3  ;;  %1946 = vmatpush1.bf16.msra.mxu0 %v6638_v42  ;;  %v598_v0 = vand.u32 31, %v7071_v51  ;;  %v932_v1 = vrot.slane %v7075_v52, 7  ;;  %v933_v2 = vrot.slane %v7089_v57, 7  ;;  %v935_v6 = vrot.slane %v7096_v60, 7 }
  0x1b   : > { %1947 = vmatprep.subr.bf16.mxu0 %v6643_v47  ;;  %vm7112_vm4 = vcmp.eq.s32.totalorder %v570_v59, 0  ;;  %v1120_v11 = vrot.slane %v6987_v16, 1  ;;  %v1121_v14 = vrot.slane %v6996_v20, 1  ;;  %v1287_v22 = vpack.c.bf16 %v7042_v40, %v7030_v35 }
  0x1c   : > { %1666 = vmatpush1.bf16.msra.mxu1 %v6635_v34  ;;  %v982_v10 = vsel %vm958_vm0, %v933_v2, %v934_v61  ;;  %v983_v17 = vsel %vm958_vm0, %v932_v1, %v933_v2  ;;  %v984_v18 = vsel %vm958_vm0, %v931_v46, %v932_v1  ;;  %v981_v16 = vsel %vm958_vm0, %v934_v61, %v935_v6 }
  0x1d   : > { %2507 = vmatprep.subr.bf16.mxu1 %v9285_v3  ;;  %v1063_v20 = vsel %vm7112_vm4, 0.0, %v982_v10  ;;  %v936_v23 = vrot.slane %v7104_v4, 7  ;;  %v937_v24 = vrot.slane %v7109_v7, 7  ;;  %v506_v25 = vadd.s32 224, %v6962_v5  ;;  %v7221_v10 = vld [vmem:[%s6974_s24 + $0x70] sm:$0xff] }
  0x1e   : > { %1948 = vmatpush1.bf16.msra.mxu0 %v6641_v45  ;;  %v1308_v26 = vpack.c.bf16 %v983_v17, %v984_v18  ;;  %v953_v27 = vrot.slane %v7121_v13, 7  ;;  %v954_v28 = vrot.slane %v7130_v19, 7  ;;  %v1288_v29 = vpack.c.bf16 %v7089_v57, %v7075_v52 }
  0x1f   : > { %5916 = vmatmul.mubr.msk.bf16.vlgmr.msra.gmra.mxu1 %vm1341_vm2, %v1285_v39  ;;  %2765 = vmatprep.subr.bf16.mxu0 %v9285_v3  ;;  %v1309_v30 = vpack.c.bf16 %v981_v16, %v1063_v20  ;;  %v710_v31 = vand.u32 31, %v506_v25  ;;  %vm1151_vm5 = vcmp.lt.s32.totalorder %v6962_v5, 7  ;;  %v1122_v38 = vrot.slane %v6999_v21, 1 }
  0x20   : > { %1693 = vmatprep.mubr.bf16.mxu1 %v9285_v3  ;;  %v961_v33 = vsel %vm958_vm0, %v954_v28, %v955_v12  ;;  %v962_v34 = vsel %vm958_vm0, %v953_v27, %v954_v28  ;;  %v7159_v36 = vsel %vm1151_vm5, %v1120_v11, %v1121_v14  ;;  %v7165_v37 = vsel %vm1151_vm5, %v1119_v62, %v1120_v11 }
  0x21   : > { %5897 = vmatmul.mubr.msk.bf16.gmra.mxu0 %vm1341_vm2, %v1306_v44  ;;  %vm922_vm6 = vcmp.eq.s32.totalorder %v710_v31, 0  ;;  %v1849_v9 = vpack.c.bf16 %v7159_v36, %v7165_v37  ;;  %v7171_v12 = vadd.s32 24, %v6962_v5  ;;  %v1123_v41 = vrot.slane %v7030_v35, 1  ;;  %v7250_v31 = vld [vmem:[%s6974_s24 + $0x80] sm:$0xff]  ;;  %v6645_v36 = vld [vmem:[%s9274_s3 + $0x98] sm:$0xff]   ;;  %v6646_v37 = vld [vmem:[%s9274_s3 + $0x30] sm:$0xff]  }
  0x22   : > { %1442 = vmatprep.mubr.bf16.mxu0 %v9285_v3  ;;  %v1083_v39 = vsel %vm922_vm6, 0.0, %v962_v34  ;;  %v1124_v42 = vrot.slane %v7042_v40, 1  ;;  %v1125_v43 = vrot.slane %v7075_v52, 1  ;;  %v1180_v46 = vsel %vm1151_vm5, %v1121_v14, %v1122_v38 }
  0x23   : > { %9310 = vst [vmem:[#allocation6_spill] sm:$0xff] %v7171_v12  ;;  %v7179_v44 = vpack.c.bf16 %v961_v33, %v1083_v39  ;;  %v535_v45 = vand.u32 31, %v7171_v12  ;;  %v7185_v21 = vadd.s32 56, %v6962_v5  ;;  %v1179_v47 = vsel %vm1151_vm5, %v1122_v38, %v1123_v41 }
  0x24   : > { %v7191_v35 = vsel %vm1151_vm5, %v1124_v42, %v1125_v43  ;;  %v7195_v40 = vsel %vm1151_vm5, %v1123_v41, %v1124_v42  ;;  %v1126_v48 = vrot.slane %v7089_v57, 1  ;;  %v1127_v56 = vrot.slane %v7078_v53, 1 }
  0x25   : > { %9311 = vst [vmem:[#allocation7_spill] sm:$0xff] %v7185_v21  ;;  %vm1090_vm7 = vcmp.eq.s32.totalorder %v535_v45, 31  ;;  %v1851_v52 = vpack.c.bf16 %v7191_v35, %v7195_v40  ;;  %v563_v55 = vand.u32 31, %v7185_v21  ;;  %v1128_v61 = vrot.slane %v7096_v60, 1  ;;  %v6648_v35 = vld [vmem:[%s9274_s3 + $0x28] sm:$0xff]  }
  0x26   : > { %v1176_v59 = vsel %vm1151_vm5, %v1125_v43, %v1126_v48  ;;  %v1175_v1 = vsel %vm1151_vm5, %v1126_v48, %v1127_v56  ;;  %v7214_v2 = vadd.s32 88, %v6962_v5  ;;  %v1130_v18 = vrot.slane %v7109_v7, 1  ;;  %v6649_v40 = vld [vmem:[%s9274_s3 + $0x88] sm:$0xff]  }
  0x27   : > { %5917 = vmatmul.mubr.msk.bf16.gmra.mxu1 %vm1341_vm2, %v1286_v58  ;;  %v1251_v58 = vsel %vm1090_vm7, 0.0, %v1179_v47  ;;  %vm1094_vm8 = vcmp.eq.s32.totalorder %v563_v55, 31  ;;  %v7229_v17 = vsel %vm1151_vm5, %v1127_v56, %v1128_v61  ;;  %v1131_v25 = vrot.slane %v7199_v49, 1  ;;  %v7291_v56 = vld [vmem:[%s6974_s24 + $0x88] sm:$0xff] }
  0x28   : > { %1703 = vmatprep.mubr.bf16.mxu1 %v9285_v3  ;;  %v7209_v57 = vpack.c.bf16 %v1251_v58, %v1180_v46  ;;  %9312 = vst [vmem:[#allocation8_spill] sm:$0xff] %v7214_v2  ;;  %v1255_v11 = vsel %vm1094_vm8, 0.0, %v1175_v1  ;;  %v591_v20 = vand.u32 31, %v7214_v2  ;;  %v980_v28 = vsel %vm958_vm0, %v935_v6, %v936_v23  ;;  %v7294_v58 = vld [vmem:[%s6974_s24 + $0x90] sm:$0xff]  ;;  %v7350_v1 = vld [vmem:[%s6974_s24 + $0xa0] sm:$0xff] }
  0x29   : > { %5898 = vmatmul.mubr.msk.bf16.gmra.mxu0 %vm1341_vm2, %v1307_v63  ;;  %v1129_v63 = vrot.slane %v7104_v4, 1  ;;  %v1132_v34 = vrot.slane %v7218_v8, 1  ;;  %v1133_v38 = vrot.slane %v7221_v10, 1  ;;  %v1289_v6 = vpack.c.bf16 %v7096_v60, %v7078_v53 }
  0x2a   : > { %1452 = vmatprep.mubr.bf16.mxu0 %v9285_v3  ;;  %vm1098_vm9 = vcmp.eq.s32.totalorder %v591_v20, 31  ;;  %v939_v46 = vrot.slane %v7218_v8, 7  ;;  %vm7279_vm10 = vcmp.eq.s32.totalorder %v598_v0, 0  ;;  %v626_v48 = vand.u32 31, %v7081_v54 }
  0x2b   : > { %v7225_v14 = vsel %vm1151_vm5, %v1128_v61, %v1129_v63  ;;  %v1172_v33 = vsel %vm1151_vm5, %v1129_v63, %v1130_v18  ;;  %v7268_v42 = vsel %vm1151_vm5, %v1132_v34, %v1133_v38  ;;  %v7272_v43 = vsel %vm1151_vm5, %v1131_v25, %v1132_v34 }
  0x2c   : > { %v1853_v16 = vpack.c.bf16 %v7225_v14, %v7229_v17  ;;  %v1855_v53 = vpack.c.bf16 %v7268_v42, %v7272_v43  ;;  %v942_v55 = vrot.slane %v7250_v31, 7  ;;  %v498_v61 = vadd.s32 160, %v6962_v5  ;;  %v6652_v14 = vld [vmem:[%s9274_s3 + $0x18] sm:$0xff]   ;;  %v6657_v42 = vld [vmem:[%s9274_s3 + $0x68] sm:$0xff]   ;;  %v6658_v43 = vld [vmem:[%s9274_s3] sm:$0xff]  }
  0x2d   : > { %v7308_v63 = vadd.s32 120, %v6962_v5  ;;  %vm7311_vm11 = vcmp.eq.s32.totalorder %v626_v48, 0  ;;  %v1135_v20 = vrot.slane %v7250_v31, 1  ;;  %v6653_v17 = vld [vmem:[%s9274_s3 + $0x78] sm:$0xff]   ;;  %vm3748_vm6 = vcmask 785408  }
  0x2f   : > { %5918 = vmatmul.mubr.msk.bf16.gmra.mxu1 %vm1341_vm2, %v1287_v22  ;;  %v7233_v22 = vpack.c.bf16 %v1255_v11, %v1176_v59  ;;  %v7299_v59 = vld [vmem:[%s6974_s24 + $0x98] sm:$0xff]  ;;  %9315 = vst [vmem:[#allocation9_spill] sm:$0xff] %v7308_v63 }
  0x30   : > { %1713 = vmatprep.mubr.bf16.mxu1 %v9285_v3 }
  0x31   : > { %5899 = vmatmul.mubr.msk.bf16.gmra.mxu0 %vm1341_vm2, %v1308_v26  ;;  %v979_v26 = vsel %vm958_vm0, %v936_v23, %v937_v24  ;;  %v7262_v23 = vld [vmem:[%s6974_s24 + $0x78] sm:$0xff] }
  0x32   : > { %1462 = vmatprep.mubr.bf16.mxu0 %v9285_v3  ;;  %v1310_v45 = vpack.c.bf16 %v979_v26, %v980_v28  ;;  %v941_v0 = vrot.slane %v7262_v23, 7  ;;  %v940_v26 = vrot.slane %v7221_v10, 7  ;;  %v7323_v28 = vadd.s32 192, %v6962_v5 }
  0x34   : > { %v974_v11 = vsel %vm958_vm0, %v941_v0, %v942_v55  ;;  %v976_v48 = vsel %vm958_vm0, %v939_v46, %v940_v26 }
  0x37   : > { %5919 = vmatmul.mubr.msk.bf16.gmra.mxu1 %vm1341_vm2, %v1288_v29  ;;  %v938_v29 = vrot.slane %v7199_v49, 7 }
  0x38   : > { %1723 = vmatprep.mubr.bf16.mxu1 %v9285_v3 }
  0x39   : > { %5900 = vmatmul.mubr.msk.bf16.gmra.mxu0 %vm1341_vm2, %v1309_v30  ;;  %v1171_v30 = vsel %vm1151_vm5, %v1130_v18, %v1131_v25  ;;  %v978_v47 = vsel %vm958_vm0, %v937_v24, %v938_v29  ;;  %v977_v24 = vsel %vm958_vm0, %v938_v29, %v939_v46  ;;  %v1134_v18 = vrot.slane %v7262_v23, 1 }
  0x3a   : > { %1472 = vmatprep.mubr.bf16.mxu0 %v9285_v3  ;;  %v1259_v39 = vsel %vm1098_vm9, 0.0, %v1171_v30  ;;  %v1067_v54 = vsel %vm7279_vm10, 0.0, %v978_v47  ;;  %v1290_v25 = vpack.c.bf16 %v7109_v7, %v7104_v4  ;;  %v619_v29 = vand.u32 31, %v7308_v63 }
  0x3b   : > { %v7264_v41 = vpack.c.bf16 %v1259_v39, %v1172_v33  ;;  %v943_v33 = vrot.slane %v7291_v56, 7  ;;  %v944_v30 = vrot.slane %v7294_v58, 7  ;;  %v1167_v34 = vsel %vm1151_vm5, %v1134_v18, %v1135_v20 }
  0x3c   : > { %v1311_v39 = vpack.c.bf16 %v977_v24, %v1067_v54  ;;  %v1071_v4 = vsel %vm7311_vm11, 0.0, %v974_v11  ;;  %v945_v7 = vrot.slane %v7299_v59, 7  ;;  %vm1102_vm12 = vcmp.eq.s32.totalorder %v619_v29, 31 }
  0x3d   : > { %v1263_v60 = vsel %vm1102_vm12, 0.0, %v1167_v34  ;;  %v1136_v24 = vrot.slane %v7291_v56, 1  ;;  %v1137_v54 = vrot.slane %v7294_v58, 1  ;;  %v973_v29 = vsel %vm958_vm0, %v942_v55, %v943_v33 }
  0x3f   : > { %5920 = vmatmul.mubr.msk.bf16.gmra.mxu1 %vm1341_vm2, %v1289_v6  ;;  %v1168_v6 = vsel %vm1151_vm5, %v1133_v38, %v1134_v18  ;;  %v975_v38 = vsel %vm958_vm0, %v940_v26, %v941_v0  ;;  %v7354_v11 = vsel %vm1151_vm5, %v1136_v24, %v1137_v54  ;;  %v7358_v18 = vsel %vm1151_vm5, %v1135_v20, %v1136_v24 }
  0x40   : > { %1733 = vmatprep.mubr.bf16.mxu1 %v9285_v3  ;;  %v7336_v47 = vpack.c.bf16 %v1263_v60, %v1168_v6  ;;  %v1312_v0 = vpack.c.bf16 %v975_v38, %v976_v48  ;;  %v1857_v46 = vpack.c.bf16 %v7354_v11, %v7358_v18  ;;  %v497_v26 = vadd.s32 152, %v6962_v5  ;;  %v6664_v18 = vld [vmem:[%s9274_s3 + $0x48] sm:$0xff]  }
  0x41   : > { %5901 = vmatmul.mubr.msk.bf16.gmra.mxu0 %vm1341_vm2, %v1310_v45  ;;  %v654_v45 = vand.u32 31, %v498_v61  ;;  %v1291_v61 = vpack.c.bf16 %v7218_v8, %v7199_v49  ;;  %v7368_v49 = vld [vmem:[%s6974_s24 + $0xb0] sm:$0xff]  ;;  %v946_v8 = vrot.slane %v7350_v1, 7  ;;  %v1292_v20 = vpack.c.bf16 %v7262_v23, %v7221_v10 }
  0x42   : > { %1482 = vmatprep.mubr.bf16.mxu0 %v9285_v3  ;;  %v647_v6 = vand.u32 31, %v497_v26  ;;  %v1139_v60 = vrot.slane %v7350_v1, 1  ;;  %v1313_v38 = vpack.c.bf16 %v973_v29, %v1071_v4  ;;  %v948_v48 = vrot.slane %v7368_v49, 7 }
  0x43   : > { %vm7384_vm14 = vcmp.eq.s32.totalorder %v654_v45, 0  ;;  %v971_v4 = vsel %vm958_vm0, %v944_v30, %v945_v7  ;;  %v972_v45 = vsel %vm958_vm0, %v943_v33, %v944_v30  ;;  %v1141_v26 = vrot.slane %v7368_v49, 1 }
  0x44   : > { %vm1106_vm13 = vcmp.eq.s32.totalorder %v647_v6, 31  ;;  %v970_v29 = vsel %vm958_vm0, %v945_v7, %v946_v8  ;;  %v468_v6 = vld [vmem:[%s6974_s24 + $0xb8] sm:$0xff]  ;;  %v501_v30 = vadd.s32 184, %v6962_v5  ;;  %v1294_v7 = vpack.c.bf16 %v7299_v59, %v7294_v58 }
  0x45   : > { %v1075_v33 = vsel %vm7384_vm14, 0.0, %v970_v29  ;;  %v682_v10 = vand.u32 31, %v7323_v28 }
  0x47   : > { %5921 = vmatmul.mubr.msk.bf16.gmra.mxu1 %vm1341_vm2, %v1290_v25  ;;  %v7363_v25 = vld [vmem:[%s6974_s24 + $0xa8] sm:$0xff]  ;;  %vm918_vm1 = vcmp.eq.s32.totalorder %v682_v10, 0 }
  0x48   : > { %1743 = vmatprep.mubr.bf16.mxu1 %v9285_v3  ;;  %v947_v34 = vrot.slane %v7363_v25, 7  ;;  %v1295_v29 = vpack.c.bf16 %v7363_v25, %v7350_v1  ;;  %v1296_v1 = vpack.c.bf16 %v468_v6, %v7368_v49 }
  0x49   : > { %5902 = vmatmul.mubr.msk.bf16.gmra.mxu0 %vm1341_vm2, %v1311_v39  ;;  %v1138_v39 = vrot.slane %v7299_v59, 1 }
  0x4a   : > { %1492 = vmatprep.mubr.bf16.mxu0 %v9285_v3 }
  0x4b   : > { %v1163_v24 = vsel %vm1151_vm5, %v1138_v39, %v1139_v60  ;;  %v1164_v23 = vsel %vm1151_vm5, %v1137_v54, %v1138_v39  ;;  %v1293_v54 = vpack.c.bf16 %v7291_v56, %v7250_v31  ;;  %v7420_v56 = vld [vmem:[%s6974_s24 + $0xc0] sm:$0xff] }
  0x4c   : > { %v1267_v55 = vsel %vm1106_vm13, 0.0, %v1163_v24  ;;  %v949_v24 = vrot.slane %v468_v6, 7 }
  0x4e   : > { %v967_v28 = vsel %vm958_vm0, %v948_v48, %v949_v24 }
  0x4f   : > { %5922 = vmatmul.mubr.msk.bf16.gmra.mxu1 %vm1341_vm2, %v1291_v61  ;;  %v7391_v61 = vpack.c.bf16 %v1267_v55, %v1164_v23  ;;  %v675_v23 = vand.u32 31, %v501_v30  ;;  %v1142_v55 = vrot.slane %v468_v6, 1 }
  0x50   : > { %1753 = vmatprep.mubr.bf16.mxu1 %v9285_v3 }
  0x51   : > { %5903 = vmatmul.mubr.msk.bf16.gmra.mxu0 %vm1341_vm2, %v1312_v0  ;;  %v1140_v0 = vrot.slane %v7363_v25, 1  ;;  %vm1110_vm15 = vcmp.eq.s32.totalorder %v675_v23, 31  ;;  %v1160_v58 = vsel %vm1151_vm5, %v1141_v26, %v1142_v55  ;;  %v7466_v25 = vld [vmem:[%s6974_s24 + $0xd0] sm:$0xff] }
  0x52   : > { %1502 = vmatprep.mubr.bf16.mxu0 %v9285_v3  ;;  %v952_v23 = vrot.slane %v7466_v25, 7 }
  0x53   : > { %v7409_v39 = vsel %vm1151_vm5, %v1140_v0, %v1141_v26  ;;  %v968_v26 = vsel %vm958_vm0, %v947_v34, %v948_v48 }
  0x54   : > { %v1316_v30 = vpack.c.bf16 %v967_v28, %v968_v26 }
  0x57   : > { %5923 = vmatmul.mubr.msk.bf16.gmra.mxu1 %vm1341_vm2, %v1292_v20  ;;  %v1314_v20 = vpack.c.bf16 %v971_v4, %v972_v45  ;;  %v1143_v4 = vrot.slane %v7420_v56, 1 }
  0x58   : > { %1763 = vmatprep.mubr.bf16.mxu1 %v9285_v3 }
  0x59   : > { %5904 = vmatmul.mubr.msk.bf16.gmra.mxu0 %vm1341_vm2, %v1313_v38  ;;  %v7413_v38 = vsel %vm1151_vm5, %v1139_v60, %v1140_v0  ;;  %v969_v60 = vsel %vm958_vm0, %v946_v8, %v947_v34  ;;  %v950_v0 = vrot.slane %v7420_v56, 7  ;;  %v7442_v8 = vld [vmem:[%s6974_s24 + $0xc8] sm:$0xff] }
  0x5a   : > { %1512 = vmatprep.mubr.bf16.mxu0 %v9285_v3  ;;  %v1859_v31 = vpack.c.bf16 %v7409_v39, %v7413_v38  ;;  %v1315_v45 = vpack.c.bf16 %v969_v60, %v1075_v33  ;;  %v951_v33 = vrot.slane %v7442_v8, 7  ;;  %v1297_v6 = vpack.c.bf16 %v7442_v8, %v7420_v56 }
  0x5b   : > { %v1145_v39 = vrot.slane %v7466_v25, 1 }
  0x5c   : > { %v965_v34 = vsel %vm958_vm0, %v950_v0, %v951_v33  ;;  %v964_v49 = vsel %vm958_vm0, %v951_v33, %v952_v23 }
  0x5f   : > { %5924 = vmatmul.mubr.msk.bf16.gmra.mxu1 %vm1341_vm2, %v1293_v54  ;;  %v1159_v54 = vsel %vm1151_vm5, %v1142_v55, %v1143_v4 }
  0x60   : > { %1773 = vmatprep.mubr.bf16.mxu1 %v9285_v3  ;;  %v1271_v59 = vsel %vm1110_vm15, 0.0, %v1159_v54 }
  0x61   : > { %5905 = vmatmul.mubr.msk.bf16.gmra.mxu0 %vm1341_vm2, %v1314_v20  ;;  %v7444_v20 = vpack.c.bf16 %v1271_v59, %v1160_v58  ;;  %v6662_v58 = vld [vmem:[%s9274_s3 + $0x50] sm:$0xff]  }
  0x62   : > { %1522 = vmatprep.mubr.bf16.mxu0 %v9285_v3  ;;  %v6663_v59 = vld [vmem:[%s9274_s3 + $0xb0] sm:$0xff]  }
  0x67   : > { %5925 = vmatmul.mubr.msk.bf16.gmra.mxu1 %vm1341_vm2, %v1294_v7  ;;  %v966_v7 = vsel %vm958_vm0, %v949_v24, %v950_v0  ;;  %v963_v24 = vsel %vm958_vm0, %v952_v23, %v953_v27  ;;  %v1298_v27 = vpack.c.bf16 %v7121_v13, %v7466_v25  ;;  %v7505_v13 = vld [vmem:[%s6974_s24 + $0xf0] sm:$0xff]  ;;  %v6661_v0 = vld [vmem:[%s9274_s3 + $0xb8] sm:$0xff]  }
  0x68   : > { %1783 = vmatprep.mubr.bf16.mxu1 %v9285_v3  ;;  %v1079_v60 = vsel %vm918_vm1, 0.0, %v966_v7  ;;  %v1318_v55 = vpack.c.bf16 %v963_v24, %v964_v49 }
  0x69   : > { %5906 = vmatmul.mubr.msk.bf16.gmra.mxu0 %vm1341_vm2, %v1315_v45  ;;  %v1317_v48 = vpack.c.bf16 %v965_v34, %v1079_v60  ;;  %v7493_v45 = vld [vmem:[%s6974_s24 + $0xe8] sm:$0xff] }
  0x6a   : > { %1532 = vmatprep.mubr.bf16.mxu0 %v9285_v3  ;;  %v1299_v10 = vpack.c.bf16 %v7493_v45, %v7130_v19  ;;  %v6644_v19 = vld [vmem:[%s9274_s3 + $0x38] sm:$0xff]  }
  0x6b   : > { %2508 = vmatpush1.bf16.msra.mxu1 %v6644_v19 }
  0x6c   : > { %2509 = vmatprep.subr.bf16.mxu1 %v9285_v3 }
  0x6f   : > { %5926 = vmatmul.mubr.msk.bf16.gmra.mxu1 %vm1341_vm2, %v1295_v29 }
  0x70   : > { %1793 = vmatprep.mubr.bf16.mxu1 %v9285_v3  ;;  %2510 = vmatpush1.bf16.msra.mxu1 %v6646_v37 }
  0x71   : > { %5907 = vmatmul.mubr.msk.bf16.gmra.mxu0 %vm1341_vm2, %v1316_v30  ;;  %2511 = vmatprep.subr.bf16.mxu1 %v9285_v3  ;;  %v6666_v30 = vld [vmem:[%s9274_s3 + $0x40] sm:$0xff]  }
  0x72   : > { %1542 = vmatprep.mubr.bf16.mxu0 %v9285_v3 }
  0x74   : > { %2512 = vmatpush1.bf16.msra.mxu1 %v6648_v35 }
  0x75   : > { %2513 = vmatprep.subr.bf16.mxu1 %v9285_v3 }
  0x77   : > { %5927 = vmatmul.mubr.msk.bf16.gmra.mxu1 %vm1341_vm2, %v1296_v1 }
  0x78   : > { %1803 = vmatprep.mubr.bf16.mxu1 %v9285_v3 }
  0x79   : > { %5908 = vmatmul.mubr.msk.bf16.gmra.mxu0 %vm1341_vm2, %v1317_v48 }
  0x7a   : > { %1552 = vmatprep.mubr.bf16.mxu0 %v9285_v3 }
  0x7f   : > { %5928 = vmatmul.mubr.msk.bf16.gmra.mxu1 %vm1341_vm2, %v1297_v6 }
  0x80   : > { %1813 = vmatprep.mubr.bf16.mxu1 %v9285_v3 }
  0x81   : > { %5909 = vmatmul.mubr.msk.bf16.gmra.mxu0 %vm1341_vm2, %v1318_v55 }
  0x82   : > { %1562 = vmatprep.mubr.bf16.mxu0 %v9285_v3 }
  0x87   : > { %5929 = vmatmul.mubr.msk.bf16.gmra.mxu1 %vm1341_vm2, %v1298_v27  ;;  %v1144_v27 = vrot.slane %v7442_v8, 1 }
  0x88   : > { %1823 = vmatprep.mubr.bf16.mxu1 %v9285_v3 }
  0x89   : > { %5910 = vmatmul.mubr.msk.bf16.gmra.mxu0 %vm1341_vm2, %v7179_v44  ;;  %v7508_v44 = vld [vmem:[%s6974_s24 + $0xf8] sm:$0xff]  ;;  %v1157_v8 = vsel %vm1151_vm5, %v1144_v27, %v1145_v39  ;;  %v1158_v25 = vsel %vm1151_vm5, %v1143_v4, %v1144_v27 }
  0x8a   : > { %1965 = vmatprep.mubr.bf16.mxu0 %v9285_v3  ;;  %v1300_v54 = vpack.c.bf16 %v7508_v44, %v7505_v13 }
  0x8f   : > { %5930 = vmatmul.mubr.msk.bf16.gmra.mxu1 %vm1341_vm2, %v1299_v10  ;;  %v505_v10 = vadd.s32 216, %v6962_v5 }
  0x90   : > { %1833 = vmatprep.mubr.bf16.mxu1 %v9285_v3 }
  0x91   : > { %5940 = vmatmul.mubr.msk.bf16.vlgmr.msra.gmra.mxu0 %vm1341_vm2, %v1849_v9  ;;  %v6647_v9 = vld [vmem:[%s9274_s3 + $0x90] sm:$0xff]  }
  0x92   : > { %1975 = vmatprep.mubr.bf16.mxu0 %v9285_v3  ;;  %2766 = vmatpush1.bf16.msra.mxu0 %v6645_v36  ;;  %v6857_v36 = vld [vmem:[%s6974_s24 + $0xe0] sm:$0xff] }
  0x93   : > { %2767 = vmatprep.subr.bf16.mxu0 %v9285_v3  ;;  %v1147_v37 = vrot.slane %v6857_v36, 1 }
  0x96   : > { %2768 = vmatpush1.bf16.msra.mxu0 %v6647_v9 }
  0x97   : > { %5931 = vmatmul.mubr.msk.bf16.gmra.mxu1 %vm1341_vm2, %v1300_v54  ;;  %2769 = vmatprep.subr.bf16.mxu0 %v9285_v3 }
  0x99   : > { %5941 = vmatmul.mubr.msk.bf16.gmra.mxu0 %vm1341_vm2, %v7209_v57  ;;  %v6651_v57 = vld [vmem:[%s9274_s3 + $0x80] sm:$0xff]  }
  0x9a   : > { %1985 = vmatprep.mubr.bf16.mxu0 %v9285_v3  ;;  %2770 = vmatpush1.bf16.msra.mxu0 %v6649_v40  ;;  %v703_v40 = vand.u32 31, %v505_v10 }
  0x9b   : > { %2771 = vmatprep.subr.bf16.mxu0 %v9285_v3 }
  0x9c   : > { %vm1114_vm3 = vcmp.eq.s32.totalorder %v703_v40, 31 }
  0x9e   : > { %2772 = vmatpush1.bf16.msra.mxu0 %v6651_v57 }
  0x9f   : > { %2773 = vmatprep.subr.bf16.mxu0 %v9285_v3 }
  0xa1   : > { %5942 = vmatmul.mubr.msk.bf16.gmra.mxu0 %vm1341_vm2, %v1851_v52  ;;  %v6650_v52 = vld [vmem:[%s9274_s3 + $0x20] sm:$0xff]  }
  0xa2   : > { %1995 = vmatprep.mubr.bf16.mxu0 %v9285_v3  ;;  %2514 = vmatpush1.bf16.msra.mxu1 %v6650_v52 }
  0xa3   : > { %2515 = vmatprep.subr.bf16.mxu1 %v9285_v3  ;;  %2774 = vmatpush1.bf16.msra.mxu0 %v6653_v17  ;;  %v1861_v17 = vpack.c.bf16 %v1157_v8, %v1158_v25  ;;  %v1150_v8 = vrot.slane %v7508_v44, 1 }
  0xa4   : > { %2775 = vmatprep.subr.bf16.mxu0 %v9285_v3 }
  0xa6   : > { %2516 = vmatpush1.bf16.msra.mxu1 %v6652_v14 }
  0xa7   : > { %2517 = vmatprep.subr.bf16.mxu1 %v9285_v3 }
  0xa9   : > { %5943 = vmatmul.mubr.msk.bf16.gmra.mxu0 %vm1341_vm2, %v7233_v22  ;;  %v6654_v22 = vld [vmem:[%s9274_s3 + $0x10] sm:$0xff]  }
  0xaa   : > { %2005 = vmatprep.mubr.bf16.mxu0 %v9285_v3  ;;  %2518 = vmatpush1.bf16.msra.mxu1 %v6654_v22 }
  0xab   : > { %2519 = vmatprep.subr.bf16.mxu1 %v9285_v3 }
  0xb1   : > { %5944 = vmatmul.mubr.msk.bf16.gmra.mxu0 %vm1341_vm2, %v1853_v16  ;;  %v6655_v16 = vld [vmem:[%s9274_s3 + $0x70] sm:$0xff]  }
  0xb2   : > { %2015 = vmatprep.mubr.bf16.mxu0 %v9285_v3  ;;  %2776 = vmatpush1.bf16.msra.mxu0 %v6655_v16 }
  0xb3   : > { %2777 = vmatprep.subr.bf16.mxu0 %v9285_v3 }
  0xb6   : > { %2778 = vmatpush1.bf16.msra.mxu0 %v6657_v42 }
  0xb7   : > { %2779 = vmatprep.subr.bf16.mxu0 %v9285_v3 }
  0xb9   : > { %5945 = vmatmul.mubr.msk.bf16.gmra.mxu0 %vm1341_vm2, %v7264_v41  ;;  %v6656_v41 = vld [vmem:[%s9274_s3 + $0x8] sm:$0xff]  }
  0xba   : > { %2025 = vmatprep.mubr.bf16.mxu0 %v9285_v3  ;;  %2520 = vmatpush1.bf16.msra.mxu1 %v6656_v41 }
  0xbb   : > { %2521 = vmatprep.subr.bf16.mxu1 %v9285_v3 }
  0xbe   : > { %2522 = vmatpush1.bf16.msra.mxu1 %v6658_v43 }
  0xbf   : > { %2531 = vmatprep.subr.bf16.mxu1 %v9285_v3 }
  0xc1   : > { %5946 = vmatmul.mubr.msk.bf16.gmra.mxu0 %vm1341_vm2, %v1855_v53  ;;  %v6659_v53 = vld [vmem:[%s9274_s3 + $0x60] sm:$0xff]  }
  0xc2   : > { %2035 = vmatprep.mubr.bf16.mxu0 %v9285_v3  ;;  %2780 = vmatpush1.bf16.msra.mxu0 %v6659_v53 }
  0xc3   : > { %2789 = vmatprep.subr.bf16.mxu0 %v9285_v3 }
  0xc6   : > { %2790 = vmatpush2.bf16.msra.mxu0 %v6661_v0 }
  0xc7   : > { %2791 = vmatprep.subr.bf16.mxu0 %v9285_v3 }
  0xc9   : > { %5947 = vmatmul.mubr.msk.bf16.gmra.mxu0 %vm1341_vm2, %v7336_v47  ;;  %v6660_v47 = vld [vmem:[%s9274_s3 + $0x58] sm:$0xff]  }
  0xca   : > { %2045 = vmatprep.mubr.bf16.mxu0 %v9285_v3  ;;  %2532 = vmatpush2.bf16.msra.mxu1 %v6660_v47 }
  0xcb   : > { %2533 = vmatprep.subr.bf16.mxu1 %v9285_v3  ;;  %2792 = vmatpush2.bf16.msra.mxu0 %v6663_v59  ;;  %v1149_v59 = vrot.slane %v7505_v13, 1 }
  0xcc   : > { %2793 = vmatprep.subr.bf16.mxu0 %v9285_v3 }
  0xcd   : > { %v1152_v44 = vsel %vm1151_vm5, %v1149_v59, %v1150_v8 }
  0xce   : > { %2534 = vmatpush2.bf16.msra.mxu1 %v6662_v58  ;;  %v1148_v58 = vrot.slane %v7493_v45, 1 }
  0xcf   : > { %2535 = vmatprep.subr.bf16.mxu1 %v9285_v3 }
  0xd0   : > { %v1153_v27 = vsel %vm1151_vm5, %v1148_v58, %v1149_v59  ;;  %v1154_v45 = vsel %vm1151_vm5, %v1147_v37, %v1148_v58 }
  0xd1   : > { %5948 = vmatmul.mubr.msk.bf16.gmra.mxu0 %vm1341_vm2, %v1857_v46  ;;  %v6665_v46 = vld [vmem:[%s9274_s3 + $0xa8] sm:$0xff]   ;;  %v1863_v36 = vpack.c.bf16 %v1153_v27, %v1154_v45 }
  0xd2   : > { %2055 = vmatprep.mubr.bf16.mxu0 %v9285_v3  ;;  %2536 = vmatpush2.bf16.msra.mxu1 %v6664_v18 }
  0xd3   : > { %2794 = vmatpush2.bf16.msra.mxu0 %v6665_v46  ;;  %2537 = vmatprep.subr.bf16.mxu1 %v9285_v3 }
  0xd4   : > { %2795 = vmatprep.subr.bf16.mxu0 %v9285_v3 }
  0xd6   : > { %2538 = vmatpush2.bf16.msra.mxu1 %v6666_v30  ;;  %v509_v30 = vadd.s32 248, %v6962_v5 }
  0xd7   : > { %v7623_v11 = vpop.f32.mrf.mxu1 }
  0xd8   : > { %9320 = vst [vmem:[#allocation10_spill] sm:$0xff] %v7623_v11  ;;  %v731_v10 = vand.u32 31, %v509_v30 }
  0xd9   : > { %v7633_v28 = vpop.f32.mrf.mxu0  ;;  %5949 = vmatmul.mubr.msk.bf16.gmra.mxu0 %vm1341_vm2, %v7391_v61  ;;  %v7637_v26 = vpop.f32.mrf.mxu1  ;;  %v6667_v61 = vld [vmem:[%s9274_s3 + $0xa0] sm:$0xff]  }
  0xda   : > { %9321 = vst [vmem:[#allocation11_spill] sm:$0xff] %v7637_v26  ;;  %2065 = vmatprep.mubr.bf16.mxu0 %v9285_v3  ;;  %2796 = vmatpush2.bf16.msra.mxu0 %v6667_v61  ;;  %vm1118_vm4 = vcmp.eq.s32.totalorder %v731_v10, 31 }
  0xdb   : > { %v7640_v29 = vpop.f32.mrf.mxu0  ;;  %v7642_v33 = vpop.f32.mrf.mxu1 }
  0xdc   : > { %9322 = vst [vmem:[#allocation12_spill] sm:$0xff] %v7642_v33 }
  0xdd   : > { %v7652_v7 = vpop.f32.mrf.mxu0  ;;  %v7654_v60 = vpop.f32.mrf.mxu1 }
  0xde   : > { %9323 = vst [vmem:[#allocation13_spill] sm:$0xff] %v7654_v60 }
  0xdf   : > { %v7656_v34 = vpop.f32.mrf.mxu0  ;;  %v7658_v1 = vpop.f32.mrf.mxu1 }
  0xe1   : > { %v7660_v48 = vpop.f32.mrf.mxu0  ;;  %5950 = vmatmul.mubr.msk.bf16.gmra.mxu0 %vm1341_vm2, %v1859_v31  ;;  %v7666_v23 = vpop.f32.mrf.mxu1 }
  0xe2   : > { %2075 = vmatprep.mubr.bf16.mxu0 %v9285_v3 }
  0xe3   : > { %v7669_v24 = vpop.f32.mrf.mxu0  ;;  %v7671_v49 = vpop.f32.mrf.mxu1 }
  0xe5   : > { %v7673_v6 = vpop.f32.mrf.mxu0  ;;  %v7675_v55 = vpop.f32.mrf.mxu1 }
  0xe7   : > { %v7679_v38 = vpop.f32.mrf.mxu0  ;;  %v7681_v31 = vpop.f32.mrf.mxu1 }
  0xe9   : > { %v7684_v54 = vpop.f32.mrf.mxu0  ;;  %5951 = vmatmul.mubr.msk.bf16.gmra.mxu0 %vm1341_vm2, %v7444_v20  ;;  %v7688_v19 = vpop.f32.mrf.mxu1  ;;  %v6858_v20 = vld [vmem:[%s6974_s24 + $0xd8] sm:$0xff] }
  0xea   : > { %2085 = vmatprep.mubr.bf16.mxu0 %v9285_v3  ;;  %v1146_v52 = vrot.slane %v6858_v20, 1 }
  0xeb   : > { %v7698_v9 = vpop.f32.mrf.mxu0  ;;  %v7700_v35 = vpop.f32.mrf.mxu1 }
  0xec   : > { %v1155_v4 = vsel %vm1151_vm5, %v1146_v52, %v1147_v37  ;;  %v1156_v41 = vsel %vm1151_vm5, %v1145_v39, %v1146_v52  ;;  %v1183_v37 = vsel %vm1151_vm5, %v1150_v8, %v1119_v62 }
  0xed   : > { %v7703_v57 = vpop.f32.mrf.mxu0  ;;  %v7705_v14 = vpop.f32.mrf.mxu1  ;;  %v1275_v42 = vsel %vm1114_vm3, 0.0, %v1155_v4 }
  0xee   : > { %v1862_v0 = vpack.c.bf16 %v1275_v42, %v1156_v41 }
  0xef   : > { %v7707_v22 = vpop.f32.mrf.mxu0  ;;  %v7709_v56 = vpop.f32.mrf.mxu1 }
  0xf1   : > { %v7713_v16 = vpop.f32.mrf.mxu0  ;;  %5952 = vmatmul.mubr.msk.bf16.gmra.mxu0 %vm1341_vm2, %v1861_v17  ;;  %v7719_v43 = vpop.f32.mrf.mxu1  ;;  %v1279_v17 = vsel %vm1118_vm4, 0.0, %v1183_v37 }
  0xf2   : > { %2095 = vmatprep.mubr.bf16.mxu0 %v9285_v3  ;;  %v1864_v15 = vpack.c.bf16 %v1279_v17, %v1152_v44 }
  0xf3   : > { %v7721_v53 = vpop.f32.mrf.mxu0  ;;  %v7727_v18 = vpop.f32.mrf.mxu1 }
  0xf5   : > { %v7723_v47 = vpop.f32.mrf.mxu0  ;;  %v7740_v39 = vpop.f32.mrf.mxu1 }
  0xf7   : > { %v7729_v46 = vpop.f32.mrf.mxu0  ;;  %v7747_v40 = vpop.f32.mrf.mxu1 }
  0xf9   : > { %v7732_v61 = vpop.f32.mrf.mxu0  ;;  %5953 = vmatmul.mubr.msk.bf16.gmra.mxu0 %vm1341_vm2, %v1862_v0  ;;  %v7761_v4 = vpop.f32.mrf.mxu1 }
  0xfa   : > { %2105 = vmatprep.mubr.bf16.mxu0 %v9285_v3 }
  0xfb   : > { %v7742_v13 = vpop.f32.mrf.mxu0  ;;  %v7767_v0 = vpop.f32.mrf.mxu1 }
  0xfd   : > { %v7745_v25 = vpop.f32.mrf.mxu0  ;;  %v7774_v30 = vpop.f32.mrf.mxu1 }
  0xff   : > { %v7749_v20 = vpop.f32.mrf.mxu0  ;;  %v7780_v45 = vpop.f32.mrf.mxu1 }
 0x101   : > { %v7755_v52 = vpop.f32.mrf.mxu0  ;;  %5954 = vmatmul.mubr.msk.bf16.gmra.mxu0 %vm1341_vm2, %v1863_v36  ;;  %v7786_v36 = vpop.f32.mrf.mxu1 }
 0x102   : > { %2115 = vmatprep.mubr.bf16.mxu0 %v9285_v3 }
 0x103   : > { %v7763_v41 = vpop.f32.mrf.mxu0  ;;  %v7792_v17 = vpop.f32.mrf.mxu1 }
 0x105   : > { %v7765_v42 = vpop.f32.mrf.mxu0  ;;  %v7798_v51 = vpop.f32.mrf.mxu1 }
 0x107   : > { %v7769_v62 = vpop.f32.mrf.mxu0  ;;  %v7804_v63 = vpop.f32.mrf.mxu1 }
 0x109   : > { %v7771_v58 = vpop.f32.mrf.mxu0  ;;  %5955 = vmatmul.mubr.msk.bf16.gmra.mxu0 %vm1341_vm2, %v1864_v15  ;;  %v7810_v12 = vpop.f32.mrf.mxu1  ;;  %vm2458_vm2 = vcmask 523264  }
 0x10b   : > { %v7776_v27 = vpop.f32.mrf.mxu0  ;;  %v7816_v11 = vpop.f32.mrf.mxu1 }
 0x10d   : > { %v7778_v59 = vpop.f32.mrf.mxu0 }
 0x10e   : > { %9324 = vst [vmem:[#allocation14_spill] sm:$0xff] %v7778_v59 }
 0x10f   : > { %v7782_v10 = vpop.f32.mrf.mxu0 }
 0x110   : > { %9325 = vst [vmem:[#allocation15_spill] sm:$0xff] %v7782_v10 }
 0x111   : > { %v7784_v8 = vpop.f32.mrf.mxu0 }
 0x112   : > { %9326 = vst [vmem:[#allocation16_spill] sm:$0xff] %v7784_v8 }
 0x113   : > { %v7788_v37 = vpop.f32.mrf.mxu0 }
 0x114   : > { %9327 = vst [vmem:[#allocation17_spill] sm:$0xff] %v7788_v37 }
 0x115   : > { %v7790_v44 = vpop.f32.mrf.mxu0 }
 0x116   : > { %9328 = vst [vmem:[#allocation18_spill] sm:$0xff] %v7790_v44 }
 0x117   : > { %v7794_v15 = vpop.f32.mrf.mxu0 }
 0x118   : > { %9329 = vst [vmem:[#allocation19_spill] sm:$0xff] %v7794_v15 }
 0x119   : > { %v7796_v3 = vpop.f32.mrf.mxu0 }
 0x11a   : > { %9330 = vst [vmem:[#allocation20_spill] sm:$0xff] %v7796_v3 }
 0x11b   : > { %v7800_v50 = vpop.f32.mrf.mxu0 }
 0x11c   : > { %9331 = vst [vmem:[#allocation21_spill] sm:$0xff] %v7800_v50  ;;  %v7822_v50 = vpop.f32.mrf.mxu1 }
 0x11d   : > { %v7802_v32 = vpop.f32.mrf.mxu0 }
 0x11e   : > { %9332 = vst [vmem:[#allocation22_spill] sm:$0xff] %v7802_v32 }
 0x11f   : > { %v7806_v2 = vpop.f32.mrf.mxu0 }
 0x120   : > { %9333 = vst [vmem:[#allocation23_spill] sm:$0xff] %v7806_v2  ;;  %v7828_v2 = vpop.f32.mrf.mxu1 }
 0x121   : > { %v7808_v21 = vpop.f32.mrf.mxu0 }
 0x122   : > { %9334 = vst [vmem:[#allocation24_spill] sm:$0xff] %v7808_v21 }
 0x123   : > { %v7812_v60 = vpop.f32.mrf.mxu0 }
 0x124   : > { %9335 = vst [vmem:[#allocation25_spill] sm:$0xff] %v7812_v60  ;;  %v7834_v60 = vpop.f32.mrf.mxu1 }
 0x125   : > { %v7814_v33 = vpop.f32.mrf.mxu0  ;;  %9343 = vst [vmem:[#allocation33_spill] sm:$0xff] %v7834_v60 }
 0x126   : > { %9336 = vst [vmem:[#allocation26_spill] sm:$0xff] %v7814_v33 }
 0x127   : > { %v7818_v26 = vpop.f32.mrf.mxu0 }
 0x128   : > { %9337 = vst [vmem:[#allocation27_spill] sm:$0xff] %v7818_v26  ;;  %v7840_v26 = vpop.f32.mrf.mxu1 }
 0x129   : > { %v7820_v3 = vpop.f32.mrf.mxu0  ;;  %9346 = vst [vmem:[#allocation36_spill] sm:$0xff] %v7840_v26 }
 0x12a   : > { %9338 = vst [vmem:[#allocation28_spill] sm:$0xff] %v7820_v3 }
 0x12b   : > { %v7824_v32 = vpop.f32.mrf.mxu0 }
 0x12c   : > { %9339 = vst [vmem:[#allocation29_spill] sm:$0xff] %v7824_v32  ;;  %v7846_v32 = vpop.f32.mrf.mxu1 }
 0x12d   : > { %v7826_v15 = vpop.f32.mrf.mxu0  ;;  %9349 = vst [vmem:[#allocation39_spill] sm:$0xff] %v7846_v32 }
 0x12e   : > { %9340 = vst [vmem:[#allocation30_spill] sm:$0xff] %v7826_v15 }
 0x12f   : > { %v7830_v21 = vpop.f32.mrf.mxu0 }
 0x130   : > { %9341 = vst [vmem:[#allocation31_spill] sm:$0xff] %v7830_v21  ;;  %v7852_v21 = vpop.f32.mrf.mxu1 }
 0x131   : > { %v7832_v44 = vpop.f32.mrf.mxu0  ;;  %9352 = vst [vmem:[#allocation42_spill] sm:$0xff] %v7852_v21 }
 0x132   : > { %9342 = vst [vmem:[#allocation32_spill] sm:$0xff] %v7832_v44 }
 0x133   : > { %v7836_v33 = vpop.f32.mrf.mxu0 }
 0x134   : > { %9344 = vst [vmem:[#allocation34_spill] sm:$0xff] %v7836_v33  ;;  %v7858_v33 = vpop.f32.mrf.mxu1 }
 0x135   : > { %v7838_v37 = vpop.f32.mrf.mxu0  ;;  %9355 = vst [vmem:[#allocation45_spill] sm:$0xff] %v7858_v33 }
 0x136   : > { %9345 = vst [vmem:[#allocation35_spill] sm:$0xff] %v7838_v37 }
 0x137   : > { %v7842_v3 = vpop.f32.mrf.mxu0 }
 0x138   : > { %9347 = vst [vmem:[#allocation37_spill] sm:$0xff] %v7842_v3  ;;  %v7864_v3 = vpop.f32.mrf.mxu1 }
 0x139   : > { %v7844_v8 = vpop.f32.mrf.mxu0  ;;  %9358 = vst [vmem:[#allocation48_spill] sm:$0xff] %v7864_v3  ;;  %v1690_v3 = vadd.f32 %v7671_v49, %v7652_v7 }
 0x13a   : > { %9348 = vst [vmem:[#allocation38_spill] sm:$0xff] %v7844_v8 }
 0x13b   : > { %v7848_v15 = vpop.f32.mrf.mxu0 }
 0x13c   : > { %9350 = vst [vmem:[#allocation40_spill] sm:$0xff] %v7848_v15  ;;  %v7870_v15 = vpop.f32.mrf.mxu1 }
 0x13d   : > { %v7850_v10 = vpop.f32.mrf.mxu0  ;;  %9361 = vst [vmem:[#allocation51_spill] sm:$0xff] %v7870_v15 }
 0x13e   : > { %9351 = vst [vmem:[#allocation41_spill] sm:$0xff] %v7850_v10 }
 0x13f   : > { %v7854_v44 = vpop.f32.mrf.mxu0 }
 0x140   : > { %9353 = vst [vmem:[#allocation43_spill] sm:$0xff] %v7854_v44  ;;  %v7877_v44 = vpop.f32.mrf.mxu1 }
 0x141   : > { %v7856_v59 = vpop.f32.mrf.mxu0  ;;  %9364 = vst [vmem:[#allocation54_spill] sm:$0xff] %v7877_v44 }
 0x142   : > { %9354 = vst [vmem:[#allocation44_spill] sm:$0xff] %v7856_v59  ;;  %v9294_v59 = vsub.s32 0, %v6962_v5  ;;  %v7893_v44 = vpop.f32.mrf.mxu1 }
 0x143   : > { %v7860_v37 = vpop.f32.mrf.mxu0  ;;  %9366 = vst [vmem:[#allocation56_spill] sm:$0xff] %v7893_v44  ;;  %v1696_v44 = vadd.f32 %v7681_v31, %v7660_v48 }
 0x144   : > { %9356 = vst [vmem:[#allocation46_spill] sm:$0xff] %v7860_v37 }
 0x145   : > { %v7862_v26 = vpop.f32.mrf.mxu0 }
 0x146   : > { %9357 = vst [vmem:[#allocation47_spill] sm:$0xff] %v7862_v26  ;;  %v2190_v26 = vld [vmem:[%s9273_s2] sm:$0x3] }
 0x147   : > { %v7866_v8 = vpop.f32.mrf.mxu0  ;;  %v7891_v15 = vrot.slane %v2190_v26, %v9294_v59 }
 0x148   : > { %9359 = vst [vmem:[#allocation49_spill] sm:$0xff] %v7866_v8  ;;  %v1686_v8 = vadd.f32 %v7658_v1, %v7633_v28 }
 0x149   : > { %v7868_v32 = vpop.f32.mrf.mxu0 }
 0x14a   : > { %9360 = vst [vmem:[#allocation50_spill] sm:$0xff] %v7868_v32  ;;  %v9295_v32 = vsub.s32 1, %v6962_v5 }
 0x14b   : > { %v7872_v10 = vpop.f32.mrf.mxu0 }
 0x14c   : > { %9362 = vst [vmem:[#allocation52_spill] sm:$0xff] %v7872_v10  ;;  %v1688_v10 = vadd.f32 %v7666_v23, %v7640_v29  ;;  %v7899_v28 = vrot.slane %v2190_v26, %v9295_v32  ;;  %v1692_v29 = vadd.f32 %v7675_v55, %v7656_v34  ;;  %v1698_v26 = vadd.f32 %v7688_v19, %v7669_v24 }
 0x14d   : > { %v7874_v21 = vpop.f32.mrf.mxu0  ;;  %v1700_v55 = vadd.f32 %v7700_v35, %v7673_v6  ;;  %v1702_v24 = vadd.f32 %v7705_v14, %v7679_v38 }
 0x14e   : > { %9363 = vst [vmem:[#allocation53_spill] sm:$0xff] %v7874_v21 }
 0x14f   : > { %v7879_v33 = vpop.f32.mrf.mxu0 }
 0x150   : > { %9365 = vst [vmem:[#allocation55_spill] sm:$0xff] %v7879_v33 }
 0x151   : > { %v1967_v37 = vpop.f32.mrf.mxu0 }
 0x152   : > { %v2126_v21 = vadd.f32 %v1967_v37, %v1686_v8  ;;  %v7904_v37 = vpop.f32.mrf.mxu1 }
 0x153   : > { %v1969_v33 = vpop.f32.mrf.mxu0 }
 0x154   : > { %v2127_v60 = vadd.f32 %v1969_v33, %v1688_v10  ;;  %v2202_v23 = vadd.f32 %v7891_v15, %v2126_v21 }
 0x155   : > { %v1971_v1 = vpop.f32.mrf.mxu0 }
 0x156   : > { %v2128_v8 = vadd.f32 %v1971_v1, %v1690_v3  ;;  %v2203_v7 = vadd.f32 %v7899_v28, %v2127_v60  ;;  %v2266_v32 = vmax.f32 %v2202_v23, 0.0  ;;  %v7915_v1 = vpop.f32.mrf.mxu1 }
 0x157   : > { %v1973_v59 = vpop.f32.mrf.mxu0 }
 0x158   : > { %v2204_v33 = vadd.f32 %v7891_v15, %v2128_v8  ;;  %v2129_v49 = vadd.f32 %v1973_v59, %v1692_v29  ;;  %v2267_v31 = vmax.f32 %v2203_v7, 0.0  ;;  %v7922_v6 = vpop.f32.mrf.mxu1 }
 0x159   : > { %v1977_v10 = vpop.f32.mrf.mxu0 }
 0x15a   : > { %v2268_v34 = vmax.f32 %v2204_v33, 0.0  ;;  %v2205_v21 = vadd.f32 %v7899_v28, %v2129_v49  ;;  %v2130_v3 = vadd.f32 %v1977_v10, %v1696_v44  ;;  %v1706_v44 = vadd.f32 %v7709_v56, %v7684_v54  ;;  %v7933_v10 = vpop.f32.mrf.mxu1 }
 0x15b   : > { %v1979_v48 = vpop.f32.mrf.mxu0 }
 0x15c   : > { %v2354_v60 = vpack.c.bf16 %v2268_v34, %v2266_v32  ;;  %v2269_v5 = vmax.f32 %v2205_v21, 0.0  ;;  %v2131_v8 = vadd.f32 %v1979_v48, %v1698_v26  ;;  %v2206_v29 = vadd.f32 %v7891_v15, %v2130_v3 }
 0x15d   : > { %v1981_v59 = vpop.f32.mrf.mxu0  ;;  %v1710_v26 = vadd.f32 %v7727_v18, %v7703_v57 }
 0x15e   : > { %v2355_v19 = vpack.c.bf16 %v2269_v5, %v2267_v31  ;;  %v2132_v23 = vadd.f32 %v1981_v59, %v1700_v55  ;;  %v2207_v7 = vadd.f32 %v7899_v28, %v2131_v8  ;;  %v1708_v5 = vadd.f32 %v7719_v43, %v7698_v9 }
 0x15f   : > { %v1983_v35 = vpop.f32.mrf.mxu0  ;;  %v2270_v14 = vmax.f32 %v2206_v29, 0.0  ;;  %v1712_v9 = vadd.f32 %v7740_v39, %v7707_v22  ;;  %v1716_v59 = vadd.f32 %v7747_v40, %v7713_v16  ;;  %v1718_v22 = vadd.f32 %v7761_v4, %v7721_v53 }
 0x160   : > { %v2208_v32 = vadd.f32 %v7891_v15, %v2132_v23  ;;  %v2133_v33 = vadd.f32 %v1983_v35, %v1702_v24  ;;  %5968 = vmatprep.mubr.msk.bf16.mxu1 %vm2458_vm2, %v2355_v19  ;;  %6020 = vmatprep.mubr.msk.bf16.mxu0 %vm2458_vm2, %v2355_v19  ;;  %v2271_v21 = vmax.f32 %v2207_v7, 0.0  ;;  %v7940_v24 = vpop.f32.mrf.mxu1  ;;  %v1720_v35 = vadd.f32 %v7767_v0, %v7723_v47 }
 0x161   : > { %v1987_v38 = vpop.f32.mrf.mxu0  ;;  %2540 = vmatmul.mubr.bf16.vlgmr.msra.gmra.mxu1 %v2354_v60  ;;  %2798 = vmatmul.mubr.bf16.vlgmr.msra.gmra.mxu0 %v2354_v60  ;;  %v1722_v53 = vadd.f32 %v7774_v30, %v7729_v46  ;;  %v1728_v46 = vadd.f32 %v7786_v36, %v7742_v13  ;;  %v1732_v13 = vadd.f32 %v7798_v51, %v7749_v20 }
 0x162   : > { %v2272_v54 = vmax.f32 %v2208_v32, 0.0  ;;  %v2209_v56 = vadd.f32 %v7899_v28, %v2133_v33  ;;  %v2134_v49 = vadd.f32 %v1987_v38, %v1706_v44  ;;  %v7951_v7 = vpop.f32.mrf.mxu1  ;;  %v1738_v51 = vadd.f32 %v7810_v12, %v7763_v41 }
 0x163   : > { %v1989_v34 = vpop.f32.mrf.mxu0  ;;  %v1742_v12 = vadd.f32 %v7822_v50, %v7769_v62  ;;  %v9367_v50 = vld [vmem:[#allocation33_spill] sm:$0xff] }
 0x164   : > { %v2273_v3 = vmax.f32 %v2209_v56, 0.0  ;;  %v2135_v55 = vadd.f32 %v1989_v34, %v1708_v5  ;;  %v2356_v48 = vpack.c.bf16 %v2272_v54, %v2270_v14  ;;  %v2210_v60 = vadd.f32 %v7891_v15, %v2134_v49  ;;  %v7958_v34 = vpop.f32.mrf.mxu1 }
 0x165   : > { %v1991_v31 = vpop.f32.mrf.mxu0  ;;  %v1748_v62 = vadd.f32 %v9367_v50, %v7776_v27  ;;  %v9370_v27 = vld [vmem:[#allocation15_spill] sm:$0xff] }
 0x166   : > { %v2357_v43 = vpack.c.bf16 %v2273_v3, %v2271_v21  ;;  %v2136_v8 = vadd.f32 %v1991_v31, %v1710_v26  ;;  %v2211_v18 = vadd.f32 %v7899_v28, %v2135_v55  ;;  %v2274_v23 = vmax.f32 %v2210_v60, 0.0 }
 0x167   : > { %v1993_v57 = vpop.f32.mrf.mxu0  ;;  %v1726_v26 = vadd.f32 %v7780_v45, %v7732_v61  ;;  %v1730_v31 = vadd.f32 %v7792_v17, %v7745_v25 }
 0x168   : > { %v2212_v19 = vadd.f32 %v7891_v15, %v2136_v8  ;;  %v2137_v29 = vadd.f32 %v1993_v57, %v1712_v9  ;;  %5969 = vmatprep.mubr.msk.bf16.mxu1 %vm2458_vm2, %v2357_v43  ;;  %6021 = vmatprep.mubr.msk.bf16.mxu0 %vm2458_vm2, %v2357_v43  ;;  %v2275_v33 = vmax.f32 %v2211_v18, 0.0  ;;  %v7969_v9 = vpop.f32.mrf.mxu1 }
 0x169   : > { %v1997_v39 = vpop.f32.mrf.mxu0  ;;  %2548 = vmatmul.mubr.bf16.gmra.mxu1 %v2356_v48  ;;  %2806 = vmatmul.mubr.bf16.gmra.mxu0 %v2356_v48 }
 0x16a   : > { %v2276_v16 = vmax.f32 %v2212_v19, 0.0  ;;  %v2213_v40 = vadd.f32 %v7899_v28, %v2137_v29  ;;  %v2138_v44 = vadd.f32 %v1997_v39, %v1716_v59  ;;  %v7976_v39 = vpop.f32.mrf.mxu1 }
 0x16b   : > { %v1999_v32 = vpop.f32.mrf.mxu0 }
 0x16c   : > { %v2277_v5 = vmax.f32 %v2213_v40, 0.0  ;;  %v2139_v38 = vadd.f32 %v1999_v32, %v1718_v22  ;;  %v2358_v14 = vpack.c.bf16 %v2276_v16, %v2274_v23  ;;  %v2214_v56 = vadd.f32 %v7891_v15, %v2138_v44  ;;  %v7987_v32 = vpop.f32.mrf.mxu1 }
 0x16d   : > { %v2001_v54 = vpop.f32.mrf.mxu0  ;;  %v1736_v22 = vadd.f32 %v7804_v63, %v7755_v52 }
 0x16e   : > { %v2359_v4 = vpack.c.bf16 %v2277_v5, %v2275_v33  ;;  %v2140_v49 = vadd.f32 %v2001_v54, %v1720_v35  ;;  %v2215_v0 = vadd.f32 %v7899_v28, %v2139_v38  ;;  %v2278_v55 = vmax.f32 %v2214_v56, 0.0 }
 0x16f   : > { %v2003_v47 = vpop.f32.mrf.mxu0  ;;  %v1740_v35 = vadd.f32 %v7816_v11, %v7765_v42 }
 0x170   : > { %v2216_v21 = vadd.f32 %v7891_v15, %v2140_v49  ;;  %v2141_v3 = vadd.f32 %v2003_v47, %v1722_v53  ;;  %5970 = vmatprep.mubr.msk.bf16.mxu1 %vm2458_vm2, %v2359_v4  ;;  %6022 = vmatprep.mubr.msk.bf16.mxu0 %vm2458_vm2, %v2359_v4  ;;  %v2279_v60 = vmax.f32 %v2215_v0, 0.0  ;;  %v1746_v49 = vadd.f32 %v7828_v2, %v7771_v58 }
 0x171   : > { %v2007_v30 = vpop.f32.mrf.mxu0  ;;  %2556 = vmatmul.mubr.bf16.gmra.mxu1 %v2358_v14  ;;  %2814 = vmatmul.mubr.bf16.gmra.mxu0 %v2358_v14 }
 0x172   : > { %v2280_v61 = vmax.f32 %v2216_v21, 0.0  ;;  %v2217_v45 = vadd.f32 %v7899_v28, %v2141_v3  ;;  %v2142_v48 = vadd.f32 %v2007_v30, %v1726_v26  ;;  %v7994_v26 = vpop.f32.mrf.mxu1  ;;  %v9368_v30 = vld [vmem:[#allocation14_spill] sm:$0xff] }
 0x173   : > { %v2009_v43 = vpop.f32.mrf.mxu0 }
 0x174   : > { %v2281_v8 = vmax.f32 %v2217_v45, 0.0  ;;  %v2143_v59 = vadd.f32 %v2009_v43, %v1728_v46  ;;  %v2360_v57 = vpack.c.bf16 %v2280_v61, %v2278_v55  ;;  %v2218_v19 = vadd.f32 %v7891_v15, %v2142_v48  ;;  %v9369_v55 = vld [vmem:[#allocation36_spill] sm:$0xff]  ;;  %v8005_v45 = vpop.f32.mrf.mxu1 }
 0x175   : > { %v2011_v18 = vpop.f32.mrf.mxu0  ;;  %v1750_v61 = vadd.f32 %v9369_v55, %v9368_v30 }
 0x176   : > { %v2361_v36 = vpack.c.bf16 %v2281_v8, %v2279_v60  ;;  %v2144_v29 = vadd.f32 %v2011_v18, %v1730_v31  ;;  %v2219_v17 = vadd.f32 %v7899_v28, %v2143_v59  ;;  %v2282_v40 = vmax.f32 %v2218_v19, 0.0 }
 0x177   : > { %v2013_v25 = vpop.f32.mrf.mxu0 }
 0x178   : > { %v2220_v23 = vadd.f32 %v7891_v15, %v2144_v29  ;;  %v2145_v16 = vadd.f32 %v2013_v25, %v1732_v13  ;;  %5971 = vmatprep.mubr.msk.bf16.mxu1 %vm2458_vm2, %v2361_v36  ;;  %6023 = vmatprep.mubr.msk.bf16.mxu0 %vm2458_vm2, %v2361_v36  ;;  %v2283_v5 = vmax.f32 %v2219_v17, 0.0  ;;  %v9372_v29 = vld [vmem:[#allocation16_spill] sm:$0xff]  ;;  %v8012_v17 = vpop.f32.mrf.mxu1 }
 0x179   : > { %v2017_v20 = vpop.f32.mrf.mxu0  ;;  %2564 = vmatmul.mubr.bf16.gmra.mxu1 %v2360_v57  ;;  %2822 = vmatmul.mubr.bf16.gmra.mxu0 %v2360_v57  ;;  %v9371_v57 = vld [vmem:[#allocation39_spill] sm:$0xff] }
 0x17a   : > { %v2284_v63 = vmax.f32 %v2220_v23, 0.0  ;;  %v2221_v52 = vadd.f32 %v7899_v28, %v2145_v16  ;;  %v2146_v44 = vadd.f32 %v2017_v20, %v1736_v22  ;;  %v1752_v18 = vadd.f32 %v9371_v57, %v9370_v27  ;;  %v9373_v22 = vld [vmem:[#allocation42_spill] sm:$0xff] }
 0x17b   : > { %v2019_v33 = vpop.f32.mrf.mxu0  ;;  %v1756_v25 = vadd.f32 %v9373_v22, %v9372_v29 }
 0x17c   : > { %v2285_v38 = vmax.f32 %v2221_v52, 0.0  ;;  %v2147_v14 = vadd.f32 %v2019_v33, %v1738_v51  ;;  %v2362_v54 = vpack.c.bf16 %v2284_v63, %v2282_v40  ;;  %v2222_v4 = vadd.f32 %v7891_v15, %v2146_v44  ;;  %v9374_v40 = vld [vmem:[#allocation17_spill] sm:$0xff] }
 0x17d   : > { %v2021_v53 = vpop.f32.mrf.mxu0  ;;  %v9375_v63 = vld [vmem:[#allocation45_spill] sm:$0xff] }
 0x17e   : > { %v2363_v41 = vpack.c.bf16 %v2285_v38, %v2283_v5  ;;  %v2148_v56 = vadd.f32 %v2021_v53, %v1740_v35  ;;  %v2223_v42 = vadd.f32 %v7899_v28, %v2147_v14  ;;  %v2286_v3 = vmax.f32 %v2222_v4, 0.0  ;;  %v9376_v14 = vld [vmem:[#allocation18_spill] sm:$0xff] }
 0x17f   : > { %v2023_v11 = vpop.f32.mrf.mxu0  ;;  %v1758_v52 = vadd.f32 %v9375_v63, %v9374_v40  ;;  %v9385_v40 = vld [vmem:[#allocation23_spill] sm:$0xff] }
 0x180   : > { %v2224_v47 = vadd.f32 %v7891_v15, %v2148_v56  ;;  %v2149_v0 = vadd.f32 %v2023_v11, %v1742_v12  ;;  %5972 = vmatprep.mubr.msk.bf16.mxu1 %vm2458_vm2, %v2363_v41  ;;  %6024 = vmatprep.mubr.msk.bf16.mxu0 %vm2458_vm2, %v2363_v41  ;;  %v2287_v31 = vmax.f32 %v2223_v42, 0.0  ;;  %v8023_v12 = vpop.f32.mrf.mxu1  ;;  %v1772_v63 = vadd.f32 %v7915_v1, %v9385_v40  ;;  %v9387_v1 = vld [vmem:[#allocation25_spill] sm:$0xff] }
 0x181   : > { %v2027_v21 = vpop.f32.mrf.mxu0  ;;  %2572 = vmatmul.mubr.bf16.gmra.mxu1 %v2362_v54  ;;  %2830 = vmatmul.mubr.bf16.gmra.mxu0 %v2362_v54  ;;  %v9377_v54 = vld [vmem:[#allocation48_spill] sm:$0xff] }
 0x182   : > { %v2288_v2 = vmax.f32 %v2224_v47, 0.0  ;;  %v2225_v58 = vadd.f32 %v7899_v28, %v2149_v0  ;;  %v2150_v46 = vadd.f32 %v2027_v21, %v1746_v49  ;;  %v1760_v53 = vadd.f32 %v9377_v54, %v9376_v14  ;;  %v9378_v47 = vld [vmem:[#allocation19_spill] sm:$0xff]  ;;  %v8030_v30 = vpop.f32.mrf.mxu1 }
 0x183   : > { %v2029_v48 = vpop.f32.mrf.mxu0  ;;  %v9379_v0 = vld [vmem:[#allocation51_spill] sm:$0xff] }
 0x184   : > { %v2289_v43 = vmax.f32 %v2225_v58, 0.0  ;;  %v2151_v60 = vadd.f32 %v2029_v48, %v1748_v62  ;;  %v2364_v8 = vpack.c.bf16 %v2288_v2, %v2286_v3  ;;  %v2226_v36 = vadd.f32 %v7891_v15, %v2150_v46  ;;  %v9380_v2 = vld [vmem:[#allocation20_spill] sm:$0xff]  ;;  %v9381_v58 = vld [vmem:[#allocation54_spill] sm:$0xff]  ;;  %v8041_v29 = vpop.f32.mrf.mxu1 }
 0x185   : > { %v2031_v59 = vpop.f32.mrf.mxu0  ;;  %v1762_v50 = vadd.f32 %v9379_v0, %v9378_v47  ;;  %v1766_v46 = vadd.f32 %v9381_v58, %v9380_v2 }
 0x186   : > { %v2365_v13 = vpack.c.bf16 %v2289_v43, %v2287_v31  ;;  %v2152_v19 = vadd.f32 %v2031_v59, %v1750_v61  ;;  %v2227_v16 = vadd.f32 %v7899_v28, %v2151_v60  ;;  %v2290_v35 = vmax.f32 %v2226_v36, 0.0  ;;  %v9382_v43 = vld [vmem:[#allocation21_spill] sm:$0xff]  ;;  %v9383_v60 = vld [vmem:[#allocation56_spill] sm:$0xff]  ;;  %v9384_v36 = vld [vmem:[#allocation22_spill] sm:$0xff] }
 0x187   : > { %v2033_v23 = vpop.f32.mrf.mxu0 }
 0x188   : > { %v2228_v51 = vadd.f32 %v7891_v15, %v2152_v19  ;;  %v2153_v20 = vadd.f32 %v2033_v23, %v1752_v18  ;;  %5973 = vmatprep.mubr.msk.bf16.mxu1 %vm2458_vm2, %v2365_v13  ;;  %6025 = vmatprep.mubr.msk.bf16.mxu0 %vm2458_vm2, %v2365_v13  ;;  %v2291_v4 = vmax.f32 %v2227_v16, 0.0  ;;  %v1770_v19 = vadd.f32 %v7904_v37, %v9384_v36 }
 0x189   : > { %v2037_v44 = vpop.f32.mrf.mxu0  ;;  %2580 = vmatmul.mubr.bf16.gmra.mxu1 %v2364_v8  ;;  %2838 = vmatmul.mubr.bf16.gmra.mxu0 %v2364_v8  ;;  %v1768_v8 = vadd.f32 %v9383_v60, %v9382_v43 }
 0x18a   : > { %v2292_v33 = vmax.f32 %v2228_v51, 0.0  ;;  %v2229_v5 = vadd.f32 %v7899_v28, %v2153_v20  ;;  %v2154_v38 = vadd.f32 %v2037_v44, %v1756_v25 }
 0x18b   : > { %v2039_v41 = vpop.f32.mrf.mxu0 }
 0x18c   : > { %v2293_v56 = vmax.f32 %v2229_v5, 0.0  ;;  %v2155_v49 = vadd.f32 %v2039_v41, %v1758_v52  ;;  %v2366_v11 = vpack.c.bf16 %v2292_v33, %v2290_v35  ;;  %v2230_v21 = vadd.f32 %v7891_v15, %v2154_v38  ;;  %v9386_v33 = vld [vmem:[#allocation24_spill] sm:$0xff]  ;;  %v8048_v38 = vpop.f32.mrf.mxu1 }
 0x18d   : > { %v2041_v42 = vpop.f32.mrf.mxu0  ;;  %v1776_v5 = vadd.f32 %v7922_v6, %v9386_v33  ;;  %v1778_v41 = vadd.f32 %v7933_v10, %v9387_v1  ;;  %v9389_v10 = vld [vmem:[#allocation27_spill] sm:$0xff] }
 0x18e   : > { %v2367_v62 = vpack.c.bf16 %v2293_v56, %v2291_v4  ;;  %v2156_v3 = vadd.f32 %v2041_v42, %v1760_v53  ;;  %v2231_v61 = vadd.f32 %v7899_v28, %v2155_v49  ;;  %v2294_v27 = vmax.f32 %v2230_v21, 0.0  ;;  %v9388_v42 = vld [vmem:[#allocation26_spill] sm:$0xff]  ;;  %v8059_v0 = vpop.f32.mrf.mxu1 }
 0x18f   : > { %v2043_v55 = vpop.f32.mrf.mxu0  ;;  %v1780_v47 = vadd.f32 %v7940_v24, %v9388_v42  ;;  %v9396_v42 = vld [vmem:[#allocation35_spill] sm:$0xff] }
 0x190   : > { %v2232_v48 = vadd.f32 %v7891_v15, %v2156_v3  ;;  %v2157_v31 = vadd.f32 %v2043_v55, %v1762_v50  ;;  %5974 = vmatprep.mubr.msk.bf16.mxu1 %vm2458_vm2, %v2367_v62  ;;  %6026 = vmatprep.mubr.msk.bf16.mxu0 %vm2458_vm2, %v2367_v62  ;;  %v2295_v25 = vmax.f32 %v2231_v61, 0.0  ;;  %v8066_v60 = vpop.f32.mrf.mxu1 }
 0x191   : > { %v2047_v59 = vpop.f32.mrf.mxu0  ;;  %2588 = vmatmul.mubr.bf16.gmra.mxu1 %v2366_v11  ;;  %2846 = vmatmul.mubr.bf16.gmra.mxu0 %v2366_v11 }
 0x192   : > { %v2296_v57 = vmax.f32 %v2232_v48, 0.0  ;;  %v2233_v18 = vadd.f32 %v7899_v28, %v2157_v31  ;;  %v2158_v13 = vadd.f32 %v2047_v59, %v1766_v46  ;;  %v1782_v46 = vadd.f32 %v7951_v7, %v9389_v10  ;;  %v9390_v31 = vld [vmem:[#allocation28_spill] sm:$0xff]  ;;  %v9391_v7 = vld [vmem:[#allocation29_spill] sm:$0xff] }
 0x193   : > { %v2049_v22 = vpop.f32.mrf.mxu0  ;;  %v1786_v43 = vadd.f32 %v7958_v34, %v9390_v31  ;;  %v9398_v31 = vld [vmem:[#allocation38_spill] sm:$0xff] }
 0x194   : > { %v2297_v23 = vmax.f32 %v2233_v18, 0.0  ;;  %v2159_v16 = vadd.f32 %v2049_v22, %v1768_v8  ;;  %v2368_v51 = vpack.c.bf16 %v2296_v57, %v2294_v27  ;;  %v2234_v44 = vadd.f32 %v7891_v15, %v2158_v13  ;;  %v9392_v22 = vld [vmem:[#allocation30_spill] sm:$0xff] }
 0x195   : > { %v2051_v20 = vpop.f32.mrf.mxu0  ;;  %v1788_v57 = vadd.f32 %v7969_v9, %v9391_v7  ;;  %v9393_v9 = vld [vmem:[#allocation31_spill] sm:$0xff]  ;;  %v9399_v7 = vld [vmem:[#allocation40_spill] sm:$0xff] }
 0x196   : > { %v2369_v52 = vpack.c.bf16 %v2297_v23, %v2295_v25  ;;  %v2160_v35 = vadd.f32 %v2051_v20, %v1770_v19  ;;  %v2235_v14 = vadd.f32 %v7899_v28, %v2159_v16  ;;  %v2298_v56 = vmax.f32 %v2234_v44, 0.0  ;;  %v8077_v23 = vpop.f32.mrf.mxu1 }
 0x197   : > { %v2053_v37 = vpop.f32.mrf.mxu0  ;;  %v1790_v25 = vadd.f32 %v7976_v39, %v9392_v22  ;;  %v1792_v44 = vadd.f32 %v7987_v32, %v9393_v9  ;;  %v9395_v32 = vld [vmem:[#allocation34_spill] sm:$0xff] }
 0x198   : > { %v2236_v54 = vadd.f32 %v7891_v15, %v2160_v35  ;;  %v2161_v53 = vadd.f32 %v2053_v37, %v1772_v63  ;;  %5975 = vmatprep.mubr.msk.bf16.mxu1 %vm2458_vm2, %v2369_v52  ;;  %6027 = vmatprep.mubr.msk.bf16.mxu0 %vm2458_vm2, %v2369_v52  ;;  %v2299_v62 = vmax.f32 %v2235_v14, 0.0  ;;  %v9394_v37 = vld [vmem:[#allocation32_spill] sm:$0xff] }
 0x199   : > { %v2057_v4 = vpop.f32.mrf.mxu0  ;;  %2596 = vmatmul.mubr.bf16.gmra.mxu1 %v2368_v51  ;;  %2854 = vmatmul.mubr.bf16.gmra.mxu0 %v2368_v51  ;;  %v1796_v14 = vadd.f32 %v7994_v26, %v9394_v37 }
 0x19a   : > { %v2300_v6 = vmax.f32 %v2236_v54, 0.0  ;;  %v2237_v49 = vadd.f32 %v7899_v28, %v2161_v53  ;;  %v2162_v11 = vadd.f32 %v2057_v4, %v1776_v5  ;;  %v8084_v54 = vpop.f32.mrf.mxu1  ;;  %v1798_v4 = vadd.f32 %v8005_v45, %v9395_v32  ;;  %v9397_v45 = vld [vmem:[#allocation37_spill] sm:$0xff] }
 0x19b   : > { %v2059_v50 = vpop.f32.mrf.mxu0 }
 0x19c   : > { %v2301_v21 = vmax.f32 %v2237_v49, 0.0  ;;  %v2163_v3 = vadd.f32 %v2059_v50, %v1778_v41  ;;  %v2370_v2 = vpack.c.bf16 %v2300_v6, %v2298_v56  ;;  %v2238_v61 = vadd.f32 %v7891_v15, %v2162_v11  ;;  %v8095_v50 = vpop.f32.mrf.mxu1 }
 0x19d   : > { %v2061_v58 = vpop.f32.mrf.mxu0 }
 0x19e   : > { %v2371_v55 = vpack.c.bf16 %v2301_v21, %v2299_v62  ;;  %v2164_v48 = vadd.f32 %v2061_v58, %v1780_v47  ;;  %v2239_v8 = vadd.f32 %v7899_v28, %v2163_v3  ;;  %v2302_v13 = vmax.f32 %v2238_v61, 0.0 }
 0x19f   : > { %v2063_v24 = vpop.f32.mrf.mxu0  ;;  %v1800_v47 = vadd.f32 %v8012_v17, %v9396_v42 }
 0x1a0   : > { %v2240_v59 = vadd.f32 %v7891_v15, %v2164_v48  ;;  %v2165_v27 = vadd.f32 %v2063_v24, %v1782_v46  ;;  %5976 = vmatprep.mubr.msk.bf16.mxu1 %vm2458_vm2, %v2371_v55  ;;  %6028 = vmatprep.mubr.msk.bf16.mxu0 %vm2458_vm2, %v2371_v55  ;;  %v2303_v51 = vmax.f32 %v2239_v8, 0.0  ;;  %v1802_v46 = vadd.f32 %v8023_v12, %v9397_v45  ;;  %v1825_v24 = vpop.f32.mrf.mxu1 }
 0x1a1   : > { %v2067_v18 = vpop.f32.mrf.mxu0  ;;  %2604 = vmatmul.mubr.bf16.gmra.mxu1 %v2370_v2  ;;  %2862 = vmatmul.mubr.bf16.gmra.mxu0 %v2370_v2  ;;  %v1808_v12 = vadd.f32 %v8041_v29, %v9399_v7 }
 0x1a2   : > { %v2304_v34 = vmax.f32 %v2240_v59, 0.0  ;;  %v2241_v36 = vadd.f32 %v7899_v28, %v2165_v27  ;;  %v2166_v19 = vadd.f32 %v2067_v18, %v1786_v43  ;;  %v1806_v43 = vadd.f32 %v8030_v30, %v9398_v31  ;;  %v1827_v22 = vpop.f32.mrf.mxu1 }
 0x1a3   : > { %v2069_v16 = vpop.f32.mrf.mxu0 }
 0x1a4   : > { %v2305_v20 = vmax.f32 %v2241_v36, 0.0  ;;  %v2167_v40 = vadd.f32 %v2069_v16, %v1788_v57  ;;  %v2372_v63 = vpack.c.bf16 %v2304_v34, %v2302_v13  ;;  %v2242_v33 = vadd.f32 %v7891_v15, %v2166_v19  ;;  %v9400_v36 = vld [vmem:[#allocation41_spill] sm:$0xff]  ;;  %v1829_v37 = vpop.f32.mrf.mxu1 }
 0x1a5   : > { %v2071_v52 = vpop.f32.mrf.mxu0  ;;  %v1810_v19 = vadd.f32 %v8048_v38, %v9400_v36 }
 0x1a6   : > { %v2373_v35 = vpack.c.bf16 %v2305_v20, %v2303_v51  ;;  %v2168_v5 = vadd.f32 %v2071_v52, %v1790_v25  ;;  %v2243_v53 = vadd.f32 %v7899_v28, %v2167_v40  ;;  %v2306_v6 = vmax.f32 %v2242_v33, 0.0  ;;  %v9401_v52 = vld [vmem:[#allocation43_spill] sm:$0xff]  ;;  %v9402_v33 = vld [vmem:[#allocation44_spill] sm:$0xff] }
 0x1a7   : > { %v2073_v39 = vpop.f32.mrf.mxu0  ;;  %v1812_v29 = vadd.f32 %v8059_v0, %v9401_v52 }
 0x1a8   : > { %v2244_v1 = vadd.f32 %v7891_v15, %v2168_v5  ;;  %v2169_v41 = vadd.f32 %v2073_v39, %v1792_v44  ;;  %5977 = vmatprep.mubr.msk.bf16.mxu1 %vm2458_vm2, %v2373_v35  ;;  %6029 = vmatprep.mubr.msk.bf16.mxu0 %vm2458_vm2, %v2373_v35  ;;  %v2307_v21 = vmax.f32 %v2243_v53, 0.0  ;;  %v1816_v5 = vadd.f32 %v8066_v60, %v9402_v33  ;;  %v9410_v33 = vld [vmem:[#allocation11_spill] sm:$0xff] }
 0x1a9   : > { %v2077_v56 = vpop.f32.mrf.mxu0  ;;  %2612 = vmatmul.mubr.bf16.gmra.mxu1 %v2372_v63  ;;  %2870 = vmatmul.mubr.bf16.gmra.mxu0 %v2372_v63 }
 0x1aa   : > { %v2308_v26 = vmax.f32 %v2244_v1, 0.0  ;;  %v2245_v49 = vadd.f32 %v7899_v28, %v2169_v41  ;;  %v2170_v11 = vadd.f32 %v2077_v56, %v1796_v14  ;;  %v9403_v1 = vld [vmem:[#allocation46_spill] sm:$0xff] }
 0x1ab   : > { %v2079_v62 = vpop.f32.mrf.mxu0  ;;  %v1818_v0 = vadd.f32 %v8077_v23, %v9403_v1  ;;  %v9412_v1 = vld [vmem:[#allocation12_spill] sm:$0xff] }
 0x1ac   : > { %v2309_v3 = vmax.f32 %v2245_v49, 0.0  ;;  %v2171_v2 = vadd.f32 %v2079_v62, %v1798_v4  ;;  %v2374_v58 = vpack.c.bf16 %v2308_v26, %v2306_v6  ;;  %v2246_v61 = vadd.f32 %v7891_v15, %v2170_v11  ;;  %v9404_v6 = vld [vmem:[#allocation47_spill] sm:$0xff]  ;;  %v1831_v49 = vpop.f32.mrf.mxu1 }
 0x1ad   : > { %v2081_v10 = vpop.f32.mrf.mxu0  ;;  %v1820_v26 = vadd.f32 %v8084_v54, %v9404_v6 }
 0x1ae   : > { %v2375_v55 = vpack.c.bf16 %v2309_v3, %v2307_v21  ;;  %v2172_v48 = vadd.f32 %v2081_v10, %v1800_v47  ;;  %v2247_v8 = vadd.f32 %v7899_v28, %v2171_v2  ;;  %v2310_v18 = vmax.f32 %v2246_v61, 0.0  ;;  %v9405_v2 = vld [vmem:[#allocation49_spill] sm:$0xff]  ;;  %v1835_v61 = vpop.f32.mrf.mxu1 }
 0x1af   : > { %v2083_v17 = vpop.f32.mrf.mxu0  ;;  %v1822_v23 = vadd.f32 %v8095_v50, %v9405_v2 }
 0x1b0   : > { %v2248_v59 = vadd.f32 %v7891_v15, %v2172_v48  ;;  %v2173_v27 = vadd.f32 %v2083_v17, %v1802_v46  ;;  %5978 = vmatprep.mubr.msk.bf16.mxu1 %vm2458_vm2, %v2375_v55  ;;  %6030 = vmatprep.mubr.msk.bf16.mxu0 %vm2458_vm2, %v2375_v55  ;;  %v2311_v16 = vmax.f32 %v2247_v8, 0.0  ;;  %v9406_v46 = vld [vmem:[#allocation50_spill] sm:$0xff]  ;;  %v9407_v17 = vld [vmem:[#allocation52_spill] sm:$0xff] }
 0x1b1   : > { %v2087_v57 = vpop.f32.mrf.mxu0  ;;  %2620 = vmatmul.mubr.bf16.gmra.mxu1 %v2374_v58  ;;  %2878 = vmatmul.mubr.bf16.gmra.mxu0 %v2374_v58  ;;  %v1826_v55 = vadd.f32 %v1825_v24, %v9406_v46  ;;  %v1828_v8 = vadd.f32 %v1827_v22, %v9407_v17 }
 0x1b2   : > { %v2312_v13 = vmax.f32 %v2248_v59, 0.0  ;;  %v2249_v30 = vadd.f32 %v7899_v28, %v2173_v27  ;;  %v2174_v34 = vadd.f32 %v2087_v57, %v1806_v43 }
 0x1b3   : > { %v2089_v25 = vpop.f32.mrf.mxu0 }
 0x1b4   : > { %v2376_v51 = vpack.c.bf16 %v2312_v13, %v2310_v18  ;;  %v2313_v20 = vmax.f32 %v2249_v30, 0.0  ;;  %v2175_v40 = vadd.f32 %v2089_v25, %v1808_v12  ;;  %v2250_v44 = vadd.f32 %v7891_v15, %v2174_v34  ;;  %v9408_v12 = vld [vmem:[#allocation53_spill] sm:$0xff]  ;;  %v1837_v18 = vpop.f32.mrf.mxu1 }
 0x1b5   : > { %v2091_v63 = vpop.f32.mrf.mxu0  ;;  %v1830_v57 = vadd.f32 %v1829_v37, %v9408_v12 }
 0x1b6   : > { %v2377_v9 = vpack.c.bf16 %v2313_v20, %v2311_v16  ;;  %v2176_v35 = vadd.f32 %v2091_v63, %v1810_v19  ;;  %v2251_v38 = vadd.f32 %v7899_v28, %v2175_v40  ;;  %v2314_v32 = vmax.f32 %v2250_v44, 0.0  ;;  %v9409_v16 = vld [vmem:[#allocation55_spill] sm:$0xff]  ;;  %v1839_v63 = vpop.f32.mrf.mxu1 }
 0x1b7   : > { %v2093_v14 = vpop.f32.mrf.mxu0 }
 0x1b8   : > { %v2252_v39 = vadd.f32 %v7891_v15, %v2176_v35  ;;  %v2177_v53 = vadd.f32 %v2093_v14, %v1812_v29  ;;  %5979 = vmatprep.mubr.msk.bf16.mxu1 %vm2458_vm2, %v2377_v9  ;;  %6031 = vmatprep.mubr.msk.bf16.mxu0 %vm2458_vm2, %v2377_v9  ;;  %v2315_v42 = vmax.f32 %v2251_v38, 0.0 }
 0x1b9   : > { %v2097_v41 = vpop.f32.mrf.mxu0  ;;  %2628 = vmatmul.mubr.bf16.gmra.mxu1 %v2376_v51  ;;  %2886 = vmatmul.mubr.bf16.gmra.mxu0 %v2376_v51  ;;  %v1832_v51 = vadd.f32 %v1831_v49, %v9409_v16 }
 0x1ba   : > { %v2316_v4 = vmax.f32 %v2252_v39, 0.0  ;;  %v2253_v60 = vadd.f32 %v7899_v28, %v2177_v53  ;;  %v2178_v56 = vadd.f32 %v2097_v41, %v1816_v5  ;;  %v1838_v5 = vadd.f32 %v1837_v18, %v9410_v33  ;;  %v9411_v39 = vld [vmem:[#allocation10_spill] sm:$0xff]  ;;  %v1841_v41 = vpop.f32.mrf.mxu1 }
 0x1bb   : > { %v2099_v11 = vpop.f32.mrf.mxu0  ;;  %v1836_v53 = vadd.f32 %v1835_v61, %v9411_v39 }
 0x1bc   : > { %v2378_v47 = vpack.c.bf16 %v2316_v4, %v2314_v32  ;;  %v2317_v62 = vmax.f32 %v2253_v60, 0.0  ;;  %v2179_v21 = vadd.f32 %v2099_v11, %v1818_v0  ;;  %v2254_v10 = vadd.f32 %v7891_v15, %v2178_v56  ;;  %v9413_v11 = vld [vmem:[#allocation13_spill] sm:$0xff] }
 0x1bd   : > { %v2101_v3 = vpop.f32.mrf.mxu0  ;;  %v1840_v0 = vadd.f32 %v1839_v63, %v9412_v1 }
 0x1be   : > { %v2379_v58 = vpack.c.bf16 %v2317_v62, %v2315_v42  ;;  %v2180_v45 = vadd.f32 %v2101_v3, %v1820_v26  ;;  %v2255_v54 = vadd.f32 %v7899_v28, %v2179_v21  ;;  %v2318_v59 = vmax.f32 %v2254_v10, 0.0 }
 0x1bf   : > { %v2103_v48 = vpop.f32.mrf.mxu0  ;;  %v1842_v42 = vadd.f32 %v1841_v41, %v9413_v11 }
 0x1c0   : > { %v2256_v31 = vadd.f32 %v7891_v15, %v2180_v45  ;;  %v2181_v43 = vadd.f32 %v2103_v48, %v1822_v23  ;;  %5980 = vmatprep.mubr.msk.bf16.mxu1 %vm2458_vm2, %v2379_v58  ;;  %6032 = vmatprep.mubr.msk.bf16.mxu0 %vm2458_vm2, %v2379_v58  ;;  %v2319_v30 = vmax.f32 %v2255_v54, 0.0 }
 0x1c1   : > { %v2107_v50 = vpop.f32.mrf.mxu0  ;;  %2636 = vmatmul.mubr.bf16.gmra.mxu1 %v2378_v47  ;;  %2894 = vmatmul.mubr.bf16.gmra.mxu0 %v2378_v47 }
 0x1c2   : > { %v2320_v27 = vmax.f32 %v2256_v31, 0.0  ;;  %v2257_v24 = vadd.f32 %v7899_v28, %v2181_v43  ;;  %v2182_v7 = vadd.f32 %v2107_v50, %v1826_v55  ;;  %v9414_v31 = vmov 0  }
 0x1c3   : > { %v2109_v13 = vpop.f32.mrf.mxu0 }
 0x1c4   : > { %v2380_v34 = vpack.c.bf16 %v2320_v27, %v2318_v59  ;;  %v2321_v36 = vmax.f32 %v2257_v24, 0.0  ;;  %v2183_v19 = vadd.f32 %v2109_v13, %v1828_v8  ;;  %v2258_v20 = vadd.f32 %v7891_v15, %v2182_v7 }
 0x1c5   : > { %v2111_v25 = vpop.f32.mrf.mxu0 }
 0x1c6   : > { %v2381_v22 = vpack.c.bf16 %v2321_v36, %v2319_v30  ;;  %v2184_v40 = vadd.f32 %v2111_v25, %v1830_v57  ;;  %v2259_v29 = vadd.f32 %v7899_v28, %v2183_v19  ;;  %v2322_v37 = vmax.f32 %v2258_v20, 0.0  ;;  %v9415_v30 = vld [vmem:[#allocation2_spill] sm:$0xff] }
 0x1c7   : > { %v2113_v52 = vpop.f32.mrf.mxu0 }
 0x1c8   : > { %v2260_v9 = vadd.f32 %v7891_v15, %v2184_v40  ;;  %v2185_v44 = vadd.f32 %v2113_v52, %v1832_v51  ;;  %5981 = vmatprep.mubr.msk.bf16.mxu1 %vm2458_vm2, %v2381_v22  ;;  %6033 = vmatprep.mubr.msk.bf16.mxu0 %vm2458_vm2, %v2381_v22  ;;  %v2323_v4 = vmax.f32 %v2259_v29, 0.0 }
 0x1c9   : > { %v2117_v35 = vpop.f32.mrf.mxu0  ;;  %2644 = vmatmul.mubr.bf16.gmra.mxu1 %v2380_v34  ;;  %2902 = vmatmul.mubr.bf16.gmra.mxu0 %v2380_v34 }
 0x1ca   : > { %v2324_v14 = vmax.f32 %v2260_v9, 0.0  ;;  %v2261_v38 = vadd.f32 %v7899_v28, %v2185_v44  ;;  %v2186_v26 = vadd.f32 %v2117_v35, %v1836_v53 }
 0x1cb   : > { %v2119_v32 = vpop.f32.mrf.mxu0 }
 0x1cc   : > { %v2382_v60 = vpack.c.bf16 %v2324_v14, %v2322_v37  ;;  %v2325_v56 = vmax.f32 %v2261_v38, 0.0  ;;  %v2187_v6 = vadd.f32 %v2119_v32, %v1838_v5  ;;  %v2262_v58 = vadd.f32 %v7891_v15, %v2186_v26 }
 0x1cd   : > { %v2121_v49 = vpop.f32.mrf.mxu0 }
 0x1ce   : > { %v2383_v47 = vpack.c.bf16 %v2325_v56, %v2323_v4  ;;  %v2188_v62 = vadd.f32 %v2121_v49, %v1840_v0  ;;  %v2263_v3 = vadd.f32 %v7899_v28, %v2187_v6  ;;  %v2326_v61 = vmax.f32 %v2262_v58, 0.0 }
 0x1cf   : > { %v2123_v21 = vpop.f32.mrf.mxu0 }
 0x1d0   : > { %v2264_v2 = vadd.f32 %v7891_v15, %v2188_v62  ;;  %v2189_v23 = vadd.f32 %v2123_v21, %v1842_v42  ;;  %5982 = vmatprep.mubr.msk.bf16.mxu1 %vm2458_vm2, %v2383_v47  ;;  %6034 = vmatprep.mubr.msk.bf16.mxu0 %vm2458_vm2, %v2383_v47  ;;  %v2327_v46 = vmax.f32 %v2263_v3, 0.0 }
 0x1d1   : > { %2652 = vmatmul.mubr.bf16.gmra.mxu1 %v2382_v60  ;;  %2910 = vmatmul.mubr.bf16.gmra.mxu0 %v2382_v60 }
 0x1d2   : > { %v2265_v10 = vadd.f32 %v7899_v28, %v2189_v23  ;;  %v2328_v45 = vmax.f32 %v2264_v2, 0.0 }
 0x1d4   : > { %v2329_v55 = vmax.f32 %v2265_v10, 0.0  ;;  %v2384_v54 = vpack.c.bf16 %v2328_v45, %v2326_v61 }
 0x1d6   : > { %v2385_v48 = vpack.c.bf16 %v2329_v55, %v2327_v46 }
 0x1d8   : > { %5983 = vmatprep.mubr.msk.bf16.mxu1 %vm2458_vm2, %v2385_v48  ;;  %6035 = vmatprep.mubr.msk.bf16.mxu0 %vm2458_vm2, %v2385_v48 }
 0x1d9   : > { %2660 = vmatmul.mubr.bf16.gmra.mxu1 %v2384_v54  ;;  %2918 = vmatmul.mubr.bf16.gmra.mxu0 %v2384_v54 }
 0x1da   : > { %4002 = vmatprep.mubr.bf16.mxu0 %v9414_v31 }
 0x221   : > { %v2541_v43 = vpop.f32.mrf.mxu1  ;;  %v2799_v15 = vpop.f32.mrf.mxu0 }
 0x222   : > { %v8156_v17 = vmax.f32 %v2541_v43, %v2799_v15 }
 0x223   : > { %v2543_v8 = vpop.f32.mrf.mxu1  ;;  %v2801_v28 = vpop.f32.mrf.mxu0 }
 0x224   : > { %v2958_v12 = vrot.slane %v8156_v17, 1 }
 0x225   : > { %v2544_v50 = vpop.f32.mrf.mxu1  ;;  %v2802_v59 = vpop.f32.mrf.mxu0 }
 0x226   : > { %v2927_v27 = vmax.f32 %v2544_v50, %v2802_v59 }
 0x227   : > { %v2546_v24 = vpop.f32.mrf.mxu1  ;;  %v2804_v7 = vpop.f32.mrf.mxu0 }
 0x228   : > { %v2959_v57 = vrot.slane %v2927_v27, 1 }
 0x229   : > { %v2549_v18 = vpop.f32.mrf.mxu1  ;;  %v2807_v13 = vpop.f32.mrf.mxu0 }
 0x22a   : > { %v3020_v34 = vsel %vm1151_vm5, %v2958_v12, %v2959_v57  ;;  %v2928_v36 = vmax.f32 %v2549_v18, %v2807_v13 }
 0x22b   : > { %v3022_v19 = vmax.f32 %v8156_v17, %v3020_v34  ;;  %v2551_v25 = vpop.f32.mrf.mxu1  ;;  %v2809_v16 = vpop.f32.mrf.mxu0 }
 0x22c   : > { %v2960_v51 = vrot.slane %v2928_v36, 1 }
 0x22d   : > { %v2552_v22 = vpop.f32.mrf.mxu1  ;;  %v2810_v20 = vpop.f32.mrf.mxu0 }
 0x22e   : > { %v3019_v40 = vsel %vm1151_vm5, %v2959_v57, %v2960_v51  ;;  %v2929_v63 = vmax.f32 %v2552_v22, %v2810_v20  ;;  %v6670_v57 = vld [vmem:[%s9275_s4 + $0x4] ss:$8 sps:$4 sm:$0xff]  }
 0x22f   : > { %v3023_v52 = vmax.f32 %v2927_v27, %v3019_v40  ;;  %v2554_v29 = vpop.f32.mrf.mxu1  ;;  %v2812_v9 = vpop.f32.mrf.mxu0  ;;  %3198 = vmatprep.mubr.bf16.mxu1 %v6670_v57 }
 0x230   : > { %v2961_v44 = vrot.slane %v2929_v63, 1 }
 0x231   : > { %v2557_v35 = vpop.f32.mrf.mxu1  ;;  %v2815_v33 = vpop.f32.mrf.mxu0  ;;  %v8166_v5 = vpack.c.bf16 %v3023_v52, %v3022_v19 }
 0x232   : > { %v3018_v37 = vsel %vm1151_vm5, %v2960_v51, %v2961_v44  ;;  %v2930_v14 = vmax.f32 %v2557_v35, %v2815_v33 }
 0x233   : > { %v3024_v38 = vmax.f32 %v2928_v36, %v3018_v37  ;;  %v2559_v39 = vpop.f32.mrf.mxu1  ;;  %v2817_v53 = vpop.f32.mrf.mxu0 }
 0x234   : > { %v2962_v1 = vrot.slane %v2930_v14, 1 }
 0x235   : > { %v2560_v0 = vpop.f32.mrf.mxu1  ;;  %v2818_v41 = vpop.f32.mrf.mxu0 }
 0x236   : > { %v3017_v32 = vsel %vm1151_vm5, %v2961_v44, %v2962_v1  ;;  %v2931_v4 = vmax.f32 %v2560_v0, %v2818_v41 }
 0x237   : > { %v3025_v60 = vmax.f32 %v2929_v63, %v3017_v32  ;;  %v2562_v56 = vpop.f32.mrf.mxu1  ;;  %v2820_v6 = vpop.f32.mrf.mxu0 }
 0x238   : > { %v2963_v26 = vrot.slane %v2931_v4, 1 }
 0x239   : > { %v2565_v49 = vpop.f32.mrf.mxu1  ;;  %v2823_v11 = vpop.f32.mrf.mxu0  ;;  %v8172_v42 = vpack.c.bf16 %v3025_v60, %v3024_v38 }
 0x23a   : > { %v3016_v47 = vsel %vm1151_vm5, %v2962_v1, %v2963_v26  ;;  %v2932_v62 = vmax.f32 %v2565_v49, %v2823_v11 }
 0x23b   : > { %v3026_v21 = vmax.f32 %v2930_v14, %v3016_v47  ;;  %v2567_v3 = vpop.f32.mrf.mxu1  ;;  %v2825_v2 = vpop.f32.mrf.mxu0 }
 0x23c   : > { %v2964_v23 = vrot.slane %v2932_v62, 1 }
 0x23d   : > { %v2568_v58 = vpop.f32.mrf.mxu1  ;;  %v2826_v10 = vpop.f32.mrf.mxu0 }
 0x23e   : > { %v3015_v45 = vsel %vm1151_vm5, %v2963_v26, %v2964_v23  ;;  %v2933_v46 = vmax.f32 %v2568_v58, %v2826_v10 }
 0x23f   : > { %v3027_v55 = vmax.f32 %v2931_v4, %v3015_v45  ;;  %v2570_v61 = vpop.f32.mrf.mxu1  ;;  %v2828_v48 = vpop.f32.mrf.mxu0 }
 0x240   : > { %v2965_v54 = vrot.slane %v2933_v46, 1 }
 0x241   : > { %v2573_v43 = vpop.f32.mrf.mxu1  ;;  %v2831_v15 = vpop.f32.mrf.mxu0  ;;  %v8178_v8 = vpack.c.bf16 %v3027_v55, %v3026_v21 }
 0x242   : > { %v3014_v28 = vsel %vm1151_vm5, %v2964_v23, %v2965_v54  ;;  %v2934_v50 = vmax.f32 %v2573_v43, %v2831_v15 }
 0x243   : > { %v3028_v59 = vmax.f32 %v2932_v62, %v3014_v28  ;;  %v2575_v27 = vpop.f32.mrf.mxu1  ;;  %v2833_v24 = vpop.f32.mrf.mxu0 }
 0x244   : > { %v2966_v7 = vrot.slane %v2934_v50, 1 }
 0x245   : > { %v2576_v18 = vpop.f32.mrf.mxu1  ;;  %v2834_v13 = vpop.f32.mrf.mxu0 }
 0x246   : > { %v3013_v34 = vsel %vm1151_vm5, %v2965_v54, %v2966_v7  ;;  %v2935_v36 = vmax.f32 %v2576_v18, %v2834_v13 }
 0x247   : > { %v3029_v19 = vmax.f32 %v2933_v46, %v3013_v34  ;;  %v2578_v25 = vpop.f32.mrf.mxu1  ;;  %v2836_v16 = vpop.f32.mrf.mxu0 }
 0x248   : > { %v2967_v51 = vrot.slane %v2935_v36, 1 }
 0x249   : > { %v2581_v22 = vpop.f32.mrf.mxu1  ;;  %v2839_v20 = vpop.f32.mrf.mxu0  ;;  %v8187_v40 = vpack.c.bf16 %v3029_v19, %v3028_v59 }
 0x24a   : > { %v3012_v63 = vsel %vm1151_vm5, %v2966_v7, %v2967_v51  ;;  %v2936_v52 = vmax.f32 %v2581_v22, %v2839_v20 }
 0x24b   : > { %v3030_v29 = vmax.f32 %v2934_v50, %v3012_v63  ;;  %v2583_v9 = vpop.f32.mrf.mxu1  ;;  %v2841_v44 = vpop.f32.mrf.mxu0 }
 0x24c   : > { %v2968_v35 = vrot.slane %v2936_v52, 1 }
 0x24d   : > { %v2584_v33 = vpop.f32.mrf.mxu1  ;;  %v2842_v37 = vpop.f32.mrf.mxu0 }
 0x24e   : > { %v3011_v14 = vsel %vm1151_vm5, %v2967_v51, %v2968_v35  ;;  %v2937_v38 = vmax.f32 %v2584_v33, %v2842_v37 }
 0x24f   : > { %v3031_v39 = vmax.f32 %v2935_v36, %v3011_v14  ;;  %v2586_v53 = vpop.f32.mrf.mxu1  ;;  %v2844_v1 = vpop.f32.mrf.mxu0 }
 0x250   : > { %v2969_v0 = vrot.slane %v2937_v38, 1 }
 0x251   : > { %v2589_v41 = vpop.f32.mrf.mxu1  ;;  %v2847_v32 = vpop.f32.mrf.mxu0  ;;  %v8193_v4 = vpack.c.bf16 %v3031_v39, %v3030_v29 }
 0x252   : > { %v3010_v60 = vsel %vm1151_vm5, %v2968_v35, %v2969_v0  ;;  %v2938_v56 = vmax.f32 %v2589_v41, %v2847_v32 }
 0x253   : > { %v3032_v6 = vmax.f32 %v2936_v52, %v3010_v60  ;;  %v2591_v26 = vpop.f32.mrf.mxu1  ;;  %v2849_v49 = vpop.f32.mrf.mxu0 }
 0x254   : > { %v2970_v11 = vrot.slane %v2938_v56, 1 }
 0x255   : > { %v2592_v47 = vpop.f32.mrf.mxu1  ;;  %v2850_v62 = vpop.f32.mrf.mxu0 }
 0x256   : > { %v3009_v21 = vsel %vm1151_vm5, %v2969_v0, %v2970_v11  ;;  %v2939_v3 = vmax.f32 %v2592_v47, %v2850_v62 }
 0x257   : > { %v3033_v2 = vmax.f32 %v2937_v38, %v3009_v21  ;;  %v2594_v23 = vpop.f32.mrf.mxu1  ;;  %v2852_v58 = vpop.f32.mrf.mxu0 }
 0x258   : > { %v2971_v10 = vrot.slane %v2939_v3, 1 }
 0x259   : > { %v2597_v45 = vpop.f32.mrf.mxu1  ;;  %v2855_v46 = vpop.f32.mrf.mxu0  ;;  %v8199_v55 = vpack.c.bf16 %v3033_v2, %v3032_v6 }
 0x25a   : > { %v3008_v61 = vsel %vm1151_vm5, %v2970_v11, %v2971_v10  ;;  %v2940_v48 = vmax.f32 %v2597_v45, %v2855_v46 }
 0x25b   : > { %v3034_v54 = vmax.f32 %v2938_v56, %v3008_v61  ;;  %v2599_v43 = vpop.f32.mrf.mxu1  ;;  %v2857_v15 = vpop.f32.mrf.mxu0 }
 0x25c   : > { %v2972_v28 = vrot.slane %v2940_v48, 1 }
 0x25d   : > { %v2600_v50 = vpop.f32.mrf.mxu1  ;;  %v2858_v59 = vpop.f32.mrf.mxu0 }
 0x25e   : > { %v3007_v27 = vsel %vm1151_vm5, %v2971_v10, %v2972_v28  ;;  %v2941_v24 = vmax.f32 %v2600_v50, %v2858_v59 }
 0x25f   : > { %v3035_v7 = vmax.f32 %v2939_v3, %v3007_v27  ;;  %v2602_v57 = vpop.f32.mrf.mxu1  ;;  %v2860_v18 = vpop.f32.mrf.mxu0 }
 0x260   : > { %v2973_v13 = vrot.slane %v2941_v24, 1 }
 0x261   : > { %v2605_v34 = vpop.f32.mrf.mxu1  ;;  %v2863_v36 = vpop.f32.mrf.mxu0  ;;  %v8205_v19 = vpack.c.bf16 %v3035_v7, %v3034_v54 }
 0x262   : > { %v3006_v25 = vsel %vm1151_vm5, %v2972_v28, %v2973_v13  ;;  %v2942_v16 = vmax.f32 %v2605_v34, %v2863_v36 }
 0x263   : > { %v3036_v51 = vmax.f32 %v2940_v48, %v3006_v25  ;;  %v2607_v22 = vpop.f32.mrf.mxu1  ;;  %v2865_v20 = vpop.f32.mrf.mxu0 }
 0x264   : > { %v2974_v63 = vrot.slane %v2942_v16, 1 }
 0x265   : > { %v2608_v52 = vpop.f32.mrf.mxu1  ;;  %v2866_v29 = vpop.f32.mrf.mxu0 }
 0x266   : > { %v3005_v9 = vsel %vm1151_vm5, %v2973_v13, %v2974_v63  ;;  %v2943_v44 = vmax.f32 %v2608_v52, %v2866_v29 }
 0x267   : > { %v3037_v35 = vmax.f32 %v2941_v24, %v3005_v9  ;;  %v2610_v33 = vpop.f32.mrf.mxu1  ;;  %v2868_v37 = vpop.f32.mrf.mxu0 }
 0x268   : > { %v2975_v14 = vrot.slane %v2943_v44, 1 }
 0x269   : > { %v2613_v38 = vpop.f32.mrf.mxu1  ;;  %v2871_v39 = vpop.f32.mrf.mxu0  ;;  %v8211_v53 = vpack.c.bf16 %v3037_v35, %v3036_v51 }
 0x26a   : > { %v2944_v1 = vmax.f32 %v2613_v38, %v2871_v39  ;;  %v3004_v60 = vsel %vm1151_vm5, %v2974_v63, %v2975_v14 }
 0x26b   : > { %v2615_v0 = vpop.f32.mrf.mxu1  ;;  %v2873_v41 = vpop.f32.mrf.mxu0  ;;  %v3038_v62 = vmax.f32 %v2942_v16, %v3004_v60 }
 0x26c   : > { %v2976_v32 = vrot.slane %v2944_v1, 1 }
 0x26d   : > { %v2616_v56 = vpop.f32.mrf.mxu1  ;;  %v2874_v6 = vpop.f32.mrf.mxu0 }
 0x26e   : > { %v2945_v26 = vmax.f32 %v2616_v56, %v2874_v6  ;;  %v3003_v49 = vsel %vm1151_vm5, %v2975_v14, %v2976_v32 }
 0x26f   : > { %v2618_v11 = vpop.f32.mrf.mxu1  ;;  %v2876_v47 = vpop.f32.mrf.mxu0  ;;  %v3039_v21 = vmax.f32 %v2943_v44, %v3003_v49 }
 0x270   : > { %v2977_v3 = vrot.slane %v2945_v26, 1 }
 0x271   : > { %v2621_v2 = vpop.f32.mrf.mxu1  ;;  %v2879_v23 = vpop.f32.mrf.mxu0  ;;  %v8217_v58 = vpack.c.bf16 %v3039_v21, %v3038_v62 }
 0x272   : > { %v8219_v10 = vmax.f32 %v2621_v2, %v2879_v23  ;;  %v3002_v45 = vsel %vm1151_vm5, %v2976_v32, %v2977_v3 }
 0x273   : > { %v2623_v46 = vpop.f32.mrf.mxu1  ;;  %v2881_v61 = vpop.f32.mrf.mxu0  ;;  %v3040_v48 = vmax.f32 %v2944_v1, %v3002_v45 }
 0x274   : > { %v2978_v54 = vrot.slane %v8219_v10, 1 }
 0x275   : > { %v8224_v43 = vpop.f32.mrf.mxu1  ;;  %v8226_v15 = vpop.f32.mrf.mxu0 }
 0x276   : > { %v3001_v28 = vsel %vm1151_vm5, %v2977_v3, %v2978_v54 }
 0x277   : > { %v2626_v50 = vpop.f32.mrf.mxu1  ;;  %v2884_v59 = vpop.f32.mrf.mxu0  ;;  %v3041_v27 = vmax.f32 %v2945_v26, %v3001_v28 }
 0x279   : > { %v8232_v24 = vpop.f32.mrf.mxu1  ;;  %v8234_v7 = vpop.f32.mrf.mxu0  ;;  %v8236_v57 = vpack.c.bf16 %v3041_v27, %v3040_v48 }
 0x27b   : > { %v2631_v18 = vpop.f32.mrf.mxu1  ;;  %v2889_v13 = vpop.f32.mrf.mxu0 }
 0x27d   : > { %v2632_v34 = vpop.f32.mrf.mxu1  ;;  %v2890_v36 = vpop.f32.mrf.mxu0 }
 0x27e   : > { %v2949_v17 = vmax.f32 %v2632_v34, %v2890_v36  ;;  %v2947_v34 = vmax.f32 %v8224_v43, %v8226_v15 }
 0x27f   : > { %v2634_v25 = vpop.f32.mrf.mxu1  ;;  %v2892_v16 = vpop.f32.mrf.mxu0 }
 0x280   : > { %v2981_v36 = vrot.slane %v2949_v17, 1 }
 0x281   : > { %v2637_v51 = vpop.f32.mrf.mxu1  ;;  %v2895_v22 = vpop.f32.mrf.mxu0 }
 0x283   : > { %v2639_v20 = vpop.f32.mrf.mxu1  ;;  %v2897_v63 = vpop.f32.mrf.mxu0 }
 0x285   : > { %v2640_v52 = vpop.f32.mrf.mxu1  ;;  %v2898_v29 = vpop.f32.mrf.mxu0 }
 0x286   : > { %v2951_v63 = vmax.f32 %v2640_v52, %v2898_v29 }
 0x287   : > { %v2642_v9 = vpop.f32.mrf.mxu1  ;;  %v2900_v44 = vpop.f32.mrf.mxu0 }
 0x289   : > { %v2645_v35 = vpop.f32.mrf.mxu1  ;;  %v2903_v33 = vpop.f32.mrf.mxu0 }
 0x28a   : > { %v2952_v13 = vmax.f32 %v2645_v35, %v2903_v33 }
 0x28b   : > { %v2647_v37 = vpop.f32.mrf.mxu1  ;;  %v2905_v14 = vpop.f32.mrf.mxu0 }
 0x28d   : > { %v2648_v38 = vpop.f32.mrf.mxu1  ;;  %v2906_v39 = vpop.f32.mrf.mxu0 }
 0x28e   : > { %v2953_v28 = vmax.f32 %v2648_v38, %v2906_v39  ;;  %v2950_v39 = vmax.f32 %v2637_v51, %v2895_v22 }
 0x28f   : > { %v2650_v1 = vpop.f32.mrf.mxu1  ;;  %v2908_v0 = vpop.f32.mrf.mxu0 }
 0x290   : > { %v2985_v9 = vrot.slane %v2953_v28, 1  ;;  %v2984_v1 = vrot.slane %v2952_v13, 1 }
 0x291   : > { %v2653_v41 = vpop.f32.mrf.mxu1  ;;  %v2911_v32 = vpop.f32.mrf.mxu0 }
 0x292   : > { %v2954_v45 = vmax.f32 %v2653_v41, %v2911_v32  ;;  %v2983_v41 = vrot.slane %v2951_v63, 1 }
 0x293   : > { %v2655_v60 = vpop.f32.mrf.mxu1  ;;  %v2913_v56 = vpop.f32.mrf.mxu0 }
 0x294   : > { %v2986_v25 = vrot.slane %v2954_v45, 1  ;;  %v2948_v56 = vmax.f32 %v8232_v24, %v8234_v7  ;;  %v2995_v51 = vsel %vm1151_vm5, %v2983_v41, %v2984_v1  ;;  %v2979_v7 = vrot.slane %v2947_v34, 1 }
 0x295   : > { %v2656_v6 = vpop.f32.mrf.mxu1  ;;  %v2914_v26 = vpop.f32.mrf.mxu0 }
 0x296   : > { %v2955_v21 = vmax.f32 %v2656_v6, %v2914_v26  ;;  %v2993_v52 = vsel %vm1151_vm5, %v2985_v9, %v2986_v25  ;;  %v2982_v6 = vrot.slane %v2950_v39, 1 }
 0x297   : > { %v2658_v49 = vpop.f32.mrf.mxu1  ;;  %v2916_v11 = vpop.f32.mrf.mxu0  ;;  %v3049_v60 = vmax.f32 %v2953_v28, %v2993_v52  ;;  %v6686_v28 = vld [vmem:[%s9275_s4 + $0x60] ss:$8 sps:$4 sm:$0xff]   ;;  %v6712_v52 = vld [vmem:[%s9276_s5 + $0x34] ss:$8 sps:$4 sm:$0xff]  }
 0x298   : > { %v2987_v50 = vrot.slane %v2955_v21, 1  ;;  %v2996_v26 = vsel %vm1151_vm5, %v2982_v6, %v2983_v41  ;;  %v3047_v11 = vmax.f32 %v2951_v63, %v2995_v51  ;;  %v6709_v63 = vld [vmem:[%s9276_s5 + $0x84] ss:$8 sps:$4 sm:$0xff]   ;;  %v6724_v41 = vld [vmem:[%s9276_s5 + $0x14] ss:$8 sps:$4 sm:$0xff]  }
 0x299   : > { %v2661_v47 = vpop.f32.mrf.mxu1  ;;  %v2919_v62 = vpop.f32.mrf.mxu0  ;;  %v3046_v24 = vmax.f32 %v2950_v39, %v2996_v26  ;;  %v6706_v39 = vld [vmem:[%s9276_s5 + $0x44] ss:$8 sps:$4 sm:$0xff]  }
 0x29a   : > { %v2956_v3 = vmax.f32 %v2661_v47, %v2919_v62  ;;  %v2992_v14 = vsel %vm1151_vm5, %v2986_v25, %v2987_v50  ;;  %v2980_v47 = vrot.slane %v2948_v56, 1  ;;  %v6695_v25 = vld [vmem:[%s9276_s5 + $0xa0] ss:$8 sps:$4 sm:$0xff]  }
 0x29b   : > { %v2663_v2 = vpop.f32.mrf.mxu1  ;;  %v2921_v23 = vpop.f32.mrf.mxu0  ;;  %v3050_v0 = vmax.f32 %v2954_v45, %v2992_v14  ;;  %v6721_v14 = vld [vmem:[%s9276_s5 + $0x64] ss:$8 sps:$4 sm:$0xff]  }
 0x29c   : > { %v2988_v46 = vrot.slane %v2956_v3, 1  ;;  %v2998_v62 = vsel %vm1151_vm5, %v2980_v47, %v2981_v36  ;;  %v2999_v15 = vsel %vm1151_vm5, %v2979_v7, %v2980_v47 }
 0x29d   : > { %v2664_v61 = vpop.f32.mrf.mxu1  ;;  %v2922_v48 = vpop.f32.mrf.mxu0  ;;  %v3043_v23 = vmax.f32 %v2947_v34, %v2999_v15 }
 0x29e   : > { %v2957_v59 = vmax.f32 %v2664_v61, %v2922_v48  ;;  %v2991_v20 = vsel %vm1151_vm5, %v2987_v50, %v2988_v46  ;;  %v6683_v61 = vld [vmem:[%s9275_s4 + $0x50] ss:$8 sps:$4 sm:$0xff]   ;;  %v6688_v48 = vld [vmem:[%s9275_s4 + $0x64] ss:$8 sps:$4 sm:$0xff]   ;;  %v6691_v50 = vld [vmem:[%s9275_s4 + $0x74] ss:$8 sps:$4 sm:$0xff]  }
 0x29f   : > { %v2666_v27 = vpop.f32.mrf.mxu1  ;;  %v2924_v18 = vpop.f32.mrf.mxu0  ;;  %v3051_v33 = vmax.f32 %v2955_v21, %v2991_v20  ;;  %v3082_v21 = vpack.c.bf16 %v3047_v11, %v3046_v24  ;;  %v6701_v20 = vld [vmem:[%s9276_s5 + $0x90] ss:$8 sps:$4 sm:$0xff]  }
 0x2a0   : > { %v2989_v16 = vrot.slane %v2957_v59, 1  ;;  %v6692_v27 = vld [vmem:[%s9276_s5 + $0xb0] ss:$8 sps:$4 sm:$0xff]  }
 0x2a1   : > { %v3084_v32 = vpack.c.bf16 %v3051_v33, %v3050_v0  ;;  %v6689_v18 = vld [vmem:[%s9275_s4 + $0x70] ss:$8 sps:$4 sm:$0xff]   ;;  %v6718_v0 = vld [vmem:[%s9276_s5 + $0x24] ss:$8 sps:$4 sm:$0xff]  }
 0x2a2   : > { %v3021_v44 = vsel %vm1151_vm5, %v2989_v16, %v2958_v12  ;;  %v2990_v37 = vsel %vm1151_vm5, %v2988_v46, %v2989_v16  ;;  %v2994_v12 = vsel %vm1151_vm5, %v2984_v1, %v2985_v9  ;;  %v6703_v16 = vld [vmem:[%s9276_s5 + $0x94] ss:$8 sps:$4 sm:$0xff]   ;;  %v6707_v9 = vld [vmem:[%s9276_s5 + $0x80] ss:$8 sps:$4 sm:$0xff]   ;;  %v6698_v33 = vld [vmem:[%s9276_s5 + $0x50] ss:$8 sps:$4 sm:$0xff]  }
 0x2a3   : > { %v3053_v38 = vmax.f32 %v2957_v59, %v3021_v44  ;;  %v3052_v35 = vmax.f32 %v2956_v3, %v2990_v37  ;;  %v3048_v22 = vmax.f32 %v2952_v13, %v2994_v12  ;;  %v3044_v3 = vmax.f32 %v2948_v56, %v2998_v62  ;;  %v6694_v59 = vld [vmem:[%s9276_s5 + $0xb4] ss:$8 sps:$4 sm:$0xff]   ;;  %v6697_v13 = vld [vmem:[%s9276_s5 + $0xa4] ss:$8 sps:$4 sm:$0xff]   ;;  %v6713_v37 = vld [vmem:[%s9276_s5 + $0x70] ss:$8 sps:$4 sm:$0xff]  }
 0x2a4   : > { %3974 = vmatprep.subr.bf16.mxu0 %v6694_v59  ;;  %v6715_v44 = vld [vmem:[%s9276_s5 + $0x74] ss:$8 sps:$4 sm:$0xff]   ;;  %v6704_v1 = vld [vmem:[%s9276_s5 + $0x40] ss:$8 sps:$4 sm:$0xff]   ;;  %v6722_v12 = vld [vmem:[%s9276_s5 + $0x10] ss:$8 sps:$4 sm:$0xff]  }
 0x2a5   : > { %v3085_v29 = vpack.c.bf16 %v3053_v38, %v3052_v35  ;;  %v3083_v49 = vpack.c.bf16 %v3049_v60, %v3048_v22  ;;  %3975 = vmatpush1.bf16.msra.mxu0 %v6692_v27  ;;  %v6719_v38 = vld [vmem:[%s9276_s5 + $0x60] ss:$8 sps:$4 sm:$0xff]   ;;  %v6700_v35 = vld [vmem:[%s9276_s5 + $0x54] ss:$8 sps:$4 sm:$0xff]  }
 0x2a6   : > { %3976 = vmatprep.subr.bf16.mxu0 %v6697_v13  ;;  %v6725_v60 = vld [vmem:[%s9276_s5] ss:$8 sps:$4 sm:$0xff]   ;;  %v6730_v56 = vld [vmem:[%s9276_s5 + $0x114] ss:$8 sps:$4 sm:$0xff]  }
 0x2a7   : > { %6278 = vmatprep.subr.bf16.mxu1 %v3085_v29  ;;  %v6710_v29 = vld [vmem:[%s9276_s5 + $0x30] ss:$8 sps:$4 sm:$0xff]  }
 0x2a8   : > { %6279 = vmatpush3.bf16.msra.mxu1 %v8211_v53  ;;  %v2997_v53 = vsel %vm1151_vm5, %v2981_v36, %v2982_v6  ;;  %v479_v36 = vadd.s32 8, %v9415_v30 }
 0x2a9   : > { %6280 = vmatprep.subr.bf16.mxu1 %v3084_v32  ;;  %v3045_v43 = vmax.f32 %v2949_v17, %v2997_v53  ;;  %3977 = vmatpush1.bf16.msra.mxu0 %v6695_v25  ;;  %v6716_v17 = vld [vmem:[%s9276_s5 + $0x20] ss:$8 sps:$4 sm:$0xff]   ;;  %v6727_v32 = vld [vmem:[%s9276_s5 + $0x4] ss:$8 sps:$4 sm:$0xff]  }
 0x2aa   : > { %3978 = vmatprep.subr.bf16.mxu0 %v6703_v16 }
 0x2ab   : > { %v3081_v2 = vpack.c.bf16 %v3045_v43, %v3044_v3 }
 0x2ac   : > { %6281 = vmatpush3.bf16.msra.mxu1 %v8205_v19  ;;  %v3000_v19 = vsel %vm1151_vm5, %v2978_v54, %v2979_v7  ;;  %v6680_v54 = vld [vmem:[%s9275_s4 + $0x40] ss:$8 sps:$4 sm:$0xff]   ;;  %v3274_v7 = vand.u32 15, %v479_v36 }
 0x2ad   : > { %6282 = vmatprep.subr.bf16.mxu1 %v3083_v49  ;;  %v3042_v45 = vmax.f32 %v8219_v10, %v3000_v19  ;;  %v6682_v10 = vld [vmem:[%s9275_s4 + $0x44] ss:$8 sps:$4 sm:$0xff]   ;;  %3979 = vmatpush1.bf16.msra.mxu0 %v6701_v20 }
 0x2ae   : > { %3980 = vmatprep.subr.bf16.mxu0 %v6709_v63  ;;  %vm3552_vm7 = vcmp.eq.s32.totalorder %v3274_v7, 15 }
 0x2af   : > { %v3080_v46 = vpack.c.bf16 %v3043_v23, %v3042_v45 }
 0x2b0   : > { %6283 = vmatpush3.bf16.msra.mxu1 %v8199_v55  ;;  %v6668_v55 = vld [vmem:[%s9275_s4] ss:$8 sps:$4 sm:$0xff]  }
 0x2b1   : > { %6284 = vmatprep.subr.bf16.mxu1 %v3082_v21  ;;  %3981 = vmatpush1.bf16.msra.mxu0 %v6707_v9 }
 0x2b2   : > { %3982 = vmatprep.subr.bf16.mxu0 %v6715_v44 }
 0x2b4   : > { %6285 = vmatpush3.bf16.msra.mxu1 %v8193_v4  ;;  %v6673_v4 = vld [vmem:[%s9275_s4 + $0x14] ss:$8 sps:$4 sm:$0xff]  }
 0x2b5   : > { %6286 = vmatprep.subr.bf16.mxu1 %v3081_v2  ;;  %3983 = vmatpush1.bf16.msra.mxu0 %v6713_v37 }
 0x2b6   : > { %3984 = vmatprep.subr.bf16.mxu0 %v6721_v14 }
 0x2b8   : > { %6287 = vmatpush3.bf16.msra.mxu1 %v8187_v40  ;;  %v6679_v40 = vld [vmem:[%s9275_s4 + $0x34] ss:$8 sps:$4 sm:$0xff]  }
 0x2b9   : > { %6288 = vmatprep.subr.bf16.mxu1 %v3080_v46  ;;  %3985 = vmatpush1.bf16.msra.mxu0 %v6719_v38 }
 0x2bc   : > { %6289 = vmatpush3.bf16.msra.mxu1 %v8178_v8  ;;  %v6671_v8 = vld [vmem:[%s9275_s4 + $0x10] ss:$8 sps:$4 sm:$0xff]  }
 0x2bd   : > { %6290 = vmatprep.subr.bf16.mxu1 %v8236_v57  ;;  %v6685_v57 = vld [vmem:[%s9275_s4 + $0x54] ss:$8 sps:$4 sm:$0xff]  }
 0x2c0   : > { %6291 = vmatpush3.bf16.msra.mxu1 %v8172_v42  ;;  %v6676_v42 = vld [vmem:[%s9275_s4 + $0x24] ss:$8 sps:$4 sm:$0xff]  }
 0x2c1   : > { %6292 = vmatprep.subr.bf16.mxu1 %v8217_v58  ;;  %v6677_v58 = vld [vmem:[%s9275_s4 + $0x30] ss:$8 sps:$4 sm:$0xff]  }
 0x2c4   : > { %6293 = vmatpush3.bf16.msra.mxu1 %v8166_v5  ;;  %v6674_v5 = vld [vmem:[%s9275_s4 + $0x20] ss:$8 sps:$4 sm:$0xff]  }
 0x2c5   : > { %3777 = vmatprep.subr.bf16.mxu1 %v6700_v35 }
 0x2c7   : > { %3199 = vmatmul.mubr.bf16.vlgmr.msra.gmra.mxu1 %v6668_v55 }
 0x2c8   : > { %3206 = vmatprep.mubr.bf16.mxu1 %v6673_v4  ;;  %3778 = vmatpush1.bf16.msra.mxu1 %v6698_v33 }
 0x2c9   : > { %3779 = vmatprep.subr.bf16.mxu1 %v6706_v39 }
 0x2cc   : > { %3780 = vmatpush1.bf16.msra.mxu1 %v6704_v1 }
 0x2cd   : > { %3781 = vmatprep.subr.bf16.mxu1 %v6712_v52 }
 0x2cf   : > { %3207 = vmatmul.mubr.bf16.gmra.mxu1 %v6671_v8 }
 0x2d0   : > { %3214 = vmatprep.mubr.bf16.mxu1 %v6676_v42  ;;  %3782 = vmatpush1.bf16.msra.mxu1 %v6710_v29  ;;  %v9416_v42 = vld [vmem:[#allocation6_spill] sm:$0xff] }
 0x2d1   : > { %3783 = vmatprep.subr.bf16.mxu1 %v6718_v0  ;;  %v9417_v0 = vld [vmem:[#allocation7_spill] sm:$0xff] }
 0x2d4   : > { %3784 = vmatpush1.bf16.msra.mxu1 %v6716_v17  ;;  %v3316_v17 = vand.u32 15, %v9417_v0  ;;  %v3267_v0 = vand.u32 15, %v9415_v30 }
 0x2d5   : > { %3785 = vmatprep.subr.bf16.mxu1 %v6724_v41 }
 0x2d6   : > { %vm3558_vm10 = vcmp.eq.s32.totalorder %v3316_v17, 15  ;;  %vm8529_vm14 = vcmp.eq.s32.totalorder %v3267_v0, 0 }
 0x2d7   : > { %3215 = vmatmul.mubr.bf16.gmra.mxu1 %v6674_v5  ;;  %v3288_v5 = vand.u32 15, %v9416_v42 }
 0x2d8   : > { %3222 = vmatprep.mubr.bf16.mxu1 %v6679_v40  ;;  %3786 = vmatpush1.bf16.msra.mxu1 %v6722_v12 }
 0x2d9   : > { %3787 = vmatprep.subr.bf16.mxu1 %v6727_v32  ;;  %vm3554_vm8 = vcmp.eq.s32.totalorder %v3288_v5, 15 }
 0x2dc   : > { %3788 = vmatpush1.bf16.msra.mxu1 %v6725_v60 }
 0x2dd   : > { %4192 = vmatprep.subr.bf16.mxu1 %v6730_v56 }
 0x2df   : > { %3223 = vmatmul.mubr.bf16.gmra.mxu1 %v6677_v58 }
 0x2e0   : > { %3230 = vmatprep.mubr.bf16.mxu1 %v6682_v10 }
 0x2e7   : > { %3231 = vmatmul.mubr.bf16.gmra.mxu1 %v6680_v54 }
 0x2e8   : > { %3238 = vmatprep.mubr.bf16.mxu1 %v6685_v57 }
 0x2ef   : > { %3239 = vmatmul.mubr.bf16.gmra.mxu1 %v6683_v61  ;;  %v483_v61 = vadd.s32 40, %v9415_v30 }
 0x2f0   : > { %3246 = vmatprep.mubr.bf16.mxu1 %v6688_v48 }
 0x2f1   : > { %v3302_v16 = vand.u32 15, %v483_v61 }
 0x2f3   : > { %vm3556_vm9 = vcmp.eq.s32.totalorder %v3302_v16, 15 }
 0x2f7   : > { %3247 = vmatmul.mubr.bf16.gmra.mxu1 %v6686_v28 }
 0x2f8   : > { %3254 = vmatprep.mubr.bf16.mxu1 %v6691_v50 }
 0x2ff   : > { %3255 = vmatmul.mubr.bf16.gmra.mxu1 %v6689_v18 }
 0x300   : > { %3805 = vmatprep.mubr.bf16.mxu1 %v9414_v31 }
 0x387   : > { %v6294_v6 = vpop.f32.mrf.mxu1 }
 0x389   : > { %v6295_v51 = vpop.f32.mrf.mxu1 }
 0x38a   : > { %v8402_v34 = vadd.f32 %v6295_v51, %v6294_v6  ;;  %v487_v6 = vadd.s32 72, %v9415_v30 }
 0x38b   : > { %v6297_v22 = vpop.f32.mrf.mxu1 }
 0x38c   : > { %v3567_v47 = vrot.slane %v8402_v34, 1 }
 0x38d   : > { %v6298_v26 = vpop.f32.mrf.mxu1 }
 0x38e   : > { %v8405_v49 = vadd.f32 %v6298_v26, %v6297_v22 }
 0x38f   : > { %v6300_v11 = vpop.f32.mrf.mxu1 }
 0x390   : > { %v3568_v53 = vrot.slane %v8405_v49, 1  ;;  %v3660_v24 = vpack.c.bf16 %v8405_v49, %v8402_v34 }
 0x391   : > { %v6301_v62 = vpop.f32.mrf.mxu1 }
 0x392   : > { %v3597_v21 = vsel %vm1151_vm5, %v3567_v47, %v3568_v53  ;;  %v8415_v43 = vadd.f32 %v6301_v62, %v6300_v11  ;;  %6096 = vmatmul.mubr.msk.bf16.vlgmr.msra.gmra.mxu0 %vm3748_vm6, %v3660_v24  ;;  %v3330_v62 = vand.u32 15, %v487_v6  ;;  %v480_v6 = vadd.s32 16, %v9415_v30 }
 0x393   : > { %v6303_v15 = vpop.f32.mrf.mxu1  ;;  %4012 = vmatprep.mubr.bf16.mxu0 %v9414_v31 }
 0x394   : > { %v3569_v3 = vrot.slane %v8415_v43, 1  ;;  %vm3560_vm11 = vcmp.eq.s32.totalorder %v3330_v62, 15 }
 0x395   : > { %v6304_v19 = vpop.f32.mrf.mxu1 }
 0x396   : > { %v3596_v2 = vsel %vm1151_vm5, %v3568_v53, %v3569_v3  ;;  %v8422_v23 = vadd.f32 %v6304_v19, %v6303_v15 }
 0x397   : > { %v3632_v45 = vsel %vm3552_vm7, 0.0, %v3596_v2  ;;  %v6306_v46 = vpop.f32.mrf.mxu1 }
 0x398   : > { %v8424_v55 = vpack.c.bf16 %v3632_v45, %v3597_v21  ;;  %v3570_v4 = vrot.slane %v8422_v23, 1  ;;  %v3661_v8 = vpack.c.bf16 %v8422_v23, %v8415_v43 }
 0x399   : > { %v6307_v40 = vpop.f32.mrf.mxu1 }
 0x39a   : > { %v3595_v58 = vsel %vm1151_vm5, %v3569_v3, %v3570_v4  ;;  %v8432_v10 = vadd.f32 %v6307_v40, %v6306_v46  ;;  %6097 = vmatmul.mubr.msk.bf16.gmra.mxu0 %vm3748_vm6, %v3661_v8 }
 0x39b   : > { %v6309_v54 = vpop.f32.mrf.mxu1  ;;  %4022 = vmatprep.mubr.bf16.mxu0 %v9414_v31 }
 0x39c   : > { %v3571_v57 = vrot.slane %v8432_v10, 1 }
 0x39d   : > { %v6310_v48 = vpop.f32.mrf.mxu1 }
 0x39e   : > { %v3594_v28 = vsel %vm1151_vm5, %v3570_v4, %v3571_v57  ;;  %v8440_v50 = vadd.f32 %v6310_v48, %v6309_v54  ;;  %v9418_v54 = vld [vmem:[#allocation8_spill] sm:$0xff] }
 0x39f   : > { %v3634_v59 = vsel %vm3554_vm8, 0.0, %v3594_v28  ;;  %v6312_v27 = vpop.f32.mrf.mxu1 }
 0x3a0   : > { %v8442_v18 = vpack.c.bf16 %v3634_v59, %v3595_v58  ;;  %v3572_v13 = vrot.slane %v8440_v50, 1  ;;  %v3662_v25 = vpack.c.bf16 %v8440_v50, %v8432_v10 }
 0x3a1   : > { %v6313_v20 = vpop.f32.mrf.mxu1 }
 0x3a2   : > { %v3593_v63 = vsel %vm1151_vm5, %v3571_v57, %v3572_v13  ;;  %v8449_v9 = vadd.f32 %v6313_v20, %v6312_v27  ;;  %6098 = vmatmul.mubr.msk.bf16.gmra.mxu0 %vm3748_vm6, %v3662_v25  ;;  %v3344_v57 = vand.u32 15, %v9418_v54  ;;  %v3281_v54 = vand.u32 15, %v480_v6  ;;  %v6745_v6 = vld [vmem:[%s9276_s5 + $0xc4] ss:$8 sps:$4 sm:$0xff]  }
 0x3a3   : > { %v6315_v44 = vpop.f32.mrf.mxu1  ;;  %4032 = vmatprep.mubr.bf16.mxu0 %v9414_v31 }
 0x3a4   : > { %v3573_v37 = vrot.slane %v8449_v9, 1  ;;  %vm3562_vm12 = vcmp.eq.s32.totalorder %v3344_v57, 15  ;;  %vm3457_vm1 = vcmp.eq.s32.totalorder %v3281_v54, 0 }
 0x3a5   : > { %v6316_v14 = vpop.f32.mrf.mxu1 }
 0x3a6   : > { %v3592_v38 = vsel %vm1151_vm5, %v3572_v13, %v3573_v37  ;;  %v8456_v35 = vadd.f32 %v6316_v14, %v6315_v44  ;;  %v491_v13 = vadd.s32 104, %v9415_v30 }
 0x3a7   : > { %v3636_v33 = vsel %vm3556_vm9, 0.0, %v3592_v38  ;;  %v6318_v39 = vpop.f32.mrf.mxu1 }
 0x3a8   : > { %v8458_v1 = vpack.c.bf16 %v3636_v33, %v3593_v63  ;;  %v3574_v52 = vrot.slane %v8456_v35, 1  ;;  %v3663_v29 = vpack.c.bf16 %v8456_v35, %v8449_v9  ;;  %v3358_v33 = vand.u32 15, %v491_v13 }
 0x3a9   : > { %v6319_v41 = vpop.f32.mrf.mxu1 }
 0x3aa   : > { %v3591_v12 = vsel %vm1151_vm5, %v3573_v37, %v3574_v52  ;;  %v8466_v32 = vadd.f32 %v6319_v41, %v6318_v39  ;;  %6099 = vmatmul.mubr.msk.bf16.gmra.mxu0 %vm3748_vm6, %v3663_v29  ;;  %v9419_v41 = vld [vmem:[#allocation9_spill] sm:$0xff]  ;;  %vm3564_vm13 = vcmp.eq.s32.totalorder %v3358_v33, 15  ;;  %v3476_v33 = vrot.slane %v8440_v50, 7 }
 0x3ab   : > { %v6321_v60 = vpop.f32.mrf.mxu1  ;;  %4042 = vmatprep.mubr.bf16.mxu0 %v9414_v31  ;;  %v6742_v50 = vld [vmem:[%s9276_s5 + $0xd4] ss:$8 sps:$4 sm:$0xff]  }
 0x3ac   : > { %v3575_v56 = vrot.slane %v8466_v32, 1 }
 0x3ad   : > { %v6322_v51 = vpop.f32.mrf.mxu1 }
 0x3ae   : > { %v3590_v22 = vsel %vm1151_vm5, %v3574_v52, %v3575_v56  ;;  %v8474_v36 = vadd.f32 %v6322_v51, %v6321_v60 }
 0x3af   : > { %v3638_v26 = vsel %vm3558_vm10, 0.0, %v3590_v22  ;;  %v6324_v11 = vpop.f32.mrf.mxu1 }
 0x3b0   : > { %v8476_v53 = vpack.c.bf16 %v3638_v26, %v3591_v12  ;;  %v3576_v24 = vrot.slane %v8474_v36, 1  ;;  %v3664_v7 = vpack.c.bf16 %v8474_v36, %v8466_v32  ;;  %v3372_v12 = vand.u32 15, %v9419_v41  ;;  %v6740_v41 = vld [vmem:[%s9276_s5 + $0xd0] ss:$8 sps:$4 sm:$0xff]   ;;  %v6743_v26 = vld [vmem:[%s9276_s5 + $0xc0] ss:$8 sps:$4 sm:$0xff]  }
 0x3b1   : > { %v6325_v21 = vpop.f32.mrf.mxu1 }
 0x3b2   : > { %v3589_v15 = vsel %vm1151_vm5, %v3575_v56, %v3576_v24  ;;  %v8483_v3 = vadd.f32 %v6325_v21, %v6324_v11  ;;  %6100 = vmatmul.mubr.msk.bf16.gmra.mxu0 %vm3748_vm6, %v3664_v7  ;;  %v3471_v11 = vrot.slane %v8402_v34, 7  ;;  %vm8535_vm15 = vcmp.eq.s32.totalorder %v3372_v12, 15 }
 0x3b3   : > { %v6327_v19 = vpop.f32.mrf.mxu1  ;;  %4052 = vmatprep.mubr.bf16.mxu0 %v9414_v31  ;;  %v3473_v34 = vrot.slane %v8415_v43, 7 }
 0x3b4   : > { %v3577_v2 = vrot.slane %v8483_v3, 1 }
 0x3b5   : > { %v6328_v45 = vpop.f32.mrf.mxu1 }
 0x3b6   : > { %v3588_v46 = vsel %vm1151_vm5, %v3576_v24, %v3577_v2  ;;  %v8490_v4 = vadd.f32 %v6328_v45, %v6327_v19  ;;  %v3472_v24 = vrot.slane %v8405_v49, 7 }
 0x3b7   : > { %v3640_v8 = vsel %vm3560_vm11, 0.0, %v3588_v46  ;;  %v6330_v42 = vpop.f32.mrf.mxu1 }
 0x3b8   : > { %v8492_v5 = vpack.c.bf16 %v3640_v8, %v3589_v15  ;;  %v3578_v40 = vrot.slane %v8490_v4, 1  ;;  %v3665_v58 = vpack.c.bf16 %v8490_v4, %v8483_v3  ;;  %v3501_v8 = vsel %vm958_vm0, %v3471_v11, %v3472_v24 }
 0x3b9   : > { %v6331_v61 = vpop.f32.mrf.mxu1  ;;  %v3500_v43 = vsel %vm958_vm0, %v3472_v24, %v3473_v34 }
 0x3ba   : > { %v3587_v48 = vsel %vm1151_vm5, %v3577_v2, %v3578_v40  ;;  %v8500_v28 = vadd.f32 %v6331_v61, %v6330_v42  ;;  %6101 = vmatmul.mubr.msk.bf16.gmra.mxu0 %vm3748_vm6, %v3665_v58  ;;  %v6728_v58 = vld [vmem:[%s9276_s5 + $0x110] ss:$8 sps:$4 sm:$0xff]   ;;  %v6733_v61 = vld [vmem:[%s9276_s5 + $0x104] ss:$8 sps:$4 sm:$0xff]   ;;  %v3537_v13 = vsel %vm3457_vm1, 0.0, %v3500_v43  ;;  %v492_v43 = vadd.s32 112, %v9415_v30 }
 0x3bb   : > { %v6333_v59 = vpop.f32.mrf.mxu1  ;;  %4062 = vmatprep.mubr.bf16.mxu0 %v9414_v31 }
 0x3bc   : > { %v3579_v27 = vrot.slane %v8500_v28, 1 }
 0x3bd   : > { %v6334_v25 = vpop.f32.mrf.mxu1 }
 0x3be   : > { %v3586_v16 = vsel %vm1151_vm5, %v3578_v40, %v3579_v27  ;;  %v8508_v20 = vadd.f32 %v6334_v25, %v6333_v59  ;;  %v6731_v59 = vld [vmem:[%s9276_s5 + $0x100] ss:$8 sps:$4 sm:$0xff]   ;;  %v6734_v25 = vld [vmem:[%s9276_s5 + $0xf0] ss:$8 sps:$4 sm:$0xff]  }
 0x3bf   : > { %v3642_v63 = vsel %vm3562_vm12, 0.0, %v3586_v16  ;;  %v6336_v44 = vpop.f32.mrf.mxu1 }
 0x3c0   : > { %v8510_v37 = vpack.c.bf16 %v3642_v63, %v3587_v48  ;;  %v3580_v14 = vrot.slane %v8508_v20, 1  ;;  %v3666_v38 = vpack.c.bf16 %v8508_v20, %v8500_v28  ;;  %v3474_v48 = vrot.slane %v8422_v23, 7  ;;  %v9424_v63 = vld [vmem:[#allocation3_spill] sm:$0xff] }
 0x3c1   : > { %v6337_v39 = vpop.f32.mrf.mxu1 }
 0x3c2   : > { %v3585_v52 = vsel %vm1151_vm5, %v3579_v27, %v3580_v14  ;;  %v8517_v29 = vadd.f32 %v6337_v39, %v6336_v44  ;;  %6102 = vmatmul.mubr.msk.bf16.gmra.mxu0 %vm3748_vm6, %v3666_v38  ;;  %v6736_v27 = vld [vmem:[%s9276_s5 + $0xf4] ss:$8 sps:$4 sm:$0xff]   ;;  %v3499_v23 = vsel %vm958_vm0, %v3473_v34, %v3474_v48  ;;  %v3295_v44 = vand.u32 15, %v9424_v63  ;;  %v6739_v38 = vld [vmem:[%s9276_s5 + $0xe4] ss:$8 sps:$4 sm:$0xff]  }
 0x3c3   : > { %v6339_v17 = vpop.f32.mrf.mxu1  ;;  %4072 = vmatprep.mubr.bf16.mxu0 %v9414_v31  ;;  %v3681_v16 = vpack.c.bf16 %v3499_v23, %v3537_v13  ;;  %v6737_v39 = vld [vmem:[%s9276_s5 + $0xe0] ss:$8 sps:$4 sm:$0xff]  }
 0x3c4   : > { %v3581_v60 = vrot.slane %v8517_v29, 1  ;;  %vm3459_vm3 = vcmp.eq.s32.totalorder %v3295_v44, 0 }
 0x3c5   : > { %v6340_v56 = vpop.f32.mrf.mxu1 }
 0x3c6   : > { %v3584_v51 = vsel %vm1151_vm5, %v3580_v14, %v3581_v60  ;;  %v8527_v22 = vadd.f32 %v6340_v56, %v6339_v17  ;;  %v3475_v14 = vrot.slane %v8432_v10, 7  ;;  %v3477_v56 = vrot.slane %v8449_v9, 7 }
 0x3c7   : > { %v3644_v7 = vsel %vm3564_vm13, 0.0, %v3584_v51  ;;  %v3478_v51 = vrot.slane %v8456_v35, 7 }
 0x3c8   : > { %v8539_v21 = vpack.c.bf16 %v3644_v7, %v3585_v52  ;;  %v3486_v15 = vrot.slane %v8527_v22, 7  ;;  %v3582_v19 = vrot.slane %v8527_v22, 1  ;;  %v3667_v2 = vpack.c.bf16 %v8527_v22, %v8517_v29  ;;  %v9425_v7 = vld [vmem:[#allocation4_spill] sm:$0xff] }
 0x3c9   : > { %v3498_v10 = vsel %vm958_vm0, %v3474_v48, %v3475_v14  ;;  %v484_v52 = vadd.s32 48, %v9415_v30  ;;  %v3497_v0 = vsel %vm958_vm0, %v3475_v14, %v3476_v33  ;;  %v3496_v9 = vsel %vm958_vm0, %v3476_v33, %v3477_v56  ;;  %v6753_v22 = vld [vmem:[%s9278_s7 + $0xb0] sm:$0xff]   ;;  %v6757_v14 = vld [vmem:[%s9278_s7 + $0xa8] sm:$0xff]   ;;  %v6759_v33 = vld [vmem:[%s9278_s7 + $0xe0] sm:$0xff]  }
 0x3ca   : > { %v3502_v45 = vsel %vm958_vm0, %v3486_v15, %v3471_v11  ;;  %v3583_v49 = vsel %vm1151_vm5, %v3581_v60, %v3582_v19  ;;  %v3598_v46 = vsel %vm1151_vm5, %v3582_v19, %v3567_v47  ;;  %6103 = vmatmul.mubr.msk.bf16.gmra.mxu0 %vm3748_vm6, %v3667_v2  ;;  %v3539_v17 = vsel %vm3459_vm3, 0.0, %v3498_v10  ;;  %v6762_v10 = vld [vmem:[%s9278_s7 + $0x58] sm:$0xff]  }
 0x3cb   : > { %v3535_v42 = vsel %vm8529_vm14, 0.0, %v3502_v45  ;;  %v3646_v40 = vsel %vm8535_vm15, 0.0, %v3598_v46  ;;  %v3682_v12 = vpack.c.bf16 %v3497_v0, %v3539_v17  ;;  %v3309_v60 = vand.u32 15, %v484_v52  ;;  %v6763_v52 = vld [vmem:[%s9278_s7 + $0xd8] sm:$0xff]   ;;  %v6766_v17 = vld [vmem:[%s9278_s7 + $0x50] sm:$0xff]  }
 0x3cc   : > { %v3680_v57 = vpack.c.bf16 %v3501_v8, %v3535_v42  ;;  %v8566_v47 = vpack.c.bf16 %v3646_v40, %v3583_v49  ;;  %v3495_v11 = vsel %vm958_vm0, %v3477_v56, %v3478_v51  ;;  %v3323_v62 = vand.u32 15, %v9425_v7  ;;  %v6765_v0 = vld [vmem:[%s9278_s7 + $0x98] sm:$0xff]   ;;  %v6770_v56 = vld [vmem:[%s9278_s7 + $0x48] sm:$0xff]  }
 0x3cd   : > { %vm3461_vm4 = vcmp.eq.s32.totalorder %v3309_v60, 0  ;;  %v3479_v19 = vrot.slane %v8466_v32, 7  ;;  %v3480_v2 = vrot.slane %v8474_v36, 7  ;;  %v488_v49 = vadd.s32 80, %v9415_v30  ;;  %v6769_v60 = vld [vmem:[%s9278_s7 + $0x90] sm:$0xff]  }
 0x3ce   : > { %6076 = vmatmul.mubr.msk.bf16.vlgmr.msra.gmra.mxu1 %vm3748_vm6, %v3680_v57  ;;  %v3541_v24 = vsel %vm3461_vm4, 0.0, %v3496_v9  ;;  %vm3463_vm7 = vcmp.eq.s32.totalorder %v3323_v62, 0  ;;  %v3481_v32 = vrot.slane %v8483_v3, 7  ;;  %v3482_v36 = vrot.slane %v8490_v4, 7  ;;  %v6774_v9 = vld [vmem:[%s9278_s7 + $0x40] sm:$0xff]  }
 0x3cf   : > { %3815 = vmatprep.mubr.bf16.mxu1 %v9414_v31  ;;  %4193 = vmatpush1.bf16.msra.mxu1 %v6728_v58  ;;  %v3683_v35 = vpack.c.bf16 %v3495_v11, %v3541_v24  ;;  %v3494_v45 = vsel %vm958_vm0, %v3478_v51, %v3479_v19  ;;  %v3493_v46 = vsel %vm958_vm0, %v3479_v19, %v3480_v2  ;;  %v3337_v40 = vand.u32 15, %v488_v49  ;;  %v6772_v51 = vld [vmem:[%s9278_s7 + $0x8] sm:$0xff]   ;;  %v6775_v11 = vld [vmem:[%s9278_s7 + $0xc0] sm:$0xff]  }
 0x3d0   : > { %4194 = vmatprep.subr.bf16.mxu1 %v6733_v61  ;;  %v3543_v8 = vsel %vm3463_vm7, 0.0, %v3494_v45  ;;  %v3492_v58 = vsel %vm958_vm0, %v3480_v2, %v3481_v32  ;;  %v3491_v54 = vsel %vm958_vm0, %v3481_v32, %v3482_v36  ;;  %v9426_v61 = vld [vmem:[#allocation5_spill] sm:$0xff]  ;;  %v3484_v3 = vrot.slane %v8508_v20, 7  ;;  %v6776_v24 = vld [vmem:[%s9278_s7] sm:$0xff]  }
 0x3d1   : > { %v3684_v42 = vpack.c.bf16 %v3493_v46, %v3543_v8  ;;  %vm3465_vm8 = vcmp.eq.s32.totalorder %v3337_v40, 0  ;;  %v3351_v48 = vand.u32 15, %v9426_v61 }
 0x3d2   : > { %v3545_v34 = vsel %vm3465_vm8, 0.0, %v3492_v58 }
 0x3d3   : > { %4195 = vmatpush1.bf16.msra.mxu1 %v6731_v59  ;;  %v3685_v57 = vpack.c.bf16 %v3491_v54, %v3545_v34  ;;  %v3483_v59 = vrot.slane %v8500_v28, 7  ;;  %vm3467_vm9 = vcmp.eq.s32.totalorder %v3351_v48, 0  ;;  %v3485_v28 = vrot.slane %v8517_v29, 7  ;;  %v6752_v29 = vld [vmem:[%s9278_s7 + $0x30] sm:$0xff]  }
 0x3d4   : > { %4196 = vmatprep.subr.bf16.mxu1 %v6736_v27 }
 0x3d5   : > { %v3490_v4 = vsel %vm958_vm0, %v3482_v36, %v3483_v59  ;;  %v3489_v27 = vsel %vm958_vm0, %v3483_v59, %v3484_v3  ;;  %v3488_v20 = vsel %vm958_vm0, %v3484_v3, %v3485_v28 }
 0x3d6   : > { %6077 = vmatmul.mubr.msk.bf16.gmra.mxu1 %vm3748_vm6, %v3681_v16  ;;  %v3547_v23 = vsel %vm3467_vm9, 0.0, %v3490_v4  ;;  %v3487_v16 = vsel %vm958_vm0, %v3485_v28, %v3486_v15  ;;  %v6756_v15 = vld [vmem:[%s9278_s7 + $0x28] sm:$0xff]   ;;  %vm6869_vm0 = vmmov 0  }
 0x3d7   : > { %3825 = vmatprep.mubr.bf16.mxu1 %v9414_v31  ;;  %4197 = vmatpush1.bf16.msra.mxu1 %v6734_v25  ;;  %v3686_v13 = vpack.c.bf16 %v3489_v27, %v3547_v23  ;;  %v3365_v25 = vand.u32 15, %v492_v43 }
 0x3d8   : > { %4198 = vmatprep.subr.bf16.mxu1 %v6739_v38  ;;  %v6758_v38 = vld [vmem:[%s9278_s7 + $0x60] sm:$0xff]  }
 0x3d9   : > { %vm3469_vm10 = vcmp.eq.s32.totalorder %v3365_v25, 0 }
 0x3da   : > { %v3549_v63 = vsel %vm3469_vm10, 0.0, %v3488_v20 }
 0x3db   : > { %4199 = vmatpush1.bf16.msra.mxu1 %v6737_v39  ;;  %v3687_v44 = vpack.c.bf16 %v3487_v16, %v3549_v63  ;;  %v6760_v39 = vld [vmem:[%s9278_s7 + $0x20] sm:$0xff]  }
 0x3dc   : > { %4200 = vmatprep.subr.bf16.mxu1 %v6742_v50  ;;  %v6764_v50 = vld [vmem:[%s9278_s7 + $0x18] sm:$0xff]  }
 0x3de   : > { %6078 = vmatmul.mubr.msk.bf16.gmra.mxu1 %vm3748_vm6, %v3682_v12  ;;  %v6768_v12 = vld [vmem:[%s9278_s7 + $0x10] sm:$0xff]  }
 0x3df   : > { %3835 = vmatprep.mubr.bf16.mxu1 %v9414_v31  ;;  %4201 = vmatpush1.bf16.msra.mxu1 %v6740_v41  ;;  %v6767_v41 = vld [vmem:[%s9278_s7 + $0xd0] sm:$0xff]  }
 0x3e0   : > { %4202 = vmatprep.subr.bf16.mxu1 %v6745_v6  ;;  %v6771_v6 = vld [vmem:[%s9278_s7 + $0xc8] sm:$0xff]  }
 0x3e3   : > { %4203 = vmatpush1.bf16.msra.mxu1 %v6743_v26  ;;  %v6773_v26 = vld [vmem:[%s9278_s7 + $0x88] sm:$0xff]  }
 0x3e6   : > { %6079 = vmatmul.mubr.msk.bf16.gmra.mxu1 %vm3748_vm6, %v3683_v35  ;;  %v6777_v35 = vld [vmem:[%s9278_s7 + $0x80] sm:$0xff]  }
 0x3e7   : > { %3845 = vmatprep.mubr.bf16.mxu1 %v9414_v31 }
 0x3ee   : > { %6080 = vmatmul.mubr.msk.bf16.gmra.mxu1 %vm3748_vm6, %v3684_v42 }
 0x3ef   : > { %3855 = vmatprep.mubr.bf16.mxu1 %v9414_v31 }
 0x3f6   : > { %6081 = vmatmul.mubr.msk.bf16.gmra.mxu1 %vm3748_vm6, %v3685_v57 }
 0x3f7   : > { %3865 = vmatprep.mubr.bf16.mxu1 %v9414_v31 }
 0x3fe   : > { %6082 = vmatmul.mubr.msk.bf16.gmra.mxu1 %vm3748_vm6, %v3686_v13 }
 0x3ff   : > { %3875 = vmatprep.mubr.bf16.mxu1 %v9414_v31 }
 0x406   : > { %6083 = vmatmul.mubr.msk.bf16.gmra.mxu1 %vm3748_vm6, %v3687_v44 }
 0x407   : > { %4220 = vmatprep.mubr.bf16.mxu1 %v9414_v31 }
 0x40e   : > { %6128 = vmatmul.mubr.msk.bf16.vlgmr.msra.gmra.mxu1 %vm3748_vm6, %v8424_v55  ;;  %v6746_v55 = vld [vmem:[%s9278_s7 + $0x78] sm:$0xff]  }
 0x40f   : > { %4230 = vmatprep.mubr.bf16.mxu1 %v9414_v31  ;;  %6342 = vmatprep.subr.bf16.mxu0 %v6746_v55 }
 0x416   : > { %6129 = vmatmul.mubr.msk.bf16.gmra.mxu1 %vm3748_vm6, %v8442_v18  ;;  %v6747_v18 = vld [vmem:[%s9278_s7 + $0xf8] sm:$0xff]  }
 0x417   : > { %4240 = vmatprep.mubr.bf16.mxu1 %v9414_v31  ;;  %6406 = vmatprep.subr.bf16.mxu1 %v6747_v18 }
 0x41e   : > { %6130 = vmatmul.mubr.msk.bf16.gmra.mxu1 %vm3748_vm6, %v8458_v1  ;;  %v6748_v1 = vld [vmem:[%s9278_s7 + $0x38] sm:$0xff]  }
 0x41f   : > { %4250 = vmatprep.mubr.bf16.mxu1 %v9414_v31  ;;  %6343 = vmatpush3.bf16.msra.mxu0 %v6748_v1 }
 0x426   : > { %6131 = vmatmul.mubr.msk.bf16.gmra.mxu1 %vm3748_vm6, %v8476_v53  ;;  %v6749_v53 = vld [vmem:[%s9278_s7 + $0xb8] sm:$0xff]  }
 0x427   : > { %4260 = vmatprep.mubr.bf16.mxu1 %v9414_v31  ;;  %6407 = vmatpush3.bf16.msra.mxu1 %v6749_v53 }
 0x42e   : > { %6132 = vmatmul.mubr.msk.bf16.gmra.mxu1 %vm3748_vm6, %v8492_v5  ;;  %v6750_v5 = vld [vmem:[%s9278_s7 + $0x70] sm:$0xff]  }
 0x42f   : > { %4270 = vmatprep.mubr.bf16.mxu1 %v9414_v31  ;;  %6344 = vmatprep.subr.bf16.mxu0 %v6750_v5 }
 0x430   : > { %6345 = vmatpush3.bf16.msra.mxu0 %v6752_v29 }
 0x436   : > { %6133 = vmatmul.mubr.msk.bf16.gmra.mxu1 %vm3748_vm6, %v8510_v37  ;;  %v6751_v37 = vld [vmem:[%s9278_s7 + $0xf0] sm:$0xff]  }
 0x437   : > { %4280 = vmatprep.mubr.bf16.mxu1 %v9414_v31  ;;  %6408 = vmatprep.subr.bf16.mxu1 %v6751_v37 }
 0x438   : > { %6409 = vmatpush3.bf16.msra.mxu1 %v6753_v22 }
 0x43e   : > { %6134 = vmatmul.mubr.msk.bf16.gmra.mxu1 %vm3748_vm6, %v8539_v21  ;;  %v6755_v21 = vld [vmem:[%s9278_s7 + $0xe8] sm:$0xff]  }
 0x43f   : > { %4290 = vmatprep.mubr.bf16.mxu1 %v9414_v31  ;;  %v6754_v31 = vld [vmem:[%s9278_s7 + $0x68] sm:$0xff]   ;;  %6410 = vmatprep.subr.bf16.mxu1 %v6755_v21 }
 0x440   : > { %6346 = vmatprep.subr.bf16.mxu0 %v6754_v31  ;;  %6411 = vmatpush3.bf16.msra.mxu1 %v6757_v14 }
 0x441   : > { %6347 = vmatpush3.bf16.msra.mxu0 %v6756_v15  ;;  %6412 = vmatprep.subr.bf16.mxu1 %v6759_v33 }
 0x442   : > { %6348 = vmatprep.subr.bf16.mxu0 %v6758_v38 }
 0x445   : > { %6349 = vmatpush3.bf16.msra.mxu0 %v6760_v39 }
 0x446   : > { %6135 = vmatmul.mubr.msk.bf16.gmra.mxu1 %vm3748_vm6, %v8566_v47  ;;  %v6761_v47 = vld [vmem:[%s9278_s7 + $0xa0] sm:$0xff]   ;;  %6350 = vmatprep.subr.bf16.mxu0 %v6762_v10 }
 0x447   : > { %6413 = vmatpush3.bf16.msra.mxu1 %v6761_v47 }
 0x448   : > { %6414 = vmatprep.subr.bf16.mxu1 %v6763_v52  ;;  %v4333_v52 = vld [vmem:[%s9277_s6] sm:$0x3] }
 0x449   : > { %6351 = vmatpush3.bf16.msra.mxu0 %v6764_v50 }
 0x44a   : > { %6352 = vmatprep.subr.bf16.mxu0 %v6766_v17 }
 0x44b   : > { %6415 = vmatpush3.bf16.msra.mxu1 %v6765_v0 }
 0x44c   : > { %6416 = vmatprep.subr.bf16.mxu1 %v6767_v41 }
 0x44d   : > { %6353 = vmatpush3.bf16.msra.mxu0 %v6768_v12 }
 0x44e   : > { %6354 = vmatprep.subr.bf16.mxu0 %v6770_v56 }
 0x44f   : > { %6417 = vmatpush3.bf16.msra.mxu1 %v6769_v60  ;;  %v9428_v60 = vsub.s32 0, %v9415_v30 }
 0x450   : > { %6418 = vmatprep.subr.bf16.mxu1 %v6771_v6 }
 0x451   : > { %6355 = vmatpush3.bf16.msra.mxu0 %v6772_v51  ;;  %v8858_v56 = vrot.slane %v4333_v52, %v9428_v60 }
 0x452   : > { %6356 = vmatprep.subr.bf16.mxu0 %v6774_v9  ;;  %v4004_v7 = vpop.f32.mrf.mxu0  ;;  %v9429_v9 = vsub.s32 1, %v9415_v30 }
 0x453   : > { %6419 = vmatpush3.bf16.msra.mxu1 %v6773_v26 }
 0x454   : > { %6420 = vmatprep.subr.bf16.mxu1 %v6775_v11  ;;  %v4006_v2 = vpop.f32.mrf.mxu0  ;;  %v8862_v11 = vrot.slane %v4333_v52, %v9429_v9 }
 0x455   : > { %6357 = vmatpush3.bf16.msra.mxu0 %v6776_v24 }
 0x456   : > { %v4008_v46 = vpop.f32.mrf.mxu0 }
 0x457   : > { %6421 = vmatpush3.bf16.msra.mxu1 %v6777_v35 }
 0x458   : > { %v4010_v40 = vpop.f32.mrf.mxu0 }
 0x45a   : > { %v4014_v58 = vpop.f32.mrf.mxu0 }
 0x45c   : > { %v4016_v57 = vpop.f32.mrf.mxu0 }
 0x45e   : > { %v4018_v59 = vpop.f32.mrf.mxu0 }
 0x460   : > { %v8797_v43 = vpop.f32.mrf.mxu0 }
 0x462   : > { %v8803_v13 = vpop.f32.mrf.mxu0 }
 0x464   : > { %v8809_v20 = vpop.f32.mrf.mxu0 }
 0x466   : > { %v8815_v44 = vpop.f32.mrf.mxu0 }
 0x468   : > { %v8821_v1 = vpop.f32.mrf.mxu0 }
 0x46a   : > { %v8827_v37 = vpop.f32.mrf.mxu0 }
 0x46c   : > { %v8833_v31 = vpop.f32.mrf.mxu0 }
 0x46e   : > { %v8839_v14 = vpop.f32.mrf.mxu0 }
 0x470   : > { %v8845_v39 = vpop.f32.mrf.mxu0 }
 0x472   : > { %v8854_v0 = vpop.f32.mrf.mxu0 }
 0x474   : > { %v8864_v24 = vpop.f32.mrf.mxu0 }
 0x48e   : > { %v3807_v62 = vpop.f32.mrf.mxu1 }
 0x48f   : > { %v4005_v50 = vadd.f32 %v4004_v7, %v3807_v62 }
 0x490   : > { %v3809_v19 = vpop.f32.mrf.mxu1 }
 0x491   : > { %v4007_v41 = vadd.f32 %v4006_v2, %v3809_v19 }
 0x492   : > { %v3811_v45 = vpop.f32.mrf.mxu1 }
 0x493   : > { %v4009_v51 = vadd.f32 %v4008_v46, %v3811_v45  ;;  %v8869_v46 = vpop.f32.mrf.mxu0 }
 0x494   : > { %v3813_v49 = vpop.f32.mrf.mxu1 }
 0x495   : > { %v4011_v7 = vadd.f32 %v4010_v40, %v3813_v49 }
 0x496   : > { %v3817_v8 = vpop.f32.mrf.mxu1 }
 0x497   : > { %v4015_v2 = vadd.f32 %v4014_v58, %v3817_v8 }
 0x498   : > { %v3819_v42 = vpop.f32.mrf.mxu1 }
 0x499   : > { %v4017_v45 = vadd.f32 %v4016_v57, %v3819_v42 }
 0x49a   : > { %v8781_v32 = vpop.f32.mrf.mxu1 }
 0x49b   : > { %v4019_v49 = vadd.f32 %v4018_v59, %v8781_v32 }
 0x49c   : > { %v8783_v36 = vpop.f32.mrf.mxu1 }
 0x49d   : > { %v4021_v42 = vadd.f32 %v8797_v43, %v8783_v36 }
 0x49e   : > { %v8785_v54 = vpop.f32.mrf.mxu1 }
 0x4a0   : > { %v8787_v34 = vpop.f32.mrf.mxu1 }
 0x4a2   : > { %v8789_v61 = vpop.f32.mrf.mxu1 }
 0x4a4   : > { %v8791_v48 = vpop.f32.mrf.mxu1 }
 0x4a6   : > { %v8793_v3 = vpop.f32.mrf.mxu1 }
 0x4a8   : > { %v8795_v4 = vpop.f32.mrf.mxu1 }
 0x4aa   : > { %v8799_v27 = vpop.f32.mrf.mxu1 }
 0x4ac   : > { %v8801_v23 = vpop.f32.mrf.mxu1 }
 0x4ae   : > { %v8805_v25 = vpop.f32.mrf.mxu1 }
 0x4b0   : > { %v8807_v28 = vpop.f32.mrf.mxu1 }
 0x4b2   : > { %v8811_v16 = vpop.f32.mrf.mxu1 }
 0x4b4   : > { %v8813_v63 = vpop.f32.mrf.mxu1 }
 0x4b6   : > { %v8817_v55 = vpop.f32.mrf.mxu1 }
 0x4b8   : > { %v8819_v18 = vpop.f32.mrf.mxu1 }
 0x4ba   : > { %v8823_v53 = vpop.f32.mrf.mxu1 }
 0x4bc   : > { %v8825_v5 = vpop.f32.mrf.mxu1 }
 0x4be   : > { %v8829_v29 = vpop.f32.mrf.mxu1 }
 0x4c0   : > { %v8831_v22 = vpop.f32.mrf.mxu1 }
 0x4c2   : > { %v8835_v21 = vpop.f32.mrf.mxu1 }
 0x4c4   : > { %v8837_v15 = vpop.f32.mrf.mxu1 }
 0x4c6   : > { %v8841_v38 = vpop.f32.mrf.mxu1 }
 0x4c8   : > { %v8843_v33 = vpop.f32.mrf.mxu1 }
 0x4ca   : > { %v8847_v47 = vpop.f32.mrf.mxu1 }
 0x4cc   : > { %v8849_v10 = vpop.f32.mrf.mxu1 }
 0x4cd   : > { %9427 = vst [vmem:[#allocation33_spill] sm:$0xff] %v8849_v10 }
 0x4ce   : > { %v4222_v17 = vpop.f32.mrf.mxu1 }
 0x4cf   : > { %v4301_v12 = vadd.f32 %v4222_v17, %v4005_v50 }
 0x4d0   : > { %v4224_v6 = vpop.f32.mrf.mxu1 }
 0x4d1   : > { %v4302_v26 = vadd.f32 %v4224_v6, %v4007_v41  ;;  %v4345_v62 = vadd.f32 %v8858_v56, %v4301_v12 }
 0x4d2   : > { %v4226_v35 = vpop.f32.mrf.mxu1 }
 0x4d3   : > { %v4303_v10 = vadd.f32 %v4226_v35, %v4009_v51  ;;  %v4346_v50 = vadd.f32 %v8862_v11, %v4302_v26  ;;  %v4377_v52 = vmax.f32 %v4345_v62, 0.0  ;;  %v8873_v26 = vpop.f32.mrf.mxu0  ;;  %v4025_v62 = vadd.f32 %v8803_v13, %v8785_v54 }
 0x4d4   : > { %v4228_v19 = vpop.f32.mrf.mxu1 }
 0x4d5   : > { %v4347_v17 = vadd.f32 %v8858_v56, %v4303_v10  ;;  %v4304_v60 = vadd.f32 %v4228_v19, %v4011_v7  ;;  %v4378_v12 = vmax.f32 %v4346_v50, 0.0  ;;  %v4027_v50 = vadd.f32 %v8809_v20, %v8787_v34 }
 0x4d6   : > { %v4232_v41 = vpop.f32.mrf.mxu1  ;;  %v4031_v20 = vadd.f32 %v8821_v1, %v8791_v48 }
 0x4d7   : > { %v4379_v6 = vmax.f32 %v4347_v17, 0.0  ;;  %v4348_v9 = vadd.f32 %v8862_v11, %v4304_v60  ;;  %v4305_v30 = vadd.f32 %v4232_v41, %v4015_v2  ;;  %v8884_v17 = vpop.f32.mrf.mxu0  ;;  %v4029_v60 = vadd.f32 %v8815_v44, %v8789_v61 }
 0x4d8   : > { %v4234_v40 = vpop.f32.mrf.mxu1 }
 0x4d9   : > { %v4441_v51 = vpack.c.bf16 %v4379_v6, %v4377_v52  ;;  %v4380_v8 = vmax.f32 %v4348_v9, 0.0  ;;  %v4306_v58 = vadd.f32 %v4234_v40, %v4017_v45  ;;  %v4349_v57 = vadd.f32 %v8858_v56, %v4305_v30 }
 0x4da   : > { %v4236_v10 = vpop.f32.mrf.mxu1 }
 0x4db   : > { %v4307_v35 = vadd.f32 %v4236_v10, %v4019_v49  ;;  %v4442_v7 = vpack.c.bf16 %v4380_v8, %v4378_v12  ;;  %v4350_v32 = vadd.f32 %v8862_v11, %v4306_v58  ;;  %v4381_v30 = vmax.f32 %v4349_v57, 0.0  ;;  %v8889_v49 = vpop.f32.mrf.mxu0 }
 0x4dc   : > { %v4238_v19 = vpop.f32.mrf.mxu1  ;;  %v4035_v8 = vadd.f32 %v8827_v37, %v8793_v3 }
 0x4dd   : > { %v4351_v59 = vadd.f32 %v8858_v56, %v4307_v35  ;;  %v4308_v2 = vadd.f32 %v4238_v19, %v4021_v42  ;;  %4585 = vmatprep.mubr.bf16.mxu0 %v4442_v7  ;;  %4811 = vmatprep.mubr.bf16.mxu1 %v4442_v7  ;;  %v4382_v41 = vmax.f32 %v4350_v32, 0.0  ;;  %v4037_v42 = vadd.f32 %v8833_v31, %v8795_v4  ;;  %v8900_v57 = vpop.f32.mrf.mxu0 }
 0x4de   : > { %v4242_v36 = vpop.f32.mrf.mxu1  ;;  %4586 = vmatmul.mubr.bf16.vlgmr.msra.gmra.mxu0 %v4441_v51  ;;  %4812 = vmatmul.mubr.bf16.vlgmr.msra.gmra.mxu1 %v4441_v51  ;;  %v4039_v7 = vadd.f32 %v8839_v14, %v8799_v27  ;;  %v4041_v31 = vadd.f32 %v8845_v39, %v8801_v23 }
 0x4df   : > { %v4383_v43 = vmax.f32 %v4351_v59, 0.0  ;;  %v4352_v54 = vadd.f32 %v8862_v11, %v4308_v2  ;;  %v4309_v13 = vadd.f32 %v4242_v36, %v4025_v62 }
 0x4e0   : > { %v4244_v45 = vpop.f32.mrf.mxu1 }
 0x4e1   : > { %v4443_v52 = vpack.c.bf16 %v4383_v43, %v4381_v30  ;;  %v4384_v6 = vmax.f32 %v4352_v54, 0.0  ;;  %v4310_v9 = vadd.f32 %v4244_v45, %v4027_v50  ;;  %v4353_v40 = vadd.f32 %v8858_v56, %v4309_v13  ;;  %v4060_v50 = vpop.f32.mrf.mxu0 }
 0x4e2   : > { %v4246_v34 = vpop.f32.mrf.mxu1  ;;  %v4045_v54 = vadd.f32 %v8854_v0, %v8805_v25  ;;  %v4047_v45 = vadd.f32 %v8864_v24, %v8807_v28  ;;  %v4049_v0 = vadd.f32 %v8869_v46, %v8811_v16  ;;  %v4051_v28 = vadd.f32 %v8873_v26, %v8813_v63 }
 0x4e3   : > { %v4311_v12 = vadd.f32 %v4246_v34, %v4029_v60  ;;  %v4444_v51 = vpack.c.bf16 %v4384_v6, %v4382_v41  ;;  %v4354_v61 = vadd.f32 %v8862_v11, %v4310_v9  ;;  %v4385_v1 = vmax.f32 %v4353_v40, 0.0  ;;  %v4064_v41 = vpop.f32.mrf.mxu0 }
 0x4e4   : > { %v4248_v58 = vpop.f32.mrf.mxu1 }
 0x4e5   : > { %v4355_v44 = vadd.f32 %v8858_v56, %v4311_v12  ;;  %v4312_v10 = vadd.f32 %v4248_v58, %v4031_v20  ;;  %4593 = vmatprep.mubr.bf16.mxu0 %v4444_v51  ;;  %4819 = vmatprep.mubr.bf16.mxu1 %v4444_v51  ;;  %v4386_v19 = vmax.f32 %v4354_v61, 0.0  ;;  %v4066_v51 = vpop.f32.mrf.mxu0 }
 0x4e6   : > { %v4252_v48 = vpop.f32.mrf.mxu1  ;;  %4594 = vmatmul.mubr.bf16.gmra.mxu0 %v4443_v52  ;;  %4820 = vmatmul.mubr.bf16.gmra.mxu1 %v4443_v52 }
 0x4e7   : > { %v4387_v35 = vmax.f32 %v4355_v44, 0.0  ;;  %v4356_v3 = vadd.f32 %v8862_v11, %v4312_v10  ;;  %v4313_v37 = vadd.f32 %v4252_v48, %v4035_v8  ;;  %v4055_v44 = vadd.f32 %v8884_v17, %v8817_v55 }
 0x4e8   : > { %v4254_v62 = vpop.f32.mrf.mxu1  ;;  %v4057_v48 = vadd.f32 %v8889_v49, %v8819_v18  ;;  %v4059_v17 = vadd.f32 %v8900_v57, %v8823_v53  ;;  %v4061_v18 = vadd.f32 %v4060_v50, %v8825_v5 }
 0x4e9   : > { %v4445_v32 = vpack.c.bf16 %v4387_v35, %v4385_v1  ;;  %v4388_v59 = vmax.f32 %v4356_v3, 0.0  ;;  %v4314_v2 = vadd.f32 %v4254_v62, %v4037_v42  ;;  %v4357_v36 = vadd.f32 %v8858_v56, %v4313_v37  ;;  %v4068_v1 = vpop.f32.mrf.mxu0 }
 0x4ea   : > { %v4256_v4 = vpop.f32.mrf.mxu1 }
 0x4eb   : > { %v4315_v30 = vadd.f32 %v4256_v4, %v4039_v7  ;;  %v4446_v43 = vpack.c.bf16 %v4388_v59, %v4386_v19  ;;  %v4358_v27 = vadd.f32 %v8862_v11, %v4314_v2  ;;  %v4389_v39 = vmax.f32 %v4357_v36, 0.0  ;;  %v4070_v59 = vpop.f32.mrf.mxu0 }
 0x4ec   : > { %v4258_v13 = vpop.f32.mrf.mxu1  ;;  %v4065_v36 = vadd.f32 %v4064_v41, %v8829_v29  ;;  %v4069_v29 = vadd.f32 %v4068_v1, %v8835_v21 }
 0x4ed   : > { %v4359_v14 = vadd.f32 %v8858_v56, %v4315_v30  ;;  %v4316_v60 = vadd.f32 %v4258_v13, %v4041_v31  ;;  %4601 = vmatprep.mubr.bf16.mxu0 %v4446_v43  ;;  %4827 = vmatprep.mubr.bf16.mxu1 %v4446_v43  ;;  %v4390_v34 = vmax.f32 %v4358_v27, 0.0  ;;  %v4067_v13 = vadd.f32 %v4066_v51, %v8831_v22 }
 0x4ee   : > { %v4262_v23 = vpop.f32.mrf.mxu1  ;;  %4602 = vmatmul.mubr.bf16.gmra.mxu0 %v4445_v32  ;;  %4828 = vmatmul.mubr.bf16.gmra.mxu1 %v4445_v32 }
 0x4ef   : > { %v4391_v52 = vmax.f32 %v4359_v14, 0.0  ;;  %v4360_v6 = vadd.f32 %v8862_v11, %v4316_v60  ;;  %v4317_v25 = vadd.f32 %v4262_v23, %v4045_v54  ;;  %v4074_v54 = vpop.f32.mrf.mxu0 }
 0x4f0   : > { %v4264_v9 = vpop.f32.mrf.mxu1 }
 0x4f1   : > { %v4447_v20 = vpack.c.bf16 %v4391_v52, %v4389_v39  ;;  %v4392_v40 = vmax.f32 %v4360_v6, 0.0  ;;  %v4318_v12 = vadd.f32 %v4264_v9, %v4047_v45  ;;  %v4361_v24 = vadd.f32 %v8858_v56, %v4317_v25  ;;  %v4076_v6 = vpop.f32.mrf.mxu0 }
 0x4f2   : > { %v4266_v8 = vpop.f32.mrf.mxu1 }
 0x4f3   : > { %v4319_v58 = vadd.f32 %v4266_v8, %v4049_v0  ;;  %v4448_v61 = vpack.c.bf16 %v4392_v40, %v4390_v34  ;;  %v4362_v16 = vadd.f32 %v8862_v11, %v4318_v12  ;;  %v4393_v26 = vmax.f32 %v4361_v24, 0.0  ;;  %v4078_v8 = vpop.f32.mrf.mxu0 }
 0x4f4   : > { %v4268_v10 = vpop.f32.mrf.mxu1  ;;  %v4071_v0 = vadd.f32 %v4070_v59, %v8837_v15 }
 0x4f5   : > { %v4363_v46 = vadd.f32 %v8858_v56, %v4319_v58  ;;  %v4320_v42 = vadd.f32 %v4268_v10, %v4051_v28  ;;  %4609 = vmatprep.mubr.bf16.mxu0 %v4448_v61  ;;  %4835 = vmatprep.mubr.bf16.mxu1 %v4448_v61  ;;  %v4394_v7 = vmax.f32 %v4362_v16, 0.0  ;;  %v4077_v28 = vadd.f32 %v4076_v6, %v8843_v33  ;;  %v4080_v1 = vpop.f32.mrf.mxu0 }
 0x4f6   : > { %v4272_v63 = vpop.f32.mrf.mxu1  ;;  %4610 = vmatmul.mubr.bf16.gmra.mxu0 %v4447_v20  ;;  %4836 = vmatmul.mubr.bf16.gmra.mxu1 %v4447_v20  ;;  %v4075_v20 = vadd.f32 %v4074_v54, %v8841_v38  ;;  %v4079_v38 = vadd.f32 %v4078_v8, %v8847_v47  ;;  %v6798_v54 = vld [vmem:[%s9280_s9 + $0x58] sm:$0xff]  }
 0x4f7   : > { %v4395_v35 = vmax.f32 %v4363_v46, 0.0  ;;  %v4364_v3 = vadd.f32 %v8862_v11, %v4320_v42  ;;  %v4321_v55 = vadd.f32 %v4272_v63, %v4055_v44 }
 0x4f8   : > { %v4274_v37 = vpop.f32.mrf.mxu1 }
 0x4f9   : > { %v4449_v62 = vpack.c.bf16 %v4395_v35, %v4393_v26  ;;  %v4396_v19 = vmax.f32 %v4364_v3, 0.0  ;;  %v4322_v32 = vadd.f32 %v4274_v37, %v4057_v48  ;;  %v4365_v49 = vadd.f32 %v8858_v56, %v4321_v55  ;;  %v9430_v26 = vld [vmem:[#allocation33_spill] sm:$0xff] }
 0x4fa   : > { %v4276_v2 = vpop.f32.mrf.mxu1  ;;  %v4081_v35 = vadd.f32 %v4080_v1, %v9430_v26 }
 0x4fb   : > { %v4323_v4 = vadd.f32 %v4276_v2, %v4059_v17  ;;  %v4450_v31 = vpack.c.bf16 %v4396_v19, %v4394_v7  ;;  %v4366_v43 = vadd.f32 %v8862_v11, %v4322_v32  ;;  %v4397_v5 = vmax.f32 %v4365_v49, 0.0 }
 0x4fc   : > { %v4278_v30 = vpop.f32.mrf.mxu1 }
 0x4fd   : > { %v4367_v53 = vadd.f32 %v8858_v56, %v4323_v4  ;;  %v4324_v57 = vadd.f32 %v4278_v30, %v4061_v18  ;;  %4617 = vmatprep.mubr.bf16.mxu0 %v4450_v31  ;;  %4843 = vmatprep.mubr.bf16.mxu1 %v4450_v31  ;;  %v4398_v41 = vmax.f32 %v4366_v43, 0.0  ;;  %v6782_v4 = vld [vmem:[%s9280_s9 + $0x78] sm:$0xff]   ;;  %v6786_v31 = vld [vmem:[%s9280_s9 + $0x70] sm:$0xff]   ;;  %v6790_v30 = vld [vmem:[%s9280_s9 + $0x68] sm:$0xff]  }
 0x4fe   : > { %v4282_v27 = vpop.f32.mrf.mxu1  ;;  %4618 = vmatmul.mubr.bf16.gmra.mxu0 %v4449_v62  ;;  %4844 = vmatmul.mubr.bf16.gmra.mxu1 %v4449_v62  ;;  %v6791_v43 = vld [vmem:[%s9280_s9 + $0x28] sm:$0xff]  }
 0x4ff   : > { %v4399_v50 = vmax.f32 %v4367_v53, 0.0  ;;  %v4368_v14 = vadd.f32 %v8862_v11, %v4324_v57  ;;  %v4325_v60 = vadd.f32 %v4282_v27, %v4065_v36  ;;  %6482 = vmatprep.subr.bf16.mxu1 %v6782_v4  ;;  %v6787_v36 = vld [vmem:[%s9280_s9 + $0x30] sm:$0xff]   ;;  %v6794_v53 = vld [vmem:[%s9280_s9 + $0x60] sm:$0xff]  }
 0x500   : > { %v4284_v45 = vpop.f32.mrf.mxu1  ;;  %v6795_v57 = vld [vmem:[%s9280_s9 + $0x20] sm:$0xff]  }
 0x501   : > { %v4451_v23 = vpack.c.bf16 %v4399_v50, %v4397_v5  ;;  %v4400_v39 = vmax.f32 %v4368_v14, 0.0  ;;  %v4326_v52 = vadd.f32 %v4284_v45, %v4067_v13  ;;  %v4369_v22 = vadd.f32 %v8858_v56, %v4325_v60  ;;  %v6799_v5 = vld [vmem:[%s9280_s9 + $0x18] sm:$0xff]   ;;  %v6802_v60 = vld [vmem:[%s9280_s9 + $0x50] sm:$0xff]  }
 0x502   : > { %v4286_v25 = vpop.f32.mrf.mxu1 }
 0x503   : > { %v4327_v9 = vadd.f32 %v4286_v25, %v4069_v29  ;;  %v4452_v34 = vpack.c.bf16 %v4400_v39, %v4398_v41  ;;  %v4370_v12 = vadd.f32 %v8862_v11, %v4326_v52  ;;  %v4401_v15 = vmax.f32 %v4369_v22, 0.0  ;;  %v6803_v39 = vld [vmem:[%s9280_s9 + $0x10] sm:$0xff]  }
 0x504   : > { %v4288_v40 = vpop.f32.mrf.mxu1 }
 0x505   : > { %v4371_v21 = vadd.f32 %v8858_v56, %v4327_v9  ;;  %v4328_v51 = vadd.f32 %v4288_v40, %v4071_v0  ;;  %4625 = vmatprep.mubr.bf16.mxu0 %v4452_v34  ;;  %4851 = vmatprep.mubr.bf16.mxu1 %v4452_v34  ;;  %v4402_v16 = vmax.f32 %v4370_v12, 0.0 }
 0x506   : > { %v4292_v24 = vpop.f32.mrf.mxu1  ;;  %4626 = vmatmul.mubr.bf16.gmra.mxu0 %v4451_v23  ;;  %4852 = vmatmul.mubr.bf16.gmra.mxu1 %v4451_v23 }
 0x507   : > { %v4403_v58 = vmax.f32 %v4371_v21, 0.0  ;;  %v4372_v61 = vadd.f32 %v8862_v11, %v4328_v51  ;;  %v4329_v44 = vadd.f32 %v4292_v24, %v4075_v20 }
 0x508   : > { %v4294_v10 = vpop.f32.mrf.mxu1 }
 0x509   : > { %v4453_v46 = vpack.c.bf16 %v4403_v58, %v4401_v15  ;;  %v4404_v42 = vmax.f32 %v4372_v61, 0.0  ;;  %v4330_v48 = vadd.f32 %v4294_v10, %v4077_v28  ;;  %v4373_v33 = vadd.f32 %v8858_v56, %v4329_v44 }
 0x50a   : > { %v4296_v63 = vpop.f32.mrf.mxu1 }
 0x50b   : > { %v4331_v3 = vadd.f32 %v4296_v63, %v4079_v38  ;;  %v4454_v55 = vpack.c.bf16 %v4404_v42, %v4402_v16  ;;  %v4374_v37 = vadd.f32 %v8862_v11, %v4330_v48  ;;  %v4405_v47 = vmax.f32 %v4373_v33, 0.0 }
 0x50c   : > { %v4298_v17 = vpop.f32.mrf.mxu1 }
 0x50d   : > { %v4375_v7 = vadd.f32 %v8858_v56, %v4331_v3  ;;  %v4332_v62 = vadd.f32 %v4298_v17, %v4081_v35  ;;  %4633 = vmatprep.mubr.bf16.mxu0 %v4454_v55  ;;  %4859 = vmatprep.mubr.bf16.mxu1 %v4454_v55  ;;  %v4406_v59 = vmax.f32 %v4374_v37, 0.0  ;;  %v6778_v56 = vld [vmem:[%s9279_s8] sm:$0xff]  }
 0x50e   : > { %4634 = vmatmul.mubr.bf16.gmra.mxu0 %v4453_v46  ;;  %4860 = vmatmul.mubr.bf16.gmra.mxu1 %v4453_v46  ;;  %v6784_v46 = vld [vmem:[%s9280_s9 + $0xf8] sm:$0xff]  }
 0x50f   : > { %v4407_v19 = vmax.f32 %v4375_v7, 0.0  ;;  %v4376_v32 = vadd.f32 %v8862_v11, %v4332_v62  ;;  %v6783_v11 = vld [vmem:[%s9280_s9 + $0x38] sm:$0xff]  }
 0x510   : > { %6483 = vmatpush3.bf16.msra.mxu1 %v6783_v11 }
 0x511   : > { %v4455_v2 = vpack.c.bf16 %v4407_v19, %v4405_v47  ;;  %v4408_v18 = vmax.f32 %v4376_v32, 0.0  ;;  %6484 = vmatprep.subr.bf16.mxu1 %v6786_v31 }
 0x513   : > { %v4456_v49 = vpack.c.bf16 %v4408_v18, %v4406_v59 }
 0x514   : > { %6485 = vmatpush3.bf16.msra.mxu1 %v6787_v36 }
 0x515   : > { %4641 = vmatprep.mubr.bf16.mxu0 %v4456_v49  ;;  %4867 = vmatprep.mubr.bf16.mxu1 %v4456_v49 }
 0x516   : > { %4642 = vmatmul.mubr.bf16.gmra.mxu0 %v4455_v2  ;;  %4868 = vmatmul.mubr.bf16.gmra.mxu1 %v4455_v2 }
 0x517   : > { %6591 = vmatprep.mubr.bf16.mxu0 %v6778_v56  ;;  %6486 = vmatprep.subr.bf16.mxu1 %v6790_v30 }
 0x518   : > { %6487 = vmatpush3.bf16.msra.mxu1 %v6791_v43 }
 0x519   : > { %6488 = vmatprep.subr.bf16.mxu1 %v6794_v53 }
 0x51c   : > { %6489 = vmatpush3.bf16.msra.mxu1 %v6795_v57 }
 0x51d   : > { %6490 = vmatprep.subr.bf16.mxu1 %v6798_v54 }
 0x520   : > { %6491 = vmatpush3.bf16.msra.mxu1 %v6799_v5 }
 0x521   : > { %6492 = vmatprep.subr.bf16.mxu1 %v6802_v60 }
 0x524   : > { %6493 = vmatpush3.bf16.msra.mxu1 %v6803_v39 }
 0x59e   : > { %v6358_v13 = vpop.f32.mrf.mxu0  ;;  %v6422_v27 = vpop.f32.mrf.mxu1 }
 0x5a0   : > { %v6359_v50 = vpop.f32.mrf.mxu0  ;;  %v6423_v14 = vpop.f32.mrf.mxu1 }
 0x5a1   : > { %v6360_v41 = vadd.f32 %v6359_v50, %v6358_v13  ;;  %v6424_v23 = vadd.f32 %v6423_v14, %v6422_v27 }
 0x5a2   : > { %v6361_v29 = vpop.f32.mrf.mxu0  ;;  %v6425_v45 = vpop.f32.mrf.mxu1 }
 0x5a3   : > { %v8989_v34 = vmax.f32 %v6360_v41, %v6424_v23 }
 0x5a4   : > { %v6362_v52 = vpop.f32.mrf.mxu0  ;;  %v6426_v6 = vpop.f32.mrf.mxu1 }
 0x5a5   : > { %v6363_v25 = vadd.f32 %v6362_v52, %v6361_v29  ;;  %v6427_v0 = vadd.f32 %v6426_v6, %v6425_v45  ;;  %v4892_v15 = vrot.slane %v8989_v34, 1 }
 0x5a6   : > { %v6364_v22 = vpop.f32.mrf.mxu0  ;;  %v6428_v9 = vpop.f32.mrf.mxu1 }
 0x5a7   : > { %v4877_v20 = vmax.f32 %v6363_v25, %v6427_v0 }
 0x5a8   : > { %v6365_v40 = vpop.f32.mrf.mxu0  ;;  %v6429_v12 = vpop.f32.mrf.mxu1 }
 0x5a9   : > { %v4893_v21 = vrot.slane %v4877_v20, 1  ;;  %v6366_v51 = vadd.f32 %v6365_v40, %v6364_v22  ;;  %v6430_v8 = vadd.f32 %v6429_v12, %v6428_v9 }
 0x5aa   : > { %v6367_v28 = vpop.f32.mrf.mxu0  ;;  %v6431_v24 = vpop.f32.mrf.mxu1 }
 0x5ab   : > { %v4878_v58 = vmax.f32 %v6366_v51, %v6430_v8  ;;  %v4922_v42 = vsel %vm1151_vm5, %v4892_v15, %v4893_v21 }
 0x5ac   : > { %v6368_v61 = vpop.f32.mrf.mxu0  ;;  %v6432_v44 = vpop.f32.mrf.mxu1  ;;  %v4924_v3 = vmax.f32 %v8989_v34, %v4922_v42 }
 0x5ad   : > { %v4894_v38 = vrot.slane %v4878_v58, 1  ;;  %v6369_v10 = vadd.f32 %v6368_v61, %v6367_v28  ;;  %v6433_v16 = vadd.f32 %v6432_v44, %v6431_v24 }
 0x5ae   : > { %v6370_v48 = vpop.f32.mrf.mxu0  ;;  %v6434_v1 = vpop.f32.mrf.mxu1 }
 0x5af   : > { %v4879_v63 = vmax.f32 %v6369_v10, %v6433_v16  ;;  %v4921_v26 = vsel %vm1151_vm5, %v4893_v21, %v4894_v38 }
 0x5b0   : > { %v6371_v35 = vpop.f32.mrf.mxu0  ;;  %v6435_v33 = vpop.f32.mrf.mxu1  ;;  %v4925_v55 = vmax.f32 %v4877_v20, %v4921_v26 }
 0x5b1   : > { %v4895_v17 = vrot.slane %v4879_v63, 1  ;;  %v6372_v37 = vadd.f32 %v6371_v35, %v6370_v48  ;;  %v6436_v7 = vadd.f32 %v6435_v33, %v6434_v1 }
 0x5b2   : > { %v8999_v62 = vpop.f32.mrf.mxu0  ;;  %v9001_v47 = vpop.f32.mrf.mxu1  ;;  %v9003_v19 = vpack.c.bf16 %v4925_v55, %v4924_v3 }
 0x5b3   : > { %v9005_v32 = vmax.f32 %v6372_v37, %v6436_v7  ;;  %v4920_v59 = vsel %vm1151_vm5, %v4894_v38, %v4895_v17 }
 0x5b4   : > { %v9009_v2 = vpop.f32.mrf.mxu0  ;;  %v9011_v18 = vpop.f32.mrf.mxu1  ;;  %v4926_v49 = vmax.f32 %v4878_v58, %v4920_v59 }
 0x5b5   : > { %v9299_v56 = vrot.slane %v9005_v32, 1 }
 0x5b6   : > { %v9014_v4 = vpop.f32.mrf.mxu0  ;;  %v9016_v11 = vpop.f32.mrf.mxu1 }
 0x5b7   : > { %v4919_v31 = vsel %vm1151_vm5, %v4895_v17, %v9299_v56 }
 0x5b8   : > { %v9022_v36 = vpop.f32.mrf.mxu0  ;;  %v9024_v30 = vpop.f32.mrf.mxu1  ;;  %v4927_v43 = vmax.f32 %v4879_v63, %v4919_v31 }
 0x5ba   : > { %v9026_v53 = vpop.f32.mrf.mxu0  ;;  %v9028_v57 = vpop.f32.mrf.mxu1  ;;  %v9030_v54 = vpack.c.bf16 %v4927_v43, %v4926_v49 }
 0x5bc   : > { %v6380_v13 = vpop.f32.mrf.mxu0  ;;  %v6444_v27 = vpop.f32.mrf.mxu1 }
 0x5be   : > { %v6382_v5 = vpop.f32.mrf.mxu0  ;;  %v6446_v50 = vpop.f32.mrf.mxu1 }
 0x5c0   : > { %v6383_v14 = vpop.f32.mrf.mxu0  ;;  %v6447_v60 = vpop.f32.mrf.mxu1 }
 0x5c2   : > { %v6385_v29 = vpop.f32.mrf.mxu0  ;;  %v6449_v45 = vpop.f32.mrf.mxu1 }
 0x5c4   : > { %v6386_v41 = vpop.f32.mrf.mxu0  ;;  %v6450_v23 = vpop.f32.mrf.mxu1 }
 0x5c6   : > { %v6388_v39 = vpop.f32.mrf.mxu0  ;;  %v6452_v52 = vpop.f32.mrf.mxu1 }
 0x5c8   : > { %v6389_v6 = vpop.f32.mrf.mxu0  ;;  %v6453_v25 = vpop.f32.mrf.mxu1 }
 0x5c9   : > { %v6390_v7 = vadd.f32 %v6389_v6, %v6388_v39  ;;  %v6454_v59 = vadd.f32 %v6453_v25, %v6452_v52  ;;  %v6381_v52 = vadd.f32 %v6380_v13, %v9026_v53  ;;  %v6445_v6 = vadd.f32 %v6444_v27, %v9028_v57 }
 0x5ca   : > { %v6391_v0 = vpop.f32.mrf.mxu0  ;;  %v6455_v22 = vpop.f32.mrf.mxu1  ;;  %v6442_v57 = vadd.f32 %v9024_v30, %v9016_v11 }
 0x5cc   : > { %v6392_v9 = vpop.f32.mrf.mxu0  ;;  %v6456_v20 = vpop.f32.mrf.mxu1 }
 0x5cd   : > { %v6393_v3 = vadd.f32 %v6392_v9, %v6391_v0  ;;  %v6457_v55 = vadd.f32 %v6456_v20, %v6455_v22 }
 0x5ce   : > { %v6394_v40 = vpop.f32.mrf.mxu0  ;;  %v6458_v12 = vpop.f32.mrf.mxu1 }
 0x5d0   : > { %v6395_v21 = vpop.f32.mrf.mxu0  ;;  %v6459_v51 = vpop.f32.mrf.mxu1 }
 0x5d1   : > { %v6396_v48 = vadd.f32 %v6395_v21, %v6394_v40  ;;  %v6460_v1 = vadd.f32 %v6459_v51, %v6458_v12  ;;  %v4887_v40 = vmax.f32 %v6393_v3, %v6457_v55  ;;  %v6384_v51 = vadd.f32 %v6383_v14, %v6382_v5 }
 0x5d2   : > { %v6397_v8 = vpop.f32.mrf.mxu0  ;;  %v6461_v28 = vpop.f32.mrf.mxu1  ;;  %v6378_v14 = vadd.f32 %v9022_v36, %v9014_v4  ;;  %v4883_v4 = vmax.f32 %v6381_v52, %v6445_v6  ;;  %v6809_v52 = vld [vmem:[%s9280_s9 + $0x88] sm:$0xff]  }
 0x5d3   : > { %v4888_v43 = vmax.f32 %v6396_v48, %v6460_v1  ;;  %v4903_v9 = vrot.slane %v4887_v40, 1  ;;  %v6806_v6 = vld [vmem:[%s9280_s9 + $0x48] sm:$0xff]  }
 0x5d4   : > { %v6398_v24 = vpop.f32.mrf.mxu0  ;;  %v6462_v58 = vpop.f32.mrf.mxu1  ;;  %6494 = vmatprep.subr.bf16.mxu1 %v6806_v6 }
 0x5d5   : > { %v6399_v38 = vadd.f32 %v6398_v24, %v6397_v8  ;;  %v6463_v10 = vadd.f32 %v6462_v58, %v6461_v28  ;;  %v6387_v24 = vadd.f32 %v6386_v41, %v6385_v29  ;;  %v6451_v58 = vadd.f32 %v6450_v23, %v6449_v45 }
 0x5d6   : > { %v6400_v61 = vpop.f32.mrf.mxu0  ;;  %v6464_v44 = vpop.f32.mrf.mxu1  ;;  %v4904_v0 = vrot.slane %v4888_v43, 1  ;;  %v6439_v23 = vadd.f32 %v9011_v18, %v9001_v47 }
 0x5d7   : > { %v4889_v17 = vmax.f32 %v6399_v38, %v6463_v10  ;;  %v4885_v25 = vmax.f32 %v6387_v24, %v6451_v58  ;;  %v4882_v38 = vmax.f32 %v6378_v14, %v6442_v57  ;;  %v6788_v24 = vld [vmem:[%s9280_s9 + $0xf0] sm:$0xff]   ;;  %v6792_v58 = vld [vmem:[%s9280_s9 + $0xe8] sm:$0xff]   ;;  %v6816_v14 = vld [vmem:[%s9280_s9 + $0x1f8] sm:$0xff]  }
 0x5d8   : > { %v6401_v16 = vpop.f32.mrf.mxu0  ;;  %v6465_v42 = vpop.f32.mrf.mxu1 }
 0x5d9   : > { %v6402_v63 = vadd.f32 %v6401_v16, %v6400_v61  ;;  %v6466_v26 = vadd.f32 %v6465_v42, %v6464_v44  ;;  %v4905_v12 = vrot.slane %v4889_v17, 1  ;;  %v6448_v61 = vadd.f32 %v6447_v60, %v6446_v50 }
 0x5da   : > { %v6403_v35 = vpop.f32.mrf.mxu0  ;;  %v6467_v33 = vpop.f32.mrf.mxu1  ;;  %v4886_v44 = vmax.f32 %v6390_v7, %v6454_v59  ;;  %v4901_v36 = vrot.slane %v4885_v25, 1  ;;  %v4899_v42 = vrot.slane %v4883_v4, 1  ;;  %v4898_v1 = vrot.slane %v4882_v38, 1 }
 0x5db   : > { %v4890_v37 = vmax.f32 %v6402_v63, %v6466_v26  ;;  %v4910_v50 = vsel %vm1151_vm5, %v4904_v0, %v4905_v12  ;;  %v4884_v27 = vmax.f32 %v6384_v51, %v6448_v61  ;;  %v9432_v7 = vrot.slane %v9005_v32, 1  ;;  %v6797_v51 = vld [vmem:[%s9280_s9 + $0xa0] sm:$0xff]   ;;  %v6800_v61 = vld [vmem:[%s9280_s9 + $0xd8] sm:$0xff]  }
 0x5dc   : > { %v6404_v49 = vpop.f32.mrf.mxu0  ;;  %v6468_v31 = vpop.f32.mrf.mxu1  ;;  %v4902_v34 = vrot.slane %v4886_v44, 1  ;;  %v4936_v41 = vmax.f32 %v4888_v43, %v4910_v50  ;;  %v6811_v50 = vld [vmem:[%s9280_s9] sm:$0xff]  }
 0x5dd   : > { %v4906_v56 = vrot.slane %v4890_v37, 1  ;;  %v6405_v8 = vadd.f32 %v6404_v49, %v6403_v35  ;;  %v6469_v28 = vadd.f32 %v6468_v31, %v6467_v33  ;;  %v4900_v10 = vrot.slane %v4884_v27, 1 }
 0x5de   : > { %v4912_v20 = vsel %vm1151_vm5, %v4902_v34, %v4903_v9  ;;  %v4913_v16 = vsel %vm1151_vm5, %v4901_v36, %v4902_v34  ;;  %v4916_v33 = vsel %vm1151_vm5, %v4898_v1, %v4899_v42  ;;  %v6817_v34 = vld [vmem:[%s9280_s9 + $0x1b8] sm:$0xff]  }
 0x5df   : > { %v4891_v21 = vmax.f32 %v6405_v8, %v6469_v28  ;;  %v4909_v39 = vsel %vm1151_vm5, %v4905_v12, %v4906_v56  ;;  %v4914_v47 = vsel %vm1151_vm5, %v4900_v10, %v4901_v36  ;;  %v4933_v48 = vmax.f32 %v4885_v25, %v4913_v16  ;;  %v6779_v28 = vld [vmem:[%s9279_s8 + $0x8] sm:$0xff]   ;;  %v6818_v36 = vld [vmem:[%s9280_s9 + $0x170] sm:$0xff]  }
 0x5e0   : > { %v4937_v13 = vmax.f32 %v4889_v17, %v4909_v39  ;;  %v4915_v63 = vsel %vm1151_vm5, %v4899_v42, %v4900_v10  ;;  %v4932_v26 = vmax.f32 %v4884_v27, %v4914_v47  ;;  %v6793_v12 = vld [vmem:[%s9280_s9 + $0xa8] sm:$0xff]   ;;  %v6819_v10 = vld [vmem:[%s9280_s9 + $0x130] sm:$0xff]   ;;  %v6828_v47 = vld [vmem:[%s9280_s9 + $0x1e0] sm:$0xff]  }
 0x5e1   : > { %v4907_v22 = vrot.slane %v4891_v21, 1  ;;  %v4931_v55 = vmax.f32 %v4883_v4, %v4915_v63  ;;  %v6808_v39 = vld [vmem:[%s9280_s9 + $0xc8] sm:$0xff]   ;;  %v6826_v63 = vld [vmem:[%s9280_s9 + $0x160] sm:$0xff]  }
 0x5e2   : > { %v4954_v11 = vpack.c.bf16 %v4937_v13, %v4936_v41  ;;  %v4952_v3 = vpack.c.bf16 %v4933_v48, %v4932_v26  ;;  %v6807_v25 = vld [vmem:[%s9280_s9 + $0x8] sm:$0xff]   ;;  %v6829_v26 = vld [vmem:[%s9280_s9 + $0x1a0] sm:$0xff]  }
 0x5e3   : > { %v4923_v29 = vsel %vm1151_vm5, %v4907_v22, %v4892_v15  ;;  %v4908_v5 = vsel %vm1151_vm5, %v4906_v56, %v4907_v22  ;;  %v4911_v15 = vsel %vm1151_vm5, %v4903_v9, %v4904_v0  ;;  %v6375_v56 = vadd.f32 %v9009_v2, %v8999_v62  ;;  %v6804_v0 = vld [vmem:[%s9280_s9 + $0xd0] sm:$0xff]   ;;  %v6812_v9 = vld [vmem:[%s9280_s9 + $0xc0] sm:$0xff]   ;;  %6495 = vmatpush3.bf16.msra.mxu1 %v6807_v25  ;;  %v6822_v16 = vld [vmem:[%s9280_s9 + $0x168] sm:$0xff]  }
 0x5e4   : > { %v4939_v60 = vmax.f32 %v4891_v21, %v4923_v29  ;;  %v4938_v53 = vmax.f32 %v4890_v37, %v4908_v5  ;;  %v4935_v30 = vmax.f32 %v4887_v40, %v4911_v15  ;;  %v4934_v62 = vmax.f32 %v4886_v44, %v4912_v20  ;;  %v6781_v40 = vld [vmem:[%s9279_s8 + $0x18] sm:$0xff]   ;;  %v6796_v21 = vld [vmem:[%s9280_s9 + $0xe0] sm:$0xff]   ;;  %v6805_v22 = vld [vmem:[%s9280_s9 + $0x90] sm:$0xff]  }
 0x5e5   : > { %v4881_v2 = vmax.f32 %v6375_v56, %v6439_v23  ;;  %v4930_v37 = vmax.f32 %v4882_v38, %v4916_v33  ;;  %v6801_v44 = vld [vmem:[%s9280_s9 + $0x98] sm:$0xff]   ;;  %v6813_v29 = vld [vmem:[%s9280_s9 + $0x80] sm:$0xff]   ;;  %v6823_v48 = vld [vmem:[%s9280_s9 + $0x128] sm:$0xff]  }
 0x5e6   : > { %v4955_v45 = vpack.c.bf16 %v4939_v60, %v4938_v53  ;;  %v4953_v18 = vpack.c.bf16 %v4935_v30, %v4934_v62  ;;  %v6810_v5 = vld [vmem:[%s9280_s9 + $0x40] sm:$0xff]   ;;  %v6814_v60 = vld [vmem:[%s9280_s9 + $0x178] sm:$0xff]   ;;  %v6824_v30 = vld [vmem:[%s9280_s9 + $0x1e8] sm:$0xff]  }
 0x5e7   : > { %v4897_v35 = vrot.slane %v4881_v2, 1  ;;  %v4951_v49 = vpack.c.bf16 %v4931_v55, %v4930_v37  ;;  %6496 = vmatprep.subr.bf16.mxu1 %v6810_v5  ;;  %v6815_v23 = vld [vmem:[%s9280_s9 + $0x138] sm:$0xff]   ;;  %v6827_v33 = vld [vmem:[%s9280_s9 + $0x120] sm:$0xff]  }
 0x5e8   : > { %6575 = vmatprep.subr.bf16.mxu0 %v4955_v45  ;;  %6497 = vmatpush3.bf16.msra.mxu1 %v6811_v50  ;;  %v6833_v55 = vld [vmem:[%s9280_s9 + $0x198] sm:$0xff]   ;;  %v6204_v5 = vld [vmem:[%s9281_s10] ss:$0 sm:$0xff] }
 0x5e9   : > { %6576 = vmatpush3.bf16.msra.mxu0 %v4955_v45  ;;  %v4917_v17 = vsel %vm1151_vm5, %v4897_v35, %v4898_v1  ;;  %v4918_v59 = vsel %vm1151_vm5, %v9432_v7, %v4897_v35  ;;  %6526 = vmatprep.subr.bf16.mxu1 %v6814_v60  ;;  %v6820_v45 = vld [vmem:[%s9280_s9 + $0x1f0] sm:$0xff]   ;;  %v6832_v35 = vld [vmem:[%s9280_s9 + $0x1d8] sm:$0xff]  }
 0x5ea   : > { %6577 = vmatprep.subr.bf16.mxu0 %v4954_v11  ;;  %v4929_v31 = vmax.f32 %v4881_v2, %v4917_v17  ;;  %v4928_v43 = vmax.f32 %v9005_v32, %v4918_v59  ;;  %v6780_v32 = vld [vmem:[%s9279_s8 + $0x10] sm:$0xff]   ;;  %v6825_v2 = vld [vmem:[%s9280_s9 + $0x1a8] sm:$0xff]   ;;  %v6831_v37 = vld [vmem:[%s9280_s9 + $0x118] sm:$0xff]  }
 0x5eb   : > { %v6836_v17 = vld [vmem:[%s9280_s9 + $0x1d0] sm:$0xff]  }
 0x5ec   : > { %v4950_v8 = vpack.c.bf16 %v4929_v31, %v4928_v43  ;;  %v6834_v7 = vld [vmem:[%s9280_s9 + $0x150] sm:$0xff]   ;;  %v6838_v43 = vld [vmem:[%s9280_s9 + $0x148] sm:$0xff]  }
 0x5ed   : > { %6578 = vmatpush3.bf16.msra.mxu0 %v4954_v11  ;;  %v6821_v11 = vld [vmem:[%s9280_s9 + $0x1b0] sm:$0xff]  }
 0x5ee   : > { %6579 = vmatprep.subr.bf16.mxu0 %v4953_v18  ;;  %v6837_v59 = vld [vmem:[%s9280_s9 + $0x190] sm:$0xff]  }
 0x5ef   : > { %v6835_v31 = vld [vmem:[%s9280_s9 + $0x110] sm:$0xff]  }
 0x5f1   : > { %6580 = vmatpush3.bf16.msra.mxu0 %v4953_v18 }
 0x5f2   : > { %6581 = vmatprep.subr.bf16.mxu0 %v4952_v3 }
 0x5f5   : > { %6582 = vmatpush3.bf16.msra.mxu0 %v4952_v3  ;;  %v6830_v3 = vld [vmem:[%s9280_s9 + $0x158] sm:$0xff]  }
 0x5f6   : > { %6583 = vmatprep.subr.bf16.mxu0 %v4951_v49 }
 0x5f9   : > { %6584 = vmatpush3.bf16.msra.mxu0 %v4951_v49  ;;  %v6840_v49 = vld [vmem:[%s9280_s9 + $0x1c8] sm:$0xff]  }
 0x5fa   : > { %6585 = vmatprep.subr.bf16.mxu0 %v4950_v8 }
 0x5fd   : > { %6586 = vmatpush3.bf16.msra.mxu0 %v4950_v8  ;;  %v6841_v8 = vld [vmem:[%s9280_s9 + $0x188] sm:$0xff]  }
 0x5fe   : > { %6587 = vmatprep.subr.bf16.mxu0 %v9030_v54 }
 0x601   : > { %6588 = vmatpush3.bf16.msra.mxu0 %v9030_v54  ;;  %v6785_v54 = vld [vmem:[%s9280_s9 + $0xb8] sm:$0xff]  }
 0x602   : > { %6589 = vmatprep.subr.bf16.mxu0 %v9003_v19 }
 0x605   : > { %6590 = vmatpush3.bf16.msra.mxu0 %v9003_v19  ;;  %v6789_v19 = vld [vmem:[%s9280_s9 + $0xb0] sm:$0xff]  }
 0x606   : > { %6504 = vmatprep.subr.bf16.mxu0 %v6784_v46  ;;  %v6844_v46 = vld [vmem:[%s9280_s9 + $0x1c0] sm:$0xff]  }
 0x608   : > { %6592 = vmatmul.mubr.bf16.vlgmr.msra.gmra.mxu0 %v6779_v28  ;;  %v6839_v28 = vld [vmem:[%s9280_s9 + $0x108] sm:$0xff]  }
 0x609   : > { %6595 = vmatprep.mubr.bf16.mxu0 %v6780_v32  ;;  %6505 = vmatpush3.bf16.msra.mxu0 %v6785_v54  ;;  %v6842_v32 = vld [vmem:[%s9280_s9 + $0x140] sm:$0xff]  }
 0x60a   : > { %6506 = vmatprep.subr.bf16.mxu0 %v6788_v24  ;;  %v6845_v54 = vld [vmem:[%s9280_s9 + $0x180] sm:$0xff]  }
 0x60b   : > { %v6843_v24 = vld [vmem:[%s9280_s9 + $0x100] sm:$0xff]  }
 0x60d   : > { %6507 = vmatpush3.bf16.msra.mxu0 %v6789_v19 }
 0x60e   : > { %6508 = vmatprep.subr.bf16.mxu0 %v6792_v58 }
 0x610   : > { %6596 = vmatmul.mubr.bf16.gmra.mxu0 %v6781_v40  ;;  %v6846_v40 = vld [vmem:[%s9282_s11 + $0x18] sm:$0xff]  }
 0x611   : > { %6509 = vmatpush3.bf16.msra.mxu0 %v6793_v12  ;;  %v6868_v12 = vmov 0.0  }
 0x612   : > { %6510 = vmatprep.subr.bf16.mxu0 %v6796_v21  ;;  %v6847_v21 = vld [vmem:[%s9282_s11 + $0x10] sm:$0xff]  }
 0x615   : > { %6511 = vmatpush3.bf16.msra.mxu0 %v6797_v51  ;;  %v6848_v51 = vld [vmem:[%s9282_s11 + $0x8] sm:$0xff]  }
 0x616   : > { %6512 = vmatprep.subr.bf16.mxu0 %v6800_v61  ;;  %v6849_v61 = vld [vmem:[%s9282_s11] sm:$0xff]  }
 0x619   : > { %6513 = vmatpush3.bf16.msra.mxu0 %v6801_v44 }
 0x61a   : > { %6514 = vmatprep.subr.bf16.mxu0 %v6804_v0 }
 0x61d   : > { %6515 = vmatpush3.bf16.msra.mxu0 %v6805_v22 }
 0x61e   : > { %6516 = vmatprep.subr.bf16.mxu0 %v6808_v39 }
 0x621   : > { %6517 = vmatpush3.bf16.msra.mxu0 %v6809_v52 }
 0x622   : > { %6518 = vmatprep.subr.bf16.mxu0 %v6812_v9 }
 0x625   : > { %6519 = vmatpush3.bf16.msra.mxu0 %v6813_v29 }
 0x626   : > { %6548 = vmatprep.subr.bf16.mxu0 %v6816_v14 }
 0x6c8   : > { %v6593_v53 = vpop.f32.mrf.mxu0 }
 0x6c9   : > { %v5175_v15 = vpack.c.bf16 %v6593_v53, %v6593_v53 }
 0x6ca   : > { %v5014_v13 = vpop.f32.mrf.mxu0 }
 0x6cb   : > { %v5173_v4 = vpack.c.bf16 %v5014_v13, %v5014_v13 }
 0x6cc   : > { %v6594_v57 = vpop.f32.mrf.mxu0 }
 0x6cd   : > { %v5176_v27 = vpack.c.bf16 %v6594_v57, %v6594_v57 }
 0x6ce   : > { %v5017_v56 = vpop.f32.mrf.mxu0 }
 0x6cf   : > { %v5174_v41 = vpack.c.bf16 %v5017_v56, %v5017_v56  ;;  %5644 = vmatprep.mubr.bf16.mxu0 %v5176_v27 }
 0x6d0   : > { %5645 = vmatmul.mubr.bf16.vlgmr.msra.gmra.mxu0 %v5175_v15  ;;  %v9162_v20 = vpop.f32.mrf.mxu0 }
 0x6d1   : > { %5604 = vmatprep.mubr.bf16.mxu1 %v5174_v41  ;;  %6549 = vmatpush3.bf16.msra.mxu0 %v6817_v34  ;;  %v5179_v19 = vpack.c.bf16 %v9162_v20, %v9162_v20 }
 0x6d2   : > { %5605 = vmatmul.mubr.bf16.vlgmr.msra.gmra.mxu1 %v5173_v4  ;;  %6550 = vmatprep.subr.bf16.mxu0 %v6820_v45  ;;  %v5030_v38 = vpop.f32.mrf.mxu0 }
 0x6d3   : > { %6527 = vmatpush3.bf16.msra.mxu1 %v6815_v23  ;;  %v5177_v58 = vpack.c.bf16 %v5030_v38, %v5030_v38 }
 0x6d4   : > { %6528 = vmatprep.subr.bf16.mxu1 %v6818_v36  ;;  %v6598_v62 = vpop.f32.mrf.mxu0 }
 0x6d5   : > { %6551 = vmatpush3.bf16.msra.mxu0 %v6821_v11  ;;  %v5180_v42 = vpack.c.bf16 %v6598_v62, %v6598_v62 }
 0x6d6   : > { %6552 = vmatprep.subr.bf16.mxu0 %v6824_v30  ;;  %v5033_v18 = vpop.f32.mrf.mxu0  ;;  %v6269_v30 = vld [vmem:[%s9283_s12] ss:$0 sm:$0xff] }
 0x6d7   : > { %6529 = vmatpush3.bf16.msra.mxu1 %v6819_v10  ;;  %v5178_v1 = vpack.c.bf16 %v5033_v18, %v5033_v18  ;;  %5724 = vmatprep.mubr.bf16.mxu0 %v5180_v42 }
 0x6d8   : > { %6530 = vmatprep.subr.bf16.mxu1 %v6822_v16 }
 0x6d9   : > { %6553 = vmatpush3.bf16.msra.mxu0 %v6825_v2  ;;  %5684 = vmatprep.mubr.bf16.mxu1 %v5178_v1 }
 0x6da   : > { %6554 = vmatprep.subr.bf16.mxu0 %v6828_v47 }
 0x6db   : > { %6531 = vmatpush3.bf16.msra.mxu1 %v6823_v48 }
 0x6dc   : > { %6532 = vmatprep.subr.bf16.mxu1 %v6826_v63 }
 0x6dd   : > { %6555 = vmatpush3.bf16.msra.mxu0 %v6829_v26 }
 0x6de   : > { %6556 = vmatprep.subr.bf16.mxu0 %v6832_v35 }
 0x6df   : > { %6533 = vmatpush3.bf16.msra.mxu1 %v6827_v33 }
 0x6e0   : > { %6534 = vmatprep.subr.bf16.mxu1 %v6830_v3 }
 0x6e1   : > { %6557 = vmatpush3.bf16.msra.mxu0 %v6833_v55 }
 0x6e2   : > { %6558 = vmatprep.subr.bf16.mxu0 %v6836_v17 }
 0x6e3   : > { %6535 = vmatpush3.bf16.msra.mxu1 %v6831_v37 }
 0x6e4   : > { %6536 = vmatprep.subr.bf16.mxu1 %v6834_v7 }
 0x6e5   : > { %6559 = vmatpush3.bf16.msra.mxu0 %v6837_v59 }
 0x6e6   : > { %6560 = vmatprep.subr.bf16.mxu0 %v6840_v49 }
 0x6e7   : > { %6537 = vmatpush3.bf16.msra.mxu1 %v6835_v31 }
 0x6e8   : > { %6538 = vmatprep.subr.bf16.mxu1 %v6838_v43 }
 0x6e9   : > { %6561 = vmatpush3.bf16.msra.mxu0 %v6841_v8 }
 0x6ea   : > { %6562 = vmatprep.subr.bf16.mxu0 %v6844_v46 }
 0x6eb   : > { %6539 = vmatpush3.bf16.msra.mxu1 %v6839_v28 }
 0x6ec   : > { %6540 = vmatprep.subr.bf16.mxu1 %v6842_v32 }
 0x6ed   : > { %6563 = vmatpush3.bf16.msra.mxu0 %v6845_v54 }
 0x6ef   : > { %6541 = vmatpush3.bf16.msra.mxu1 %v6843_v24 }
 0x6f0   : > { %5725 = vmatmul.mubr.bf16.vlgmr.msra.gmra.mxu0 %v5179_v19  ;;  %6599 = vmatprep.subr.bf16.mxu1 %v6868_v12 }
 0x6f2   : > { %5685 = vmatmul.mubr.bf16.vlgmr.msra.gmra.mxu1 %v5177_v58 }
 0x6f3   : > { %6600 = vmatpush3.bf16.msra.mxu1 %v6846_v40  ;;  %6607 = vmatprep.mubr.msk.bf16.mxu1 %vm6869_vm0, %v6868_v12 }
 0x6f4   : > { %6601 = vmatprep.subr.bf16.mxu1 %v6868_v12 }
 0x6f7   : > { %6602 = vmatpush3.bf16.msra.mxu1 %v6847_v21 }
 0x6f8   : > { %6603 = vmatprep.subr.bf16.mxu1 %v6868_v12 }
 0x6fb   : > { %6604 = vmatpush3.bf16.msra.mxu1 %v6848_v51 }
 0x6fc   : > { %6605 = vmatprep.subr.bf16.mxu1 %v6868_v12 }
 0x6ff   : > { %6606 = vmatpush3.bf16.msra.mxu1 %v6849_v61 }
 0x790   : > { %v6520_v44 = vpop.f32.mrf.mxu0 }
 0x792   : > { %v6498_v0 = vpop.f32.mrf.mxu1  ;;  %v6521_v22 = vpop.f32.mrf.mxu0 }
 0x793   : > { %v6522_v13 = vadd.f32 %v6521_v22, %v6520_v44 }
 0x794   : > { %v6499_v39 = vpop.f32.mrf.mxu1  ;;  %v6523_v52 = vpop.f32.mrf.mxu0 }
 0x795   : > { %v6500_v29 = vadd.f32 %v6499_v39, %v6498_v0 }
 0x796   : > { %v6501_v6 = vpop.f32.mrf.mxu1  ;;  %v6524_v25 = vpop.f32.mrf.mxu0 }
 0x797   : > { %v5607_v14 = vadd.f32 %v6500_v29, %v6204_v5 }
 0x798   : > { %v6502_v9 = vpop.f32.mrf.mxu1 }
 0x799   : > { %v5647_v34 = vadd.f32 %v6522_v13, %v5607_v14 }
 0x7b0   : > { %v6564_v50 = vpop.f32.mrf.mxu0 }
 0x7b2   : > { %v6542_v60 = vpop.f32.mrf.mxu1  ;;  %v6565_v53 = vpop.f32.mrf.mxu0 }
 0x7b3   : > { %v6566_v23 = vadd.f32 %v6565_v53, %v6564_v50 }
 0x7b4   : > { %v6543_v57 = vpop.f32.mrf.mxu1  ;;  %v6567_v27 = vpop.f32.mrf.mxu0 }
 0x7b5   : > { %v6544_v15 = vadd.f32 %v6543_v57, %v6542_v60 }
 0x7b6   : > { %v6545_v56 = vpop.f32.mrf.mxu1  ;;  %v6568_v45 = vpop.f32.mrf.mxu0 }
 0x7b7   : > { %v5687_v41 = vadd.f32 %v6544_v15, %v5647_v34 }
 0x7b8   : > { %v6546_v4 = vpop.f32.mrf.mxu1 }
 0x7b9   : > { %v5727_v36 = vadd.f32 %v6566_v23, %v5687_v41 }
 0x7bb   : > { %v5732_v20 = vmax.f32 %v5727_v36, 0.0 }
 0x7bd   : > { %v5741_v11 = vpack.c.bf16 %v5732_v20, %v5732_v20 }
 0x7bf   : > { %6608 = vmatmul.mubr.msk.bf16.vlgmr.msra.gmra.mxu1 %vm2458_vm2, %v5741_v11 }
 0x87f   : > { %v5810_v38 = vpop.f32.mrf.mxu1 }
 0x880   : > { %v5811_v10 = vadd.f32 %v6269_v30, %v5810_v38 }
 0x881   : > { %v6609_v16 = vpop.f32.mrf.mxu1 }
 0x882   : > { %v5816_v62 = vand.u32 2147483647, %v5811_v10  ;;  %vm5820_vm5 = vcmp.ge.f32.partialorder %v5811_v10, 0.0 }
 0x883   : > { %v5813_v2 = vpop.f32.mrf.mxu1 }
 0x884   : > { %v5817_v42 = vsub.f32 0.0, %v5816_v62 }
 0x885   : > { %v6610_v47 = vpop.f32.mrf.mxu1 }
 0x886   : > { %v5818_v18 = vmul.f32 1.442695, %v5817_v42 }
 0x888   : > { %6850 = vpow2.f32 %v5818_v18 }
 0x895   : > { %v6851_v48 = vpop.eup %6850 }
 0x896   : > { %v5822_v1 = vadd.f32 1.0, %v6851_v48  ;;  %v5821_v26 = vsel %vm5820_vm5, 1.0, %v6851_v48 }
 0x898   : > { %6852 = vrcp.f32 %v5822_v1 }
 0x8a5   : > { %v6853_v63 = vpop.eup %6852 }
 0x8a6   : > { %v5824_v35 = vmul.f32 %v6853_v63, %v5821_v26 }
 0x8a8   : > { %5825 = vst [vmem:[%s443_s23] sm:$0xff] %v5824_v35 }
 0x8a9 PF: > { %s23_s25 = sadd.s32 1, %s6865_s25  }
 0x8aa   : > { %p20_p5 = scmp.ge.s32.totalorder %s23_s25, 4  }
 0x8ac   :  { %22 = sbr.rel (!%p20_p5) target bundleno = 1 (0x1), region = 108 }

</bundles_post_ra>
